<compile_context>
chip_gen: v7x
topology: tpu7x:2x2x1
jax: 0.10.0
libtpu: 0.0.40
codegen_flags: <defaults>
</compile_context>

<pallas_src>
import jax
import jax.numpy as jnp
from jax.experimental import pallas as pl
from jax.experimental.pallas import tpu as pltpu

NEG_SLOPE = 0.2   # GATv2Conv default negative_slope
C_PAD = 128       # lane-dense padded output-feature width (>= max(hidden, embed))


# ----------------------------------------------------------------------------
# Fused Pallas kernel (one graph per grid step):
# conv0 + PReLU + conv1 + skip linear + PReLU.
# ----------------------------------------------------------------------------
def _encoder_kernel(x_ref, negmask_ref, ew_ref,
                    wlr0_ref, blr0_ref, we0_ref, att0_ref, b0_ref, pr0_ref,
                    wlr1_ref, blr1_ref, we1_ref, att1_ref, b1_ref, pr1_ref,
                    wskip_ref, bskip_ref, out_ref):
    x = x_ref[...]                        # (N, FIN) bf16 input features (unpadded K axis)
    negmask = negmask_ref[...]            # (N, N) f32: 0 on edges, -1e30 on non-edges
    ew = ew_ref[...]                      # (N, N) f32 dense edge weights [target, source]

    def gatv2(h, wlr, blr, we, att, bout):
        # merged lin_l / lin_r: one bf16 MXU matmul -> [xl | xr], split at lane 128.
        xlr = jnp.dot(h, wlr, preferred_element_type=jnp.float32) + blr   # (N, 2*C_PAD) f32
        xl = xlr[:, :C_PAD]               # source projection
        xr = xlr[:, C_PAD:]               # target projection
        # s[i, j, c] = leaky_relu(xl[j, c] + xr[i, c] + ew[i, j] * we[c])   (f32: v5e-safe)
        s = xl[None, :, :] + xr[:, None, :] + ew[:, :, None] * we[None, :, :]
        s = jnp.where(s >= 0.0, s, NEG_SLOPE * s)
        logits = jnp.sum(s * att[None, :, :], axis=-1) + negmask          # (N, N) f32
        m = jnp.max(logits, axis=-1, keepdims=True)
        p = jnp.exp(logits - m)           # non-edge entries underflow to exactly 0
        alpha = p * pl.reciprocal(jnp.sum(p, axis=-1, keepdims=True), approx=True)
        # aggregate messages on the MXU (bf16 operands, f32 accumulate) + output bias
        return jnp.dot(alpha.astype(jnp.bfloat16), xl.astype(jnp.bfloat16),
                       preferred_element_type=jnp.float32) + bout

    hid = wlr1_ref.shape[0]               # real hidden width (layer-1 contraction size)

    # layer 0 + PReLU(hidden): h stays in VMEM/vregs, never round-trips HBM.
    h = gatv2(x, wlr0_ref[...], blr0_ref[...], we0_ref[...], att0_ref[...], b0_ref[...])
    a0 = pr0_ref[...]
    h = jnp.where(h >= 0.0, h, a0 * h)    # (N, C_PAD) f32, lanes >= hid are exactly 0

    # layer 1 (contraction trimmed to hid) + skip linear on the original input + PReLU(embed)
    h1 = h[:, :hid].astype(jnp.bfloat16)
    o = gatv2(h1, wlr1_ref[...], blr1_ref[...], we1_ref[...], att1_ref[...], b1_ref[...])
    o = o + jnp.dot(x, wskip_ref[...], preferred_element_type=jnp.float32) + bskip_ref[...]
    a1 = pr1_ref[...]
    out_ref[...] = jnp.where(o >= 0.0, o, a1 * o)   # (N, C_PAD): unmasked lane-dense store


# ----------------------------------------------------------------------------
# JAX glue: sparse edge list -> dense additive mask / edge-weight matrix.
# Replicates remove_self_loops + add_self_loops(fill_value='mean') with
# per-destination mean fill, using one-hot matmuls (no TPU scatters).
# ----------------------------------------------------------------------------
def build_dense_graph(edge_index, edge_weight, num_nodes):
    src, dst = edge_index[0], edge_index[1]
    ids = jnp.arange(num_nodes)
    keep = (src != dst).astype(jnp.float32)                       # drop existing self loops
    oh_src = (src[:, None] == ids[None, :]).astype(jnp.float32)   # (E, N)
    oh_dst = (dst[:, None] == ids[None, :]).astype(jnp.float32)   # (E, N)
    w = keep * edge_weight
    adj = jnp.minimum(oh_dst.T @ (oh_src * keep[:, None]), 1.0)   # (N_tgt, N_src)
    ewd = oh_dst.T @ (oh_src * w[:, None])
    deg = jnp.sum(oh_dst * keep[:, None], axis=0)                 # incoming degree per target
    fill = jnp.sum(oh_dst * w[:, None], axis=0) / jnp.maximum(deg, 1.0)  # per-dst mean (0 if none)
    eye = jnp.eye(num_nodes, dtype=jnp.float32)
    adj = adj * (1.0 - eye) + eye                                 # add self loops
    ewd = ewd * (1.0 - eye) + fill[:, None] * eye                 # self-loop weight = per-dst mean
    negmask = (adj - 1.0) * 1e30                                  # 0 on edges, -1e30 elsewhere
    return negmask, ewd


# ----------------------------------------------------------------------------
# Parameter packing: pad ONLY the lane (output) axes to C_PAD, keep contraction
# axes at their true sizes; merge Wl|Wr (bl|br) so each layer does one
# projection matmul; MXU weights stored in bf16.
# ----------------------------------------------------------------------------
def _pad_lane(a, cols=C_PAD):
    return jnp.pad(a, ((0, 0), (0, cols - a.shape[1])))


def _pack_layer(p):
    wlr = jnp.concatenate([_pad_lane(p["wl"]), _pad_lane(p["wr"])],
                          axis=1).astype(jnp.bfloat16)             # (K, 2*C_PAD) bf16
    blr = jnp.concatenate([_pad_lane(p["bl"]), _pad_lane(p["br"])], axis=1)  # (1, 2*C_PAD) f32
    return [wlr, blr,
            _pad_lane(p["we"]), _pad_lane(p["att"]),
            _pad_lane(p["bout"]), _pad_lane(p["prelu"])]            # all (1, C_PAD) f32


# ----------------------------------------------------------------------------
# Batched forward: one pallas_call, grid over graphs, weights shared.
# ----------------------------------------------------------------------------
def gat_encoder_forward_batched(xb, edge_indexb, edge_weightb, p0, p1):
    B, N, FIN = xb.shape
    emb = p1["bout"].shape[1]
    negmask, ewd = jax.vmap(build_dense_graph, in_axes=(0, 0, None))(
        edge_indexb, edge_weightb, N)                               # (B,N,N) each

    weight_args = (_pack_layer(p0) + _pack_layer(p1)
                   + [_pad_lane(p1["wskip"]).astype(jnp.bfloat16),  # (FIN, C_PAD) bf16
                      _pad_lane(p1["bskip"])])                      # (1, C_PAD)  f32
    args = [xb.astype(jnp.bfloat16), negmask, ewd] + weight_args

    in_specs = [
        pl.BlockSpec((None, N, FIN), lambda b: (b, 0, 0)),          # x      (per graph)
        pl.BlockSpec((None, N, N),   lambda b: (b, 0, 0)),          # negmask(per graph)
        pl.BlockSpec((None, N, N),   lambda b: (b, 0, 0)),          # ew     (per graph)
    ] + [pl.BlockSpec(w.shape, lambda b: (0, 0)) for w in weight_args]  # weights: shared

    out_pad = pl.pallas_call(
        _encoder_kernel,
        out_shape=jax.ShapeDtypeStruct((B, N, C_PAD), jnp.float32),
        grid=(B,),
        in_specs=in_specs,
        out_specs=pl.BlockSpec((None, N, C_PAD), lambda b: (b, 0, 0)),
        compiler_params=pltpu.CompilerParams(
            dimension_semantics=("parallel",),       # shard graphs across TCs (v7x)
            vmem_limit_bytes=32 * 1024 * 1024),      # generous vs. actual tiny residency
    )(*args)
    return out_pad[:, :, :emb]                                      # strip lane padding


def gat_encoder_forward(x, edge_index, edge_weight, p0, p1):
    """Single-graph forward matching the PyTorch module signature (B=1 batch)."""
    out = gat_encoder_forward_batched(x[None], edge_index[None], edge_weight[None], p0, p1)
    return out[0]


# ----------------------------------------------------------------------------
# Deterministic parameter init (glorot like PyG; nn.PReLU(c) per-channel, 0.25).
# ----------------------------------------------------------------------------
def _glorot(key, shape):
    lim = (6.0 / (shape[0] + shape[1])) ** 0.5
    return jax.random.uniform(key, shape, jnp.float32, -lim, lim)


def init_gatv2_params(key, fin, cout, fin_skip=None):
    ks = jax.random.split(key, 6)
    p = dict(
        wl=_glorot(ks[0], (fin, cout)),
        bl=jnp.zeros((1, cout), jnp.float32),
        wr=_glorot(ks[1], (fin, cout)),
        br=jnp.zeros((1, cout), jnp.float32),
        we=_glorot(ks[2], (1, cout)),            # lin_edge (edge_dim=1 -> cout), no bias
        att=_glorot(ks[3], (1, cout)),           # att parameter (1, heads=1, cout)
        bout=jnp.zeros((1, cout), jnp.float32),
        prelu=jnp.full((1, cout), 0.25, jnp.float32),   # nn.PReLU(cout): per-channel, init 0.25
    )
    if fin_skip is not None:
        p["wskip"] = _glorot(ks[4], (fin_skip, cout))
        p["bskip"] = jax.random.uniform(ks[5], (1, cout), jnp.float32, -0.1, 0.1)
    return p


if __name__ == "__main__":
    # encoder config: input_size=8, hidden_size=32, embedding_size=32,
    # num_layers=2, heads=1; batch of B=4 graphs, each N=16 nodes / E=48 edges.
    B, N, FIN, HID, EMB, E = 4, 16, 8, 32, 32, 48

    key = jax.random.PRNGKey(0)
    k_x, k_src, k_off, k_ew, k_p0, k_p1 = jax.random.split(key, 6)

    xb = jax.random.normal(k_x, (B, N, FIN), jnp.float32)
    src = jax.random.randint(k_src, (B, E), 0, N)
    dst = (src + 1 + jax.random.randint(k_off, (B, E), 0, N - 1)) % N   # no self loops
    edge_index = jnp.stack([src, dst], axis=1).astype(jnp.int32)        # (B, 2, E)
    edge_weight = jax.random.uniform(k_ew, (B, E), jnp.float32)         # (B, E)

    p0 = init_gatv2_params(k_p0, FIN, HID)                  # GATv2Conv(FIN -> HID)
    p1 = init_gatv2_params(k_p1, HID, EMB, fin_skip=FIN)    # GATv2Conv(HID -> EMB) + skip

    fwd = jax.jit(gat_encoder_forward_batched)
    out = jax.block_until_ready(fwd(xb, edge_index, edge_weight, p0, p1))
    assert out.shape == (B, N, EMB) and out.dtype == jnp.float32
    assert bool(jnp.all(jnp.isfinite(out)))

    # single-graph wrapper (original module signature) agrees with batch entry 0
    out1 = jax.block_until_ready(
        jax.jit(gat_encoder_forward)(xb[0], edge_index[0], edge_weight[0], p0, p1))
    assert out1.shape == (N, EMB)
    assert bool(jnp.allclose(out1, out[0], rtol=1e-5, atol=1e-5))

    print("KERNEL_OK")
</pallas_src>

<mosaic_0001>
module attributes {stable_mosaic.version = 11 : i64} {
  func.func @_encoder_kernel(%arg0: i32, %arg1: memref<1x16x8xbf16, #tpu.memory_space<vmem>>, %arg2: memref<1x16x16xf32, #tpu.memory_space<vmem>>, %arg3: memref<1x16x16xf32, #tpu.memory_space<vmem>>, %arg4: memref<8x256xbf16, #tpu.memory_space<vmem>>, %arg5: memref<1x256xf32, #tpu.memory_space<vmem>>, %arg6: memref<1x128xf32, #tpu.memory_space<vmem>>, %arg7: memref<1x128xf32, #tpu.memory_space<vmem>>, %arg8: memref<1x128xf32, #tpu.memory_space<vmem>>, %arg9: memref<1x128xf32, #tpu.memory_space<vmem>>, %arg10: memref<32x256xbf16, #tpu.memory_space<vmem>>, %arg11: memref<1x256xf32, #tpu.memory_space<vmem>>, %arg12: memref<1x128xf32, #tpu.memory_space<vmem>>, %arg13: memref<1x128xf32, #tpu.memory_space<vmem>>, %arg14: memref<1x128xf32, #tpu.memory_space<vmem>>, %arg15: memref<1x128xf32, #tpu.memory_space<vmem>>, %arg16: memref<8x128xbf16, #tpu.memory_space<vmem>>, %arg17: memref<1x128xf32, #tpu.memory_space<vmem>>, %arg18: memref<1x16x128xf32, #tpu.memory_space<vmem>>) attributes {dimension_semantics = [#tpu.dimension_semantics<parallel>], iteration_bounds = array<i64: 4>, scalar_prefetch = 0 : i64, scratch_operands = 0 : i64, tpu.core_type = #tpu.core_type<tc>, window_params = [{transform_indices = @transform_0, window_bounds = array<i64: 1, 16, 8>}, {transform_indices = @transform_1, window_bounds = array<i64: 1, 16, 16>}, {transform_indices = @transform_2, window_bounds = array<i64: 1, 16, 16>}, {pipeline_mode = #tpu.pipeline_mode<synchronous>, transform_indices = @transform_3, window_bounds = array<i64: 8, 256>}, {pipeline_mode = #tpu.pipeline_mode<synchronous>, transform_indices = @transform_4, window_bounds = array<i64: 1, 256>}, {pipeline_mode = #tpu.pipeline_mode<synchronous>, transform_indices = @transform_5, window_bounds = array<i64: 1, 128>}, {pipeline_mode = #tpu.pipeline_mode<synchronous>, transform_indices = @transform_6, window_bounds = array<i64: 1, 128>}, {pipeline_mode = #tpu.pipeline_mode<synchronous>, transform_indices = @transform_7, window_bounds = array<i64: 1, 128>}, {pipeline_mode = #tpu.pipeline_mode<synchronous>, transform_indices = @transform_8, window_bounds = array<i64: 1, 128>}, {pipeline_mode = #tpu.pipeline_mode<synchronous>, transform_indices = @transform_9, window_bounds = array<i64: 32, 256>}, {pipeline_mode = #tpu.pipeline_mode<synchronous>, transform_indices = @transform_10, window_bounds = array<i64: 1, 256>}, {pipeline_mode = #tpu.pipeline_mode<synchronous>, transform_indices = @transform_11, window_bounds = array<i64: 1, 128>}, {pipeline_mode = #tpu.pipeline_mode<synchronous>, transform_indices = @transform_12, window_bounds = array<i64: 1, 128>}, {pipeline_mode = #tpu.pipeline_mode<synchronous>, transform_indices = @transform_13, window_bounds = array<i64: 1, 128>}, {pipeline_mode = #tpu.pipeline_mode<synchronous>, transform_indices = @transform_14, window_bounds = array<i64: 1, 128>}, {pipeline_mode = #tpu.pipeline_mode<synchronous>, transform_indices = @transform_15, window_bounds = array<i64: 8, 128>}, {pipeline_mode = #tpu.pipeline_mode<synchronous>, transform_indices = @transform_16, window_bounds = array<i64: 1, 128>}, {transform_indices = @transform_17, window_bounds = array<i64: 1, 16, 128>}]} {
    %c0 = arith.constant 0 : index
    %c0_0 = arith.constant 0 : index
    %c0_1 = arith.constant 0 : index
    %0 = vector.load %arg1[%c0, %c0_0, %c0_1] : memref<1x16x8xbf16, #tpu.memory_space<vmem>>, vector<1x16x8xbf16>
    %1 = vector.shape_cast %0 : vector<1x16x8xbf16> to vector<16x8xbf16>
    %c0_2 = arith.constant 0 : index
    %c0_3 = arith.constant 0 : index
    %c0_4 = arith.constant 0 : index
    %2 = vector.load %arg2[%c0_2, %c0_3, %c0_4] : memref<1x16x16xf32, #tpu.memory_space<vmem>>, vector<1x16x16xf32>
    %3 = vector.shape_cast %2 : vector<1x16x16xf32> to vector<16x16xf32>
    %c0_5 = arith.constant 0 : index
    %c0_6 = arith.constant 0 : index
    %c0_7 = arith.constant 0 : index
    %4 = vector.load %arg3[%c0_5, %c0_6, %c0_7] : memref<1x16x16xf32, #tpu.memory_space<vmem>>, vector<1x16x16xf32>
    %5 = vector.shape_cast %4 : vector<1x16x16xf32> to vector<16x16xf32>
    %c0_8 = arith.constant 0 : index
    %c0_9 = arith.constant 0 : index
    %6 = vector.load %arg4[%c0_8, %c0_9] : memref<8x256xbf16, #tpu.memory_space<vmem>>, vector<8x256xbf16>
    %c0_10 = arith.constant 0 : index
    %c0_11 = arith.constant 0 : index
    %7 = vector.load %arg5[%c0_10, %c0_11] : memref<1x256xf32, #tpu.memory_space<vmem>>, vector<1x256xf32>
    %c0_12 = arith.constant 0 : index
    %c0_13 = arith.constant 0 : index
    %8 = vector.load %arg6[%c0_12, %c0_13] : memref<1x128xf32, #tpu.memory_space<vmem>>, vector<1x128xf32>
    %c0_14 = arith.constant 0 : index
    %c0_15 = arith.constant 0 : index
    %9 = vector.load %arg7[%c0_14, %c0_15] : memref<1x128xf32, #tpu.memory_space<vmem>>, vector<1x128xf32>
    %c0_16 = arith.constant 0 : index
    %c0_17 = arith.constant 0 : index
    %10 = vector.load %arg8[%c0_16, %c0_17] : memref<1x128xf32, #tpu.memory_space<vmem>>, vector<1x128xf32>
    %cst = arith.constant dense<0.000000e+00> : vector<16x256xf32>
    %11 = tpu.matmul %1, %6, %cst {dimension_numbers = #tpu.dot_dimension_numbers<[1], [0], [0], [1], [0, 0, 1, 1], [], []>} : vector<16x8xbf16>, vector<8x256xbf16>, vector<16x256xf32> -> vector<16x256xf32>
    %12 = vector.broadcast %7 : vector<1x256xf32> to vector<16x256xf32>
    %13 = arith.addf %11, %12 : vector<16x256xf32>
    %14 = vector.extract_strided_slice %13 {offsets = [0, 0], sizes = [16, 128], strides = [1, 1]} : vector<16x256xf32> to vector<16x128xf32>
    %15 = vector.extract_strided_slice %13 {offsets = [0, 128], sizes = [16, 128], strides = [1, 1]} : vector<16x256xf32> to vector<16x128xf32>
    %16 = vector.shape_cast %14 : vector<16x128xf32> to vector<1x16x128xf32>
    %17 = vector.shape_cast %15 : vector<16x128xf32> to vector<16x1x128xf32>
    %18 = vector.broadcast %16 : vector<1x16x128xf32> to vector<16x16x128xf32>
    %19 = vector.broadcast %17 : vector<16x1x128xf32> to vector<16x16x128xf32>
    %20 = arith.addf %18, %19 : vector<16x16x128xf32>
    %21 = vector.shape_cast %5 : vector<16x16xf32> to vector<16x16x1xf32>
    %22 = vector.shape_cast %8 : vector<1x128xf32> to vector<1x1x128xf32>
    %23 = vector.broadcast %21 : vector<16x16x1xf32> to vector<16x16x128xf32>
    %24 = vector.broadcast %22 : vector<1x1x128xf32> to vector<16x16x128xf32>
    %25 = arith.mulf %23, %24 : vector<16x16x128xf32>
    %26 = arith.addf %20, %25 : vector<16x16x128xf32>
    %cst_18 = arith.constant 0.000000e+00 : f32
    %27 = vector.broadcast %cst_18 : f32 to vector<16x16x128xf32>
    %28 = arith.cmpf oge, %26, %27 : vector<16x16x128xf32>
    %cst_19 = arith.constant 2.000000e-01 : f32
    %29 = vector.broadcast %cst_19 : f32 to vector<16x16x128xf32>
    %30 = arith.mulf %29, %26 : vector<16x16x128xf32>
    %31 = arith.select %28, %26, %30 : vector<16x16x128xi1>, vector<16x16x128xf32>
    %32 = vector.shape_cast %9 : vector<1x128xf32> to vector<1x1x128xf32>
    %33 = vector.broadcast %32 : vector<1x1x128xf32> to vector<16x16x128xf32>
    %34 = arith.mulf %31, %33 : vector<16x16x128xf32>
    %cst_20 = arith.constant dense<0.000000e+00> : vector<16x16xf32>
    %35 = vector.multi_reduction <add>, %34, %cst_20 [2] : vector<16x16x128xf32> to vector<16x16xf32>
    %36 = arith.addf %35, %3 : vector<16x16xf32>
    %cst_21 = arith.constant dense<0xFF800000> : vector<16xf32>
    %37 = vector.multi_reduction <maximumf>, %36, %cst_21 [1] : vector<16x16xf32> to vector<16xf32>
    %38 = vector.shape_cast %37 : vector<16xf32> to vector<16x1xf32>
    %39 = vector.broadcast %38 : vector<16x1xf32> to vector<16x16xf32>
    %40 = arith.subf %36, %39 : vector<16x16xf32>
    %41 = math.exp %40 : vector<16x16xf32>
    %cst_22 = arith.constant dense<0.000000e+00> : vector<16xf32>
    %42 = vector.multi_reduction <add>, %41, %cst_22 [1] : vector<16x16xf32> to vector<16xf32>
    %43 = vector.shape_cast %42 : vector<16xf32> to vector<16x1xf32>
    %44 = tpu.reciprocal %43 {approx = true} : vector<16x1xf32> -> vector<16x1xf32>
    %45 = vector.broadcast %44 : vector<16x1xf32> to vector<16x16xf32>
    %46 = arith.mulf %41, %45 : vector<16x16xf32>
    %47 = arith.truncf %46 : vector<16x16xf32> to vector<16x16xbf16>
    %48 = arith.truncf %14 : vector<16x128xf32> to vector<16x128xbf16>
    %cst_23 = arith.constant dense<0.000000e+00> : vector<16x128xf32>
    %49 = tpu.matmul %47, %48, %cst_23 {dimension_numbers = #tpu.dot_dimension_numbers<[1], [0], [0], [1], [0, 0, 1, 1], [], []>} : vector<16x16xbf16>, vector<16x128xbf16>, vector<16x128xf32> -> vector<16x128xf32>
    %50 = vector.broadcast %10 : vector<1x128xf32> to vector<16x128xf32>
    %51 = arith.addf %49, %50 : vector<16x128xf32>
    %c0_24 = arith.constant 0 : index
    %c0_25 = arith.constant 0 : index
    %52 = vector.load %arg9[%c0_24, %c0_25] : memref<1x128xf32, #tpu.memory_space<vmem>>, vector<1x128xf32>
    %cst_26 = arith.constant 0.000000e+00 : f32
    %53 = vector.broadcast %cst_26 : f32 to vector<16x128xf32>
    %54 = arith.cmpf oge, %51, %53 : vector<16x128xf32>
    %55 = vector.broadcast %52 : vector<1x128xf32> to vector<16x128xf32>
    %56 = arith.mulf %55, %51 : vector<16x128xf32>
    %57 = arith.select %54, %51, %56 : vector<16x128xi1>, vector<16x128xf32>
    %58 = vector.extract_strided_slice %57 {offsets = [0, 0], sizes = [16, 32], strides = [1, 1]} : vector<16x128xf32> to vector<16x32xf32>
    %59 = arith.truncf %58 : vector<16x32xf32> to vector<16x32xbf16>
    %c0_27 = arith.constant 0 : index
    %c0_28 = arith.constant 0 : index
    %60 = vector.load %arg10[%c0_27, %c0_28] : memref<32x256xbf16, #tpu.memory_space<vmem>>, vector<32x256xbf16>
    %c0_29 = arith.constant 0 : index
    %c0_30 = arith.constant 0 : index
    %61 = vector.load %arg11[%c0_29, %c0_30] : memref<1x256xf32, #tpu.memory_space<vmem>>, vector<1x256xf32>
    %c0_31 = arith.constant 0 : index
    %c0_32 = arith.constant 0 : index
    %62 = vector.load %arg12[%c0_31, %c0_32] : memref<1x128xf32, #tpu.memory_space<vmem>>, vector<1x128xf32>
    %c0_33 = arith.constant 0 : index
    %c0_34 = arith.constant 0 : index
    %63 = vector.load %arg13[%c0_33, %c0_34] : memref<1x128xf32, #tpu.memory_space<vmem>>, vector<1x128xf32>
    %c0_35 = arith.constant 0 : index
    %c0_36 = arith.constant 0 : index
    %64 = vector.load %arg14[%c0_35, %c0_36] : memref<1x128xf32, #tpu.memory_space<vmem>>, vector<1x128xf32>
    %cst_37 = arith.constant dense<0.000000e+00> : vector<16x256xf32>
    %65 = tpu.matmul %59, %60, %cst_37 {dimension_numbers = #tpu.dot_dimension_numbers<[1], [0], [0], [1], [0, 0, 1, 1], [], []>} : vector<16x32xbf16>, vector<32x256xbf16>, vector<16x256xf32> -> vector<16x256xf32>
    %66 = vector.broadcast %61 : vector<1x256xf32> to vector<16x256xf32>
    %67 = arith.addf %65, %66 : vector<16x256xf32>
    %68 = vector.extract_strided_slice %67 {offsets = [0, 0], sizes = [16, 128], strides = [1, 1]} : vector<16x256xf32> to vector<16x128xf32>
    %69 = vector.extract_strided_slice %67 {offsets = [0, 128], sizes = [16, 128], strides = [1, 1]} : vector<16x256xf32> to vector<16x128xf32>
    %70 = vector.shape_cast %68 : vector<16x128xf32> to vector<1x16x128xf32>
    %71 = vector.shape_cast %69 : vector<16x128xf32> to vector<16x1x128xf32>
    %72 = vector.broadcast %70 : vector<1x16x128xf32> to vector<16x16x128xf32>
    %73 = vector.broadcast %71 : vector<16x1x128xf32> to vector<16x16x128xf32>
    %74 = arith.addf %72, %73 : vector<16x16x128xf32>
    %75 = vector.shape_cast %5 : vector<16x16xf32> to vector<16x16x1xf32>
    %76 = vector.shape_cast %62 : vector<1x128xf32> to vector<1x1x128xf32>
    %77 = vector.broadcast %75 : vector<16x16x1xf32> to vector<16x16x128xf32>
    %78 = vector.broadcast %76 : vector<1x1x128xf32> to vector<16x16x128xf32>
    %79 = arith.mulf %77, %78 : vector<16x16x128xf32>
    %80 = arith.addf %74, %79 : vector<16x16x128xf32>
    %cst_38 = arith.constant 0.000000e+00 : f32
    %81 = vector.broadcast %cst_38 : f32 to vector<16x16x128xf32>
    %82 = arith.cmpf oge, %80, %81 : vector<16x16x128xf32>
    %cst_39 = arith.constant 2.000000e-01 : f32
    %83 = vector.broadcast %cst_39 : f32 to vector<16x16x128xf32>
    %84 = arith.mulf %83, %80 : vector<16x16x128xf32>
    %85 = arith.select %82, %80, %84 : vector<16x16x128xi1>, vector<16x16x128xf32>
    %86 = vector.shape_cast %63 : vector<1x128xf32> to vector<1x1x128xf32>
    %87 = vector.broadcast %86 : vector<1x1x128xf32> to vector<16x16x128xf32>
    %88 = arith.mulf %85, %87 : vector<16x16x128xf32>
    %cst_40 = arith.constant dense<0.000000e+00> : vector<16x16xf32>
    %89 = vector.multi_reduction <add>, %88, %cst_40 [2] : vector<16x16x128xf32> to vector<16x16xf32>
    %90 = arith.addf %89, %3 : vector<16x16xf32>
    %cst_41 = arith.constant dense<0xFF800000> : vector<16xf32>
    %91 = vector.multi_reduction <maximumf>, %90, %cst_41 [1] : vector<16x16xf32> to vector<16xf32>
    %92 = vector.shape_cast %91 : vector<16xf32> to vector<16x1xf32>
    %93 = vector.broadcast %92 : vector<16x1xf32> to vector<16x16xf32>
    %94 = arith.subf %90, %93 : vector<16x16xf32>
    %95 = math.exp %94 : vector<16x16xf32>
    %cst_42 = arith.constant dense<0.000000e+00> : vector<16xf32>
    %96 = vector.multi_reduction <add>, %95, %cst_42 [1] : vector<16x16xf32> to vector<16xf32>
    %97 = vector.shape_cast %96 : vector<16xf32> to vector<16x1xf32>
    %98 = tpu.reciprocal %97 {approx = true} : vector<16x1xf32> -> vector<16x1xf32>
    %99 = vector.broadcast %98 : vector<16x1xf32> to vector<16x16xf32>
    %100 = arith.mulf %95, %99 : vector<16x16xf32>
    %101 = arith.truncf %100 : vector<16x16xf32> to vector<16x16xbf16>
    %102 = arith.truncf %68 : vector<16x128xf32> to vector<16x128xbf16>
    %cst_43 = arith.constant dense<0.000000e+00> : vector<16x128xf32>
    %103 = tpu.matmul %101, %102, %cst_43 {dimension_numbers = #tpu.dot_dimension_numbers<[1], [0], [0], [1], [0, 0, 1, 1], [], []>} : vector<16x16xbf16>, vector<16x128xbf16>, vector<16x128xf32> -> vector<16x128xf32>
    %104 = vector.broadcast %64 : vector<1x128xf32> to vector<16x128xf32>
    %105 = arith.addf %103, %104 : vector<16x128xf32>
    %c0_44 = arith.constant 0 : index
    %c0_45 = arith.constant 0 : index
    %106 = vector.load %arg16[%c0_44, %c0_45] : memref<8x128xbf16, #tpu.memory_space<vmem>>, vector<8x128xbf16>
    %cst_46 = arith.constant dense<0.000000e+00> : vector<16x128xf32>
    %107 = tpu.matmul %1, %106, %cst_46 {dimension_numbers = #tpu.dot_dimension_numbers<[1], [0], [0], [1], [0, 0, 1, 1], [], []>} : vector<16x8xbf16>, vector<8x128xbf16>, vector<16x128xf32> -> vector<16x128xf32>
    %108 = arith.addf %105, %107 : vector<16x128xf32>
    %c0_47 = arith.constant 0 : index
    %c0_48 = arith.constant 0 : index
    %109 = vector.load %arg17[%c0_47, %c0_48] : memref<1x128xf32, #tpu.memory_space<vmem>>, vector<1x128xf32>
    %110 = vector.broadcast %109 : vector<1x128xf32> to vector<16x128xf32>
    %111 = arith.addf %108, %110 : vector<16x128xf32>
    %c0_49 = arith.constant 0 : index
    %c0_50 = arith.constant 0 : index
    %112 = vector.load %arg15[%c0_49, %c0_50] : memref<1x128xf32, #tpu.memory_space<vmem>>, vector<1x128xf32>
    %cst_51 = arith.constant 0.000000e+00 : f32
    %113 = vector.broadcast %cst_51 : f32 to vector<16x128xf32>
    %114 = arith.cmpf oge, %111, %113 : vector<16x128xf32>
    %115 = vector.broadcast %112 : vector<1x128xf32> to vector<16x128xf32>
    %116 = arith.mulf %115, %111 : vector<16x128xf32>
    %117 = arith.select %114, %111, %116 : vector<16x128xi1>, vector<16x128xf32>
    %c0_52 = arith.constant 0 : index
    %c0_53 = arith.constant 0 : index
    %c0_54 = arith.constant 0 : index
    %118 = vector.load %arg18[%c0_52, %c0_53, %c0_54] : memref<1x16x128xf32, #tpu.memory_space<vmem>>, vector<1x16x128xf32>
    %119 = vector.shape_cast %118 : vector<1x16x128xf32> to vector<16x128xf32>
    %120 = vector.shape_cast %117 : vector<16x128xf32> to vector<1x16x128xf32>
    tpu.vector_store %arg18[%c0_52, %c0_53, %c0_54], %120 {strides = array<i32>} : memref<1x16x128xf32, #tpu.memory_space<vmem>>, vector<1x16x128xf32>,
    return
  }
  func.func @transform_0(%arg0: i32) -> (i32, i32, i32) {
    %c0_i32 = arith.constant 0 : i32
    %c0_i32_0 = arith.constant 0 : i32
    %c0_i32_1 = arith.constant 0 : i32
    return %arg0, %c0_i32, %c0_i32_0 : i32, i32, i32
  }
  func.func @transform_1(%arg0: i32) -> (i32, i32, i32) {
    %c0_i32 = arith.constant 0 : i32
    %c0_i32_0 = arith.constant 0 : i32
    %c0_i32_1 = arith.constant 0 : i32
    return %arg0, %c0_i32, %c0_i32_0 : i32, i32, i32
  }
  func.func @transform_2(%arg0: i32) -> (i32, i32, i32) {
    %c0_i32 = arith.constant 0 : i32
    %c0_i32_0 = arith.constant 0 : i32
    %c0_i32_1 = arith.constant 0 : i32
    return %arg0, %c0_i32, %c0_i32_0 : i32, i32, i32
  }
  func.func @transform_3(%arg0: i32) -> (i32, i32) {
    %c0_i32 = arith.constant 0 : i32
    %c0_i32_0 = arith.constant 0 : i32
    %c0_i32_1 = arith.constant 0 : i32
    return %c0_i32, %c0_i32_0 : i32, i32
  }
  func.func @transform_4(%arg0: i32) -> (i32, i32) {
    %c0_i32 = arith.constant 0 : i32
    %c0_i32_0 = arith.constant 0 : i32
    %c0_i32_1 = arith.constant 0 : i32
    return %c0_i32, %c0_i32_0 : i32, i32
  }
  func.func @transform_5(%arg0: i32) -> (i32, i32) {
    %c0_i32 = arith.constant 0 : i32
    %c0_i32_0 = arith.constant 0 : i32
    %c0_i32_1 = arith.constant 0 : i32
    return %c0_i32, %c0_i32_0 : i32, i32
  }
  func.func @transform_6(%arg0: i32) -> (i32, i32) {
    %c0_i32 = arith.constant 0 : i32
    %c0_i32_0 = arith.constant 0 : i32
    %c0_i32_1 = arith.constant 0 : i32
    return %c0_i32, %c0_i32_0 : i32, i32
  }
  func.func @transform_7(%arg0: i32) -> (i32, i32) {
    %c0_i32 = arith.constant 0 : i32
    %c0_i32_0 = arith.constant 0 : i32
    %c0_i32_1 = arith.constant 0 : i32
    return %c0_i32, %c0_i32_0 : i32, i32
  }
  func.func @transform_8(%arg0: i32) -> (i32, i32) {
    %c0_i32 = arith.constant 0 : i32
    %c0_i32_0 = arith.constant 0 : i32
    %c0_i32_1 = arith.constant 0 : i32
    return %c0_i32, %c0_i32_0 : i32, i32
  }
  func.func @transform_9(%arg0: i32) -> (i32, i32) {
    %c0_i32 = arith.constant 0 : i32
    %c0_i32_0 = arith.constant 0 : i32
    %c0_i32_1 = arith.constant 0 : i32
    return %c0_i32, %c0_i32_0 : i32, i32
  }
  func.func @transform_10(%arg0: i32) -> (i32, i32) {
    %c0_i32 = arith.constant 0 : i32
    %c0_i32_0 = arith.constant 0 : i32
    %c0_i32_1 = arith.constant 0 : i32
    return %c0_i32, %c0_i32_0 : i32, i32
  }
  func.func @transform_11(%arg0: i32) -> (i32, i32) {
    %c0_i32 = arith.constant 0 : i32
    %c0_i32_0 = arith.constant 0 : i32
    %c0_i32_1 = arith.constant 0 : i32
    return %c0_i32, %c0_i32_0 : i32, i32
  }
  func.func @transform_12(%arg0: i32) -> (i32, i32) {
    %c0_i32 = arith.constant 0 : i32
    %c0_i32_0 = arith.constant 0 : i32
    %c0_i32_1 = arith.constant 0 : i32
    return %c0_i32, %c0_i32_0 : i32, i32
  }
  func.func @transform_13(%arg0: i32) -> (i32, i32) {
    %c0_i32 = arith.constant 0 : i32
    %c0_i32_0 = arith.constant 0 : i32
    %c0_i32_1 = arith.constant 0 : i32
    return %c0_i32, %c0_i32_0 : i32, i32
  }
  func.func @transform_14(%arg0: i32) -> (i32, i32) {
    %c0_i32 = arith.constant 0 : i32
    %c0_i32_0 = arith.constant 0 : i32
    %c0_i32_1 = arith.constant 0 : i32
    return %c0_i32, %c0_i32_0 : i32, i32
  }
  func.func @transform_15(%arg0: i32) -> (i32, i32) {
    %c0_i32 = arith.constant 0 : i32
    %c0_i32_0 = arith.constant 0 : i32
    %c0_i32_1 = arith.constant 0 : i32
    return %c0_i32, %c0_i32_0 : i32, i32
  }
  func.func @transform_16(%arg0: i32) -> (i32, i32) {
    %c0_i32 = arith.constant 0 : i32
    %c0_i32_0 = arith.constant 0 : i32
    %c0_i32_1 = arith.constant 0 : i32
    return %c0_i32, %c0_i32_0 : i32, i32
  }
  func.func @transform_17(%arg0: i32) -> (i32, i32, i32) {
    %c0_i32 = arith.constant 0 : i32
    %c0_i32_0 = arith.constant 0 : i32
    %c0_i32_1 = arith.constant 0 : i32
    return %arg0, %c0_i32, %c0_i32_0 : i32, i32, i32
  }
}

</mosaic_0001>

<bundles_post_ra>
// kernel: gat_encoder_forward_batched.1
= control target key start
LH: loop header
LB: loop body
LE: loop exit
PB: predicated region body
PF: predicated region fallthrough
CT: control target
= control target key end

     0   :  { %s7282_s0 = inlined_call_operand.vmem [shape: bf16[4,16,8], index: 0, kind: input, shape index: {}]   ;;  %s7283_s1 = inlined_call_operand.vmem [shape: f32[4,16,16], index: 1, kind: input, shape index: {}]   ;;  %s7284_s2 = inlined_call_operand.vmem [shape: f32[4,16,16], index: 2, kind: input, shape index: {}]   ;;  %s7285_s3 = inlined_call_operand.vmem [shape: bf16[8,256], index: 3, kind: input, shape index: {}]   ;;  %s7286_s4 = inlined_call_operand.vmem [shape: f32[1,256], index: 4, kind: input, shape index: {}]   ;;  %s7287_s5 = inlined_call_operand.vmem [shape: f32[1,128], index: 5, kind: input, shape index: {}]   ;;  %s7288_s6 = inlined_call_operand.vmem [shape: f32[1,128], index: 6, kind: input, shape index: {}]   ;;  %s7289_s7 = inlined_call_operand.vmem [shape: f32[1,128], index: 7, kind: input, shape index: {}]   ;;  %s7290_s8 = inlined_call_operand.vmem [shape: f32[1,128], index: 8, kind: input, shape index: {}]   ;;  %s7291_s9 = inlined_call_operand.vmem [shape: bf16[32,256], index: 9, kind: input, shape index: {}]   ;;  %s7292_s10 = inlined_call_operand.vmem [shape: f32[1,256], index: 10, kind: input, shape index: {}]   ;;  %s7293_s11 = inlined_call_operand.vmem [shape: f32[1,128], index: 11, kind: input, shape index: {}]   ;;  %s7294_s12 = inlined_call_operand.vmem [shape: f32[1,128], index: 12, kind: input, shape index: {}]   ;;  %s7295_s13 = inlined_call_operand.vmem [shape: f32[1,128], index: 13, kind: input, shape index: {}]   ;;  %s7296_s14 = inlined_call_operand.vmem [shape: f32[1,128], index: 14, kind: input, shape index: {}]   ;;  %s7297_s15 = inlined_call_operand.vmem [shape: bf16[8,128], index: 15, kind: input, shape index: {}]   ;;  %s7298_s16 = inlined_call_operand.vmem [shape: f32[1,128], index: 16, kind: input, shape index: {}]   ;;  %s7299_s17 = inlined_call_operand.hbm [shape: f32[4,16,128], index: 17, kind: output, shape index: {}]  }
   0x1   :  { %7409 = sst [smem:[#allocation88_spill]] %s7282_s0 }
   0x2   :  { %7410 = sst [smem:[#allocation89_spill]] %s7283_s1 }
   0x3   :  { %7411 = sst [smem:[#allocation90_spill]] %s7285_s3 }
   0x4   :  { %22 = vsyncpa [#allocation3], 0 }
   0x5   :  { %24 = vsyncpa [#allocation3 + $0x1], 0  ;;  %s5291_s24 = smov 0   ;;  %s5293_s25 = smov 0  }
   0x6   :  { %s5295_s26 = smov 0   ;;  %s5297_s27 = smov 0  }
   0x7 LB: > { %7412 = sst [smem:[#allocation5_spill]] %s5188_s26  ;;  %s5312_s28 = sadd.s32 4294967295, %s5192_s27   ;;  %s5192_s27 = sphi %s5297_s27, %s7612_s27   ;;  %s5188_s26 = sphi %s5295_s26, %s7614_s26   ;;  %s5184_s25 = sphi %s5293_s25, %s7616_s25   ;;  %s5180_s24 = sphi %s5291_s24, %s7615_s24  }
   0x8   : > { %s4871_s29 = sadd.s32 4294967294, %s5192_s27   ;;  %s5316_s0 = sadd.s32 1, %s5192_s27  }
   0x9   : > { %7413 = sst [smem:[#allocation6_spill]] %s5316_s0  ;;  %s409_s30 = sadd.s32 1, %s5188_s26 }
   0xa   : > { %s406_s18 = ssub.s32 %s5192_s27, %s5316_s0  ;;  %p419_p0 = scmp.ne.s32.totalorder %s5188_s26, %s5184_s25 }
   0xb   : > { %p407_p1 = scmp.eq.s32.totalorder %s406_s18, 0  ;;  %p420_p2 = scmp.eq.s32.totalorder %s5312_s28, 3 }
   0xc   : > { %p425_p3 = scmp.ne.s32.totalorder %s5184_s25, %s5180_s24  ;;  %p426_p4 = scmp.eq.s32.totalorder %s4871_s29, 3 }
   0xd   : > { %s5327_s19 = scalar_select %p407_p1, %s5188_s26, %s409_s30  }
   0xe   : > { %p5329_p5 = por %p420_p2, %p419_p0  ;;  %p5333_p6 = por %p426_p4, %p425_p3 }
   0xf   : > { %7414 = sst [smem:[#allocation7_spill]] %s5327_s19  ;;  %p4874_p7 = scmp.ge.s32.totalorder %s5192_s27, 1 }
  0x10   : > { %p510_p8 = scmp.lt.s32.totalorder %s5192_s27, 5 }
  0x12   : > { %p511_p9 = pnand %p4874_p7, %p510_p8 }
  0x14   : > { %514 = sbr.rel (%p511_p9) target bundleno = 2992 (0xbb0), region = 88 }
  0x1b   : > { %s7417_s3 = sld [smem:[#allocation90_spill]]  ;;  %vm624_vm0 = vcmask 1043456   ;;  %p572_p10 = scmp.lt.s32.totalorder %s5312_s28, 3  ;;  %v600_v1 = vlaneseq  ;;  %v5194_v4 = vmov 0   ;;  %vm7394_vm1 = vcmask 64512  }
  0x1c   : > { %663 = vmatprep.mubr.bf16.mxu0 %v5194_v4  ;;  %4983 = vset.pattern.permute.xlu1 %v5194_v4  ;;  %s7420_s22 = sld [smem:[#allocation88_spill]]  ;;  %s7428_s19 = sld [smem:[#allocation89_spill]]  ;;  %v7303_v49 = vmov 0.0  }
  0x1d   : > { %s5344_s23 = scalar_select %p572_p10, %s5312_s28, 3  ;;  %v5346_v5 = vshrl.u32 %v600_v1, 7  ;;  %v1701_v6 = vand.u32 127, %v600_v1  ;;  %4982 = vset.pattern.permute.xlu0 %v5194_v4  ;;  %4919 = vmatprep.subr.bf16.mxu1 %v7303_v49 }
  0x1f   : > { %s4909_s29 = sshll.u32 %s5344_s23, 3  ;;  %s4910_s30 = sshll.u32 %s5344_s23, 4  ;;  %v5353_v8 = vsub.s32 0, %v5346_v5  ;;  %v5356_v9 = vsub.s32 1, %v5346_v5  ;;  %v5359_v10 = vsub.s32 %v1701_v6, %v5346_v5  ;;  %v1706_v11 = vadd.s32 4294967288, %v1701_v6 }
  0x20   : > { %s586_s0 = scalar_lea.vmem %s7284_s2, %s4910_s30  ;;  %v5381_v20 = vsub.s32 2, %v5346_v5  ;;  %v5386_v23 = vsub.s32 3, %v5346_v5  ;;  %v5391_v26 = vsub.s32 4, %v5346_v5  ;;  %v5396_v29 = vsub.s32 5, %v5346_v5 }
  0x21   : > { %v594_v0 = vld [vmem:[%s7417_s3] sm:$0xff]  ;;  %7418 = vst [vmem:[#allocation8_spill] sm:$0xff] %v5356_v9  ;;  %7419 = vst [vmem:[#allocation9_spill] sm:$0xff] %v5359_v10  ;;  %v5372_v13 = vsub.s32 %v1706_v11, %v5346_v5  ;;  %v593_v17 = vld [vmem:[%s586_s0 + $0x8] sm:$0xff]  ;;  %v5401_v32 = vsub.s32 6, %v5346_v5  ;;  %v5406_v35 = vsub.s32 7, %v5346_v5 }
  0x22   : > { %v4884_v2 = vcombine.high %v594_v0, %v594_v0  ;;  %v4883_v3 = vcombine.low %v594_v0, %v594_v0  ;;  %s5364_s3 = scalar_lea.vmem %s7420_s22, %s4909_s29  ;;  %v592_v12 = vld [vmem:[%s586_s0] sm:$0xff]  ;;  %v977_v18 = vrot.slane %v593_v17, %v5353_v8  ;;  %v988_v19 = vrot.slane %v593_v17, %v5356_v9  ;;  %7422 = vst [vmem:[#allocation11_spill] sm:$0xff] %v5381_v20  ;;  %s581_s29 = scalar_lea.vmem %s7428_s19, %s4910_s30 }
  0x23   : > { %7421 = vst [vmem:[#allocation10_spill] sm:$0xff] %v5372_v13  ;;  %v4986_v14 = vld [vmem:[%s5364_s3] sm:$0xff]   ;;  %v900_v15 = vrot.slane %v592_v12, %v5356_v9  ;;  %v889_v16 = vrot.slane %v592_v12, %v5353_v8  ;;  %v911_v21 = vrot.slane %v592_v12, %v5381_v20  ;;  %v999_v22 = vrot.slane %v593_v17, %v5381_v20  ;;  %v591_v40 = vld [vmem:[%s581_s29 + $0x8] sm:$0xff]  ;;  %s4912_s0 = sshll.u32 %s5312_s28, 8  ;;  %s5198_s22 = smov [#allocation2]  }
  0x24   : > { %4885 = vmatprep.subr.msk.bf16.mxu0 %vm624_vm0, %v4884_v2  ;;  %v626_v7 = vsel %vm624_vm0, %v4883_v3, 0  ;;  %7423 = vst [vmem:[#allocation12_spill] sm:$0xff] %v5386_v23  ;;  %v922_v24 = vrot.slane %v592_v12, %v5386_v23  ;;  %v1010_v25 = vrot.slane %v593_v17, %v5386_v23  ;;  %7424 = vst [vmem:[#allocation13_spill] sm:$0xff] %v5391_v26  ;;  %v590_v38 = vld [vmem:[%s581_s29] sm:$0xff]  ;;  %s7237_s21 = scalar_lea.hbm %s7299_s17, %s4912_s0  ;;  %s5134_s26 = sshll.u32 %s5198_s22, 4  ;;  %s5135_s26 = int_to_ptr.vmem [resolvable:$false] %s5134_s26 }
  0x25   : > { %632 = vmatpush1.bf16.msra.mxu0 %v626_v7  ;;  %902 = vbcast.lane.b32.xlu1 %v900_v15, 256  ;;  %v933_v27 = vrot.slane %v592_v12, %v5391_v26  ;;  %v1021_v28 = vrot.slane %v593_v17, %v5391_v26  ;;  %7425 = vst [vmem:[#allocation14_spill] sm:$0xff] %v5396_v29  ;;  %7426 = vst [vmem:[#allocation15_spill] sm:$0xff] %v5401_v32  ;;  %s5136_s0 = scalar_lea.vmem %s5135_s26, 512 }
  0x26   : > { %891 = vbcast.lane.b32.xlu0 %v889_v16, 256  ;;  %v944_v30 = vrot.slane %v592_v12, %v5396_v29  ;;  %v1032_v31 = vrot.slane %v593_v17, %v5396_v29  ;;  %v955_v33 = vrot.slane %v592_v12, %v5401_v32  ;;  %v1043_v34 = vrot.slane %v593_v17, %v5401_v32 }
  0x27   : > { %7427 = vst [vmem:[#allocation16_spill] sm:$0xff] %v5406_v35  ;;  %v966_v36 = vrot.slane %v592_v12, %v5406_v35  ;;  %v1054_v37 = vrot.slane %v593_v17, %v5406_v35  ;;  %v1335_v39 = vrot.slane %v590_v38, %v5353_v8  ;;  %v1346_v41 = vrot.slane %v590_v38, %v5356_v9 }
  0x28   : > { %4886 = vmatmul.mubr.msk.bf16.vlgmr.msra.gmra.mrb[0].mxu0 %vm7394_vm1, %v4986_v14  ;;  %v1423_v42 = vrot.slane %v591_v40, %v5353_v8  ;;  %v1434_v43 = vrot.slane %v591_v40, %v5356_v9  ;;  %v1357_v44 = vrot.slane %v590_v38, %v5381_v20  ;;  %v1445_v45 = vrot.slane %v591_v40, %v5381_v20 }
  0x29   : > { %2925 = vmatprep.mubr.bf16.mxu0 %v5194_v4  ;;  %906 = vbcast.lane.b32.xlu1 %v900_v15, 264  ;;  %v1368_v46 = vrot.slane %v590_v38, %v5386_v23  ;;  %v1456_v47 = vrot.slane %v591_v40, %v5386_v23  ;;  %v1379_v48 = vrot.slane %v590_v38, %v5391_v26  ;;  %v5196_v15 = vmov 1966171168  }
  0x2a   : > { %895 = vbcast.lane.b32.xlu0 %v889_v16, 264  ;;  %v1467_v50 = vrot.slane %v591_v40, %v5391_v26  ;;  %v1390_v51 = vrot.slane %v590_v38, %v5396_v29  ;;  %v1478_v52 = vrot.slane %v591_v40, %v5396_v29  ;;  %v1401_v53 = vrot.slane %v590_v38, %v5401_v32 }
  0x2b   : > { %v1489_v54 = vrot.slane %v591_v40, %v5401_v32  ;;  %v1412_v55 = vrot.slane %v590_v38, %v5406_v35  ;;  %v1500_v56 = vrot.slane %v591_v40, %v5406_v35  ;;  %v678_v16 = vunpack.c.l.s4 %v5196_v15 }
  0x2d   : > { %983 = vbcast.lane.b32.xlu1 %v977_v18, 264 }
  0x2e   : > { %979 = vbcast.lane.b32.xlu0 %v977_v18, 256  ;;  %v595_v18 = vld [vmem:[%s7286_s4] sm:$0x3] }
  0x31   : > { %994 = vbcast.lane.b32.xlu1 %v988_v19, 264 }
  0x32   : > { %990 = vbcast.lane.b32.xlu0 %v988_v19, 256  ;;  %v679_v19 = vunpack.c.0.s8 %v678_v16 }
  0x35   : > { %917 = vbcast.lane.b32.xlu1 %v911_v21, 264 }
  0x36   : > { %913 = vbcast.lane.b32.xlu0 %v911_v21, 256 }
  0x39   : > { %1005 = vbcast.lane.b32.xlu1 %v999_v22, 264 }
  0x3a   : > { %1001 = vbcast.lane.b32.xlu0 %v999_v22, 256  ;;  %v607_v22 = vrot.slane %v595_v18, %v5356_v9 }
  0x3d   : > { %928 = vbcast.lane.b32.xlu1 %v922_v24, 264 }
  0x3e   : > { %924 = vbcast.lane.b32.xlu0 %v922_v24, 256  ;;  %v603_v24 = vrot.slane %v595_v18, %v5353_v8 }
  0x41   : > { %1016 = vbcast.lane.b32.xlu1 %v1010_v25, 264 }
  0x42   : > { %1012 = vbcast.lane.b32.xlu0 %v1010_v25, 256  ;;  %v5476_v25 = vsub.s32 %v679_v19, %v5346_v5  ;;  %v5490_v5 = vld [vmem:[%s7287_s5] ss:$0 sm:$0xff] }
  0x44   : > { %7448 = vst [vmem:[#allocation36_spill] sm:$0xff] %v5476_v25 }
  0x45   : > { %939 = vbcast.lane.b32.xlu1 %v933_v27, 264 }
  0x46   : > { %935 = vbcast.lane.b32.xlu0 %v933_v27, 256 }
  0x49   : > { %1027 = vbcast.lane.b32.xlu1 %v1021_v28, 264 }
  0x4a   : > { %1023 = vbcast.lane.b32.xlu0 %v1021_v28, 256 }
  0x4d   : > { %950 = vbcast.lane.b32.xlu1 %v944_v30, 264 }
  0x4e   : > { %946 = vbcast.lane.b32.xlu0 %v944_v30, 256 }
  0x51   : > { %1038 = vbcast.lane.b32.xlu1 %v1032_v31, 264 }
  0x52   : > { %1034 = vbcast.lane.b32.xlu0 %v1032_v31, 256 }
  0x55   : > { %961 = vbcast.lane.b32.xlu1 %v955_v33, 264 }
  0x56   : > { %957 = vbcast.lane.b32.xlu0 %v955_v33, 256 }
  0x59   : > { %1049 = vbcast.lane.b32.xlu1 %v1043_v34, 264 }
  0x5a   : > { %1045 = vbcast.lane.b32.xlu0 %v1043_v34, 256 }
  0x5d   : > { %972 = vbcast.lane.b32.xlu1 %v966_v36, 264 }
  0x5e   : > { %968 = vbcast.lane.b32.xlu0 %v966_v36, 256 }
  0x61   : > { %1060 = vbcast.lane.b32.xlu1 %v1054_v37, 264 }
  0x62   : > { %1056 = vbcast.lane.b32.xlu0 %v1054_v37, 256 }
  0x65   : > { %1337 = vbcast.lane.b32.xlu1 %v1335_v39, 256 }
  0x66   : > { %1341 = vbcast.lane.b32.xlu0 %v1335_v39, 264 }
  0x69   : > { %1348 = vbcast.lane.b32.xlu1 %v1346_v41, 256 }
  0x6a   : > { %1425 = vbcast.lane.b32.xlu0 %v1423_v42, 256 }
  0x6d   : > { %1352 = vbcast.lane.b32.xlu1 %v1346_v41, 264 }
  0x6e   : > { %1436 = vbcast.lane.b32.xlu0 %v1434_v43, 256 }
  0x71   : > { %1429 = vbcast.lane.b32.xlu1 %v1423_v42, 264 }
  0x72   : > { %1359 = vbcast.lane.b32.xlu0 %v1357_v44, 256 }
  0x75   : > { %1440 = vbcast.lane.b32.xlu1 %v1434_v43, 264 }
  0x76   : > { %1447 = vbcast.lane.b32.xlu0 %v1445_v45, 256 }
  0x79   : > { %1363 = vbcast.lane.b32.xlu1 %v1357_v44, 264 }
  0x7a   : > { %1370 = vbcast.lane.b32.xlu0 %v1368_v46, 256 }
  0x7d   : > { %1451 = vbcast.lane.b32.xlu1 %v1445_v45, 264 }
  0x7e   : > { %1458 = vbcast.lane.b32.xlu0 %v1456_v47, 256 }
  0x81   : > { %1374 = vbcast.lane.b32.xlu1 %v1368_v46, 264 }
  0x82   : > { %1381 = vbcast.lane.b32.xlu0 %v1379_v48, 256 }
  0x85   : > { %1462 = vbcast.lane.b32.xlu1 %v1456_v47, 264 }
  0x86   : > { %1469 = vbcast.lane.b32.xlu0 %v1467_v50, 256 }
  0x89   : > { %1385 = vbcast.lane.b32.xlu1 %v1379_v48, 264 }
  0x8a   : > { %1392 = vbcast.lane.b32.xlu0 %v1390_v51, 256 }
  0x8d   : > { %1473 = vbcast.lane.b32.xlu1 %v1467_v50, 264 }
  0x8e   : > { %1480 = vbcast.lane.b32.xlu0 %v1478_v52, 256 }
  0x91   : > { %1396 = vbcast.lane.b32.xlu1 %v1390_v51, 264 }
  0x92   : > { %1403 = vbcast.lane.b32.xlu0 %v1401_v53, 256 }
  0x95   : > { %1484 = vbcast.lane.b32.xlu1 %v1478_v52, 264 }
  0x96   : > { %1491 = vbcast.lane.b32.xlu0 %v1489_v54, 256 }
  0x97   : > { %v5432_v57 = vpop.permute.xlu1 %902 }
  0x98   : > { %7429 = vst [vmem:[#allocation17_spill] sm:$0xff] %v5432_v57  ;;  %v5446_v0 = vpop.permute.xlu0 %891  ;;  %v5499_v47 = vmul.f32 %v5490_v5, %v5432_v57 }
  0x99   : > { %1407 = vbcast.lane.b32.xlu1 %v1401_v53, 264  ;;  %7436 = vst [vmem:[#allocation24_spill] sm:$0xff] %v5446_v0  ;;  %v1068_v48 = vmul.f32 %v5490_v5, %v5446_v0 }
  0x9a   : > { %1414 = vbcast.lane.b32.xlu0 %v1412_v55, 256 }
  0x9b   : > { %v5434_v58 = vpop.permute.xlu1 %906 }
  0x9c   : > { %7430 = vst [vmem:[#allocation18_spill] sm:$0xff] %v5434_v58  ;;  %v5450_v2 = vpop.permute.xlu0 %895 }
  0x9d   : > { %1495 = vbcast.lane.b32.xlu1 %v1489_v54, 264  ;;  %7438 = vst [vmem:[#allocation26_spill] sm:$0xff] %v5450_v2  ;;  %v5511_v54 = vmul.f32 %v5490_v5, %v5434_v58  ;;  %v1069_v16 = vmul.f32 %v5490_v5, %v5450_v2 }
  0x9e   : > { %1502 = vbcast.lane.b32.xlu0 %v1500_v56, 256 }
  0x9f   : > { %v5436_v59 = vpop.permute.xlu1 %983 }
  0xa0   : > { %7431 = vst [vmem:[#allocation19_spill] sm:$0xff] %v5436_v59  ;;  %v5454_v4 = vpop.permute.xlu0 %979  ;;  %v5522_v18 = vmul.f32 %v5490_v5, %v5436_v59 }
  0xa1   : > { %1418 = vbcast.lane.b32.xlu1 %v1412_v55, 264  ;;  %7440 = vst [vmem:[#allocation28_spill] sm:$0xff] %v5454_v4 }
  0xa3   : > { %v5438_v60 = vpop.permute.xlu1 %994 }
  0xa4   : > { %7432 = vst [vmem:[#allocation20_spill] sm:$0xff] %v5438_v60  ;;  %v5458_v7 = vpop.permute.xlu0 %990 }
  0xa5   : > { %1506 = vbcast.lane.b32.xlu1 %v1500_v56, 264  ;;  %7442 = vst [vmem:[#allocation30_spill] sm:$0xff] %v5458_v7 }
  0xa7   : > { %v5440_v61 = vpop.permute.xlu1 %917 }
  0xa8   : > { %7433 = vst [vmem:[#allocation21_spill] sm:$0xff] %v5440_v61  ;;  %v5462_v12 = vpop.permute.xlu0 %913 }
  0xa9   : > { %7444 = vst [vmem:[#allocation32_spill] sm:$0xff] %v5462_v12 }
  0xab   : > { %v5442_v62 = vpop.permute.xlu1 %1005 }
  0xac   : > { %7434 = vst [vmem:[#allocation22_spill] sm:$0xff] %v5442_v62  ;;  %v5466_v17 = vpop.permute.xlu0 %1001 }
  0xad   : > { %7446 = vst [vmem:[#allocation34_spill] sm:$0xff] %v5466_v17 }
  0xaf   : > { %v5444_v63 = vpop.permute.xlu1 %928 }
  0xb0   : > { %7435 = vst [vmem:[#allocation23_spill] sm:$0xff] %v5444_v63  ;;  %v5478_v28 = vpop.permute.xlu0 %924 }
  0xb1   : > { %7449 = vst [vmem:[#allocation37_spill] sm:$0xff] %v5478_v28 }
  0xb3   : > { %v5448_v1 = vpop.permute.xlu1 %1016 }
  0xb4   : > { %7437 = vst [vmem:[#allocation25_spill] sm:$0xff] %v5448_v1  ;;  %v5503_v50 = vpop.permute.xlu0 %1012 }
  0xb5   : > { %7451 = vst [vmem:[#allocation39_spill] sm:$0xff] %v5503_v50 }
  0xb7   : > { %v5452_v3 = vpop.permute.xlu1 %939 }
  0xb8   : > { %7439 = vst [vmem:[#allocation27_spill] sm:$0xff] %v5452_v3 }
  0xbb   : > { %v5456_v6 = vpop.permute.xlu1 %1027 }
  0xbc   : > { %7441 = vst [vmem:[#allocation29_spill] sm:$0xff] %v5456_v6 }
  0xbf   : > { %v5460_v11 = vpop.permute.xlu1 %950 }
  0xc0   : > { %7443 = vst [vmem:[#allocation31_spill] sm:$0xff] %v5460_v11 }
  0xc3   : > { %v5464_v14 = vpop.permute.xlu1 %1038 }
  0xc4   : > { %7445 = vst [vmem:[#allocation33_spill] sm:$0xff] %v5464_v14 }
  0xc7   : > { %v5471_v21 = vpop.permute.xlu1 %961 }
  0xc8   : > { %7447 = vst [vmem:[#allocation35_spill] sm:$0xff] %v5471_v21 }
  0xcb   : > { %v5480_v34 = vpop.permute.xlu1 %1049 }
  0xcc   : > { %7450 = vst [vmem:[#allocation38_spill] sm:$0xff] %v5480_v34 }
  0xcf   : > { %v5506_v53 = vpop.permute.xlu1 %972 }
  0xd0   : > { %7452 = vst [vmem:[#allocation40_spill] sm:$0xff] %v5506_v53 }
  0xfb   : > { %v665_v27 = vpop.f32.mrb[0].mxu0 }
  0xfc   : > { %v667_v30 = vpop.f32.mrb[1].mxu0  ;;  %v5482_v36 = vadd.f32 %v665_v27, %v603_v24 }
  0xfd   : > { %v668_v31 = vadd.f32 %v667_v30, %v607_v22  ;;  %v669_v33 = vpop.f32.mrb[2].mxu0 }
  0xfe   : > { %v5484_v37 = vadd.f32 %v669_v33, %v603_v24  ;;  %v671_v38 = vpop.f32.mrb[3].mxu0  ;;  %v1084_v24 = vmul.f32 %v5490_v5, %v5454_v4  ;;  %v5532_v33 = vmul.f32 %v5490_v5, %v5458_v7  ;;  %v5560_v7 = vpop.permute.xlu1 %1060 }
  0xff   : > { %v676_v39 = vcombine.high %v668_v31, %v668_v31  ;;  %v683_v40 = vrot.slane %v668_v31, %v5476_v25  ;;  %v672_v41 = vadd.f32 %v671_v38, %v607_v22  ;;  %v5536_v38 = vmul.f32 %v5490_v5, %v5440_v61  ;;  %7454 = vst [vmem:[#allocation42_spill] sm:$0xff] %v5560_v7 }
 0x100   : > { %v2482_v42 = vpack.c.bf16 %v5484_v37, %v5482_v36 }
 0x101   : > { %v690_v43 = vrot.slane %v676_v39, %v5476_v25  ;;  %v699_v44 = vrot.slane %v683_v40, %v5476_v25  ;;  %v725_v45 = vcombine.high %v672_v41, %v672_v41  ;;  %v732_v46 = vrot.slane %v672_v41, %v5476_v25 }
 0x102   : > { %4920 = vmatpush3.bf16.msra.mxu1 %v2482_v42  ;;  %v691_v27 = vcombine.high %v683_v40, %v683_v40  ;;  %v1072_v40 = vmul.f32 %v5490_v5, %v5462_v12  ;;  %v5547_v42 = vmul.f32 %v5490_v5, %v5466_v17  ;;  %v5564_v17 = vmul.f32 %v5490_v5, %v5478_v28 }
 0x103   : > { %v692_v51 = vcombine.high %v690_v43, %v690_v43  ;;  %v706_v52 = vrot.slane %v690_v43, %v5476_v25  ;;  %4925 = vmatprep.subr.bf16.mxu1 %v7303_v49  ;;  %v777_v55 = vrot.slane %v699_v44, %v5353_v8  ;;  %v739_v56 = vrot.slane %v725_v45, %v5476_v25 }
 0x104   : > { %v5516_v15 = vrot.slane %v732_v46, %v5476_v25  ;;  %v740_v49 = vcombine.high %v732_v46, %v732_v46  ;;  %v5569_v4 = vrot.slane %v691_v27, %v5476_v25  ;;  %v721_v59 = vcombine.high %v699_v44, %v699_v44 }
 0x105   : > { %v5525_v19 = vrot.slane %v692_v51, %v5476_v25  ;;  %v722_v22 = vcombine.high %v706_v52, %v706_v52  ;;  %v854_v30 = vadd.f32 %v777_v55, %v5482_v36  ;;  %v741_v31 = vcombine.high %v739_v56, %v739_v56  ;;  %v5554_v51 = vpop.permute.xlu0 %935 }
 0x106   : > { %v5541_v41 = vrot.slane %v739_v56, %v5476_v25  ;;  %v809_v45 = vrot.slane %v5516_v15, %v5353_v8  ;;  %7453 = vst [vmem:[#allocation41_spill] sm:$0xff] %v5554_v51  ;;  %v1099_v27 = vmul.f32 %v5490_v5, %v5560_v7  ;;  %v5588_v44 = vrot.slane %v740_v49, %v5476_v25 }
 0x107   : > { %v724_v39 = vcombine.high %v5525_v19, %v5525_v19  ;;  %v5550_v43 = vrot.slane %v741_v31, %v5476_v25  ;;  %v801_v61 = vrot.slane %v722_v22, %v5353_v8  ;;  %v1076_v31 = vmul.f32 %v5490_v5, %v5554_v51 }
 0x108   : > { %v771_v56 = vcombine.high %v5541_v41, %v5541_v41  ;;  %v870_v22 = vadd.f32 %v809_v45, %v5482_v36  ;;  %v855_v57 = vadd.f32 %v777_v55, %v5484_v37  ;;  %v785_v49 = vrot.slane %v721_v59, %v5353_v8  ;;  %v5620_v59 = vld [vmem:[%s7288_s6] ss:$0 sm:$0xff] }
 0x109   : > { %v805_v12 = vrot.slane %v724_v39, %v5353_v8  ;;  %v773_v46 = vcombine.high %v5550_v43, %v5550_v43  ;;  %v871_v39 = vadd.f32 %v809_v45, %v5484_v37  ;;  %v5576_v2 = vadd.f32 %v801_v61, %v5484_v37  ;;  %v5628_v23 = vpop.permute.xlu0 %1023 }
 0x10a   : > { %v5579_v28 = vadd.f32 %v801_v61, %v5482_v36  ;;  %v833_v58 = vrot.slane %v771_v56, %v5353_v8  ;;  %v723_v61 = vcombine.high %v5569_v4, %v5569_v4  ;;  %v781_v56 = vrot.slane %v5569_v4, %v5353_v8  ;;  %7455 = vst [vmem:[#allocation43_spill] sm:$0xff] %v5628_v23 }
 0x10b   : > { %v5583_v51 = vadd.f32 %v805_v12, %v5484_v37  ;;  %v5591_v0 = vadd.f32 %v805_v12, %v5482_v36  ;;  %v837_v45 = vrot.slane %v773_v46, %v5353_v8  ;;  %v1101_v55 = vadd.f32 %v1069_v16, %v855_v57 }
 0x10c   : > { %v5600_v35 = vadd.f32 %v833_v58, %v5484_v37  ;;  %v5603_v7 = vadd.f32 %v833_v58, %v5482_v36  ;;  %v793_v25 = vrot.slane %v706_v52, %v5353_v8  ;;  %v770_v32 = vcombine.high %v5516_v15, %v5516_v15 }
 0x10d   : > { %v885_v12 = vadd.f32 %v837_v45, %v5484_v37  ;;  %v5608_v46 = vadd.f32 %v837_v45, %v5482_v36  ;;  %v1100_v4 = vadd.f32 %v1068_v48, %v854_v30  ;;  %v1116_v29 = vadd.f32 %v1084_v24, %v870_v22 }
 0x10e   : > { %v813_v26 = vrot.slane %v5588_v44, %v5353_v8  ;;  %vm1133_vm2 = vcmp.ge.f32.partialorder %v1101_v55, 0.0  ;;  %v1165_v45 = vmul.f32 0.2, %v1101_v55  ;;  %v856_v48 = vadd.f32 %v781_v56, %v5482_v36 }
 0x10f   : > { %v5615_v58 = vadd.f32 %v1099_v27, %v885_v12  ;;  %vm1132_vm3 = vcmp.ge.f32.partialorder %v1100_v4, 0.0  ;;  %v1164_v57 = vmul.f32 0.2, %v1100_v4  ;;  %vm1148_vm4 = vcmp.ge.f32.partialorder %v1116_v29, 0.0 }
 0x110   : > { %v1180_v52 = vmul.f32 0.2, %v1116_v29  ;;  %v1197_v16 = vsel %vm1133_vm2, %v1101_v55, %v1165_v45  ;;  %v858_v15 = vadd.f32 %v785_v49, %v5482_v36  ;;  %v857_v24 = vadd.f32 %v781_v56, %v5484_v37 }
 0x111   : > { %v817_v30 = vrot.slane %v770_v32, %v5353_v8  ;;  %v1235_v22 = vmul.f32 %v5620_v59, %v1197_v16  ;;  %v1196_v27 = vsel %vm1132_vm3, %v1100_v4, %v1164_v57  ;;  %v862_v12 = vadd.f32 %v793_v25, %v5482_v36 }
 0x112   : > { %v1234_v20 = vmul.f32 %v5620_v59, %v1196_v27  ;;  %v1212_v9 = vsel %vm1148_vm4, %v1116_v29, %v1180_v52  ;;  %v1102_v55 = vadd.f32 %v5499_v47, %v856_v48  ;;  %v1104_v45 = vadd.f32 %v1072_v40, %v858_v15 }
 0x113   : > { %1268 = vadd.xlane.f32.xlu1 %v1235_v22  ;;  %v1103_v10 = vadd.f32 %v5511_v54, %v857_v24  ;;  %v1108_v13 = vadd.f32 %v1076_v31, %v862_v12  ;;  %v1117_v56 = vadd.f32 %v5522_v18, %v871_v39  ;;  %v872_v32 = vadd.f32 %v813_v26, %v5482_v36 }
 0x114   : > { %1266 = vadd.xlane.f32.xlu0 %v1234_v20  ;;  %vm1134_vm5 = vcmp.ge.f32.partialorder %v1102_v55, 0.0  ;;  %v1166_v4 = vmul.f32 0.2, %v1102_v55  ;;  %vm1136_vm6 = vcmp.ge.f32.partialorder %v1104_v45, 0.0  ;;  %v1168_v57 = vmul.f32 0.2, %v1104_v45 }
 0x115   : > { %v1250_v16 = vmul.f32 %v5620_v59, %v1212_v9  ;;  %vm1135_vm7 = vcmp.ge.f32.partialorder %v1103_v10, 0.0  ;;  %v1167_v29 = vmul.f32 0.2, %v1103_v10  ;;  %v1172_v52 = vmul.f32 0.2, %v1108_v13  ;;  %v5644_v9 = vpop.permute.xlu0 %946 }
 0x116   : > { %v5637_v47 = vrot.slane %v723_v61, %v5353_v8  ;;  %v1198_v40 = vsel %vm1134_vm5, %v1102_v55, %v1166_v4  ;;  %v1200_v54 = vsel %vm1136_vm6, %v1104_v45, %v1168_v57  ;;  %vm1140_vm8 = vcmp.ge.f32.partialorder %v1108_v13, 0.0  ;;  %7456 = vst [vmem:[#allocation44_spill] sm:$0xff] %v5644_v9 }
 0x117   : > { %v1077_v18 = vmul.f32 %v5490_v5, %v5452_v3  ;;  %v825_v20 = vrot.slane %v5541_v41, %v5353_v8  ;;  %1298 = vadd.xlane.f32.xlu1 %v1250_v16  ;;  %v1236_v31 = vmul.f32 %v5620_v59, %v1198_v40  ;;  %v1199_v39 = vsel %vm1135_vm7, %v1103_v10, %v1167_v29 }
 0x118   : > { %v1238_v48 = vmul.f32 %v5620_v59, %v1200_v54  ;;  %vm1149_vm9 = vcmp.ge.f32.partialorder %v1117_v56, 0.0  ;;  %v1181_v61 = vmul.f32 0.2, %v1117_v56  ;;  %v1118_v15 = vadd.f32 %v5532_v33, %v872_v32 }
 0x119   : > { %1270 = vadd.xlane.f32.xlu0 %v1236_v31  ;;  %v1204_v24 = vsel %vm1140_vm8, %v1108_v13, %v1172_v52  ;;  %v859_v22 = vadd.f32 %v785_v49, %v5484_v37  ;;  %v874_v27 = vadd.f32 %v817_v30, %v5482_v36  ;;  %v863_v41 = vadd.f32 %v793_v25, %v5484_v37  ;;  %v5667_v29 = vpop.permute.xlu0 %1034 }
 0x11a   : > { %v1237_v12 = vmul.f32 %v5620_v59, %v1199_v39  ;;  %v1182_v55 = vmul.f32 0.2, %v1118_v15  ;;  %v860_v10 = vadd.f32 %v5637_v47, %v5482_v36  ;;  %v873_v45 = vadd.f32 %v813_v26, %v5484_v37  ;;  %7457 = vst [vmem:[#allocation45_spill] sm:$0xff] %v5667_v29 }
 0x11b   : > { %1274 = vadd.xlane.f32.xlu1 %v1238_v48  ;;  %vm1150_vm10 = vcmp.ge.f32.partialorder %v1118_v15, 0.0  ;;  %v1105_v33 = vadd.f32 %v5536_v38, %v859_v22  ;;  %v1120_v13 = vadd.f32 %v5547_v42, %v874_v27  ;;  %v878_v49 = vadd.f32 %v825_v20, %v5482_v36 }
 0x11c   : > { %v772_v32 = vcombine.high %v5588_v44, %v5588_v44  ;;  %v1213_v25 = vsel %vm1149_vm9, %v1117_v56, %v1181_v61  ;;  %v1109_v4 = vadd.f32 %v1077_v18, %v863_v41  ;;  %v875_v57 = vadd.f32 %v817_v30, %v5484_v37 }
 0x11d   : > { %v1087_v16 = vmul.f32 %v5490_v5, %v5438_v60  ;;  %1272 = vadd.xlane.f32.xlu0 %v1237_v12  ;;  %v1242_v26 = vmul.f32 %v5620_v59, %v1204_v24  ;;  %vm1137_vm11 = vcmp.ge.f32.partialorder %v1105_v33, 0.0  ;;  %v1169_v38 = vmul.f32 0.2, %v1105_v33 }
 0x11e   : > { %v1092_v42 = vmul.f32 %v5490_v5, %v5628_v23  ;;  %v1214_v52 = vsel %vm1150_vm10, %v1118_v15, %v1182_v55  ;;  %v1184_v44 = vmul.f32 0.2, %v1120_v13  ;;  %v1106_v56 = vadd.f32 %v5564_v17, %v860_v10  ;;  %v5683_v55 = vpop.permute.xlu0 %957 }
 0x11f   : > { %v797_v30 = vrot.slane %v5525_v19, %v5353_v8  ;;  %1282 = vadd.xlane.f32.xlu1 %v1242_v26  ;;  %v1251_v40 = vmul.f32 %v5620_v59, %v1213_v25  ;;  %vm1152_vm12 = vcmp.ge.f32.partialorder %v1120_v13, 0.0  ;;  %v1119_v54 = vadd.f32 %v1087_v16, %v873_v45  ;;  %7458 = vst [vmem:[#allocation46_spill] sm:$0xff] %v5683_v55 }
 0x120   : > { %v821_v18 = vrot.slane %v772_v32, %v5353_v8  ;;  %v1201_v31 = vsel %vm1137_vm11, %v1105_v33, %v1169_v38  ;;  %v1173_v39 = vmul.f32 0.2, %v1109_v4  ;;  %v1089_v48 = vmul.f32 %v5490_v5, %v5442_v62 }
 0x121   : > { %v1078_v61 = vmul.f32 %v5490_v5, %v5644_v9  ;;  %1300 = vadd.xlane.f32.xlu0 %v1251_v40  ;;  %v1252_v17 = vmul.f32 %v5620_v59, %v1214_v52  ;;  %vm1141_vm13 = vcmp.ge.f32.partialorder %v1109_v4, 0.0  ;;  %v1216_v19 = vsel %vm1152_vm12, %v1120_v13, %v1184_v44  ;;  %v7500_v9 = vld [vmem:[#allocation10_spill] sm:$0xff] }
 0x122   : > { %vm1138_vm14 = vcmp.ge.f32.partialorder %v1106_v56, 0.0  ;;  %v1170_v15 = vmul.f32 0.2, %v1106_v56  ;;  %v1124_v24 = vadd.f32 %v1092_v42, %v878_v49  ;;  %v1239_v22 = vmul.f32 %v5620_v59, %v1201_v31 }
 0x123   : > { %1302 = vadd.xlane.f32.xlu1 %v1252_v17  ;;  %v1183_v27 = vmul.f32 0.2, %v1119_v54  ;;  %v864_v41 = vadd.f32 %v797_v30, %v5482_v36  ;;  %v861_v12 = vadd.f32 %v5637_v47, %v5484_v37  ;;  %v1205_v10 = vsel %vm1141_vm13, %v1109_v4, %v1173_v39 }
 0x124   : > { %v1121_v45 = vadd.f32 %v1089_v48, %v875_v57  ;;  %v879_v33 = vadd.f32 %v825_v20, %v5484_v37  ;;  %v876_v13 = vadd.f32 %v821_v18, %v5482_v36  ;;  %v1075_v49 = vmul.f32 %v5490_v5, %v5444_v63 }
 0x125   : > { %v1080_v32 = vmul.f32 %v5490_v5, %v5683_v55  ;;  %1276 = vadd.xlane.f32.xlu0 %v1239_v22  ;;  %v1254_v25 = vmul.f32 %v5620_v59, %v1216_v19  ;;  %vm1151_vm15 = vcmp.ge.f32.partialorder %v1119_v54, 0.0  ;;  %v829_v47 = vrot.slane %v5550_v43, %v5353_v8  ;;  %v5700_v43 = vpop.permute.xlu0 %1045 }
 0x126   : > { %v1202_v4 = vsel %vm1138_vm14, %v1106_v56, %v1170_v15  ;;  %v1188_v57 = vmul.f32 0.2, %v1124_v24  ;;  %v1110_v16 = vadd.f32 %v1078_v61, %v864_v41  ;;  %v1243_v20 = vmul.f32 %v5620_v59, %v1205_v10  ;;  %7459 = vst [vmem:[#allocation47_spill] sm:$0xff] %v5700_v43 }
 0x127   : > { %1306 = vadd.xlane.f32.xlu1 %v1254_v25  ;;  %vm1156_vm2 = vcmp.ge.f32.partialorder %v1124_v24, 0.0  ;;  %v1215_v26 = vsel %vm1151_vm15, %v1119_v54, %v1183_v27  ;;  %v1185_v38 = vmul.f32 0.2, %v1121_v45  ;;  %v1107_v42 = vadd.f32 %v1075_v49, %v861_v12 }
 0x128   : > { %v1093_v52 = vmul.f32 %v5490_v5, %v5456_v6  ;;  %v1112_v44 = vadd.f32 %v1080_v32, %v5579_v28  ;;  %v1240_v40 = vmul.f32 %v5620_v59, %v1202_v4  ;;  %vm1153_vm3 = vcmp.ge.f32.partialorder %v1121_v45, 0.0  ;;  %v7501_v6 = vld [vmem:[#allocation9_spill] sm:$0xff] }
 0x129   : > { %1284 = vadd.xlane.f32.xlu0 %v1243_v20  ;;  %v1220_v56 = vsel %vm1156_vm2, %v1124_v24, %v1188_v57  ;;  %v1174_v31 = vmul.f32 0.2, %v1110_v16  ;;  %v865_v39 = vadd.f32 %v797_v30, %v5484_v37  ;;  %v880_v48 = vadd.f32 %v829_v47, %v5482_v36 }
 0x12a   : > { %v1090_v54 = vmul.f32 %v5490_v5, %v5503_v50  ;;  %v1253_v61 = vmul.f32 %v5620_v59, %v1215_v26  ;;  %vm1142_vm4 = vcmp.ge.f32.partialorder %v1110_v16, 0.0  ;;  %v1079_v28 = vmul.f32 %v5490_v5, %v5460_v11 }
 0x12b   : > { %1278 = vadd.xlane.f32.xlu1 %v1240_v40  ;;  %v1217_v17 = vsel %vm1153_vm3, %v1121_v45, %v1185_v38  ;;  %v1171_v19 = vmul.f32 0.2, %v1107_v42  ;;  %v1125_v15 = vadd.f32 %v1093_v52, %v879_v33  ;;  %v1258_v24 = vmul.f32 %v5620_v59, %v1220_v56  ;;  %v5716_v45 = vpop.permute.xlu0 %968 }
 0x12c   : > { %vm1139_vm5 = vcmp.ge.f32.partialorder %v1107_v42, 0.0  ;;  %v877_v30 = vadd.f32 %v821_v18, %v5484_v37  ;;  %v1094_v36 = vmul.f32 %v5490_v5, %v5667_v29  ;;  %v1206_v22 = vsel %vm1142_vm4, %v1110_v16, %v1174_v31  ;;  %7460 = vst [vmem:[#allocation48_spill] sm:$0xff] %v5716_v45 }
 0x12d   : > { %1304 = vadd.xlane.f32.xlu0 %v1253_v61  ;;  %v1176_v27 = vmul.f32 0.2, %v1112_v44  ;;  %v1122_v41 = vadd.f32 %v1090_v54, %v876_v13  ;;  %v1255_v12 = vmul.f32 %v5620_v59, %v1217_v17  ;;  %vm1144_vm6 = vcmp.ge.f32.partialorder %v1112_v44, 0.0 }
 0x12e   : > { %v1081_v10 = vmul.f32 %v5490_v5, %v5471_v21  ;;  %v1203_v33 = vsel %vm1139_vm5, %v1107_v42, %v1171_v19  ;;  %v1189_v49 = vmul.f32 0.2, %v1125_v15  ;;  %v1111_v32 = vadd.f32 %v1079_v28, %v865_v39 }
 0x12f   : > { %1314 = vadd.xlane.f32.xlu1 %v1258_v24  ;;  %v1096_v18 = vmul.f32 %v5490_v5, %v5700_v43  ;;  %v1244_v25 = vmul.f32 %v5620_v59, %v1206_v22  ;;  %vm1157_vm7 = vcmp.ge.f32.partialorder %v1125_v15, 0.0  ;;  %v1208_v13 = vsel %vm1144_vm6, %v1112_v44, %v1176_v27 }
 0x130   : > { %v1186_v4 = vmul.f32 0.2, %v1122_v41  ;;  %v1126_v57 = vadd.f32 %v1094_v36, %v880_v48  ;;  %v881_v16 = vadd.f32 %v829_v47, %v5484_v37  ;;  %v1241_v20 = vmul.f32 %v5620_v59, %v1203_v33  ;;  %v5730_v47 = vpop.permute.xlu0 %1056 }
 0x131   : > { %1308 = vadd.xlane.f32.xlu0 %v1255_v12  ;;  %vm1154_vm8 = vcmp.ge.f32.partialorder %v1122_v41, 0.0  ;;  %v1113_v26 = vadd.f32 %v1081_v10, %v5576_v2  ;;  %v1221_v38 = vsel %vm1157_vm7, %v1125_v15, %v1189_v49  ;;  %v1175_v42 = vmul.f32 0.2, %v1111_v32  ;;  %7461 = vst [vmem:[#allocation49_spill] sm:$0xff] %v5730_v47 }
 0x132   : > { %v1091_v52 = vmul.f32 %v5490_v5, %v5448_v1  ;;  %v1082_v40 = vmul.f32 %v5490_v5, %v5716_v45  ;;  %v1246_v44 = vmul.f32 %v5620_v59, %v1208_v13  ;;  %vm1143_vm9 = vcmp.ge.f32.partialorder %v1111_v32, 0.0 }
 0x133   : > { %1286 = vadd.xlane.f32.xlu1 %v1244_v25  ;;  %v1128_v37 = vadd.f32 %v1096_v18, %v5603_v7  ;;  %v1218_v56 = vsel %vm1154_vm8, %v1122_v41, %v1186_v4  ;;  %v1190_v31 = vmul.f32 0.2, %v1126_v57  ;;  %vm1163_vm10 = vcmp.ge.f32.partialorder %v5615_v58, 0.0  ;;  %v5746_v41 = vpop.permute.xlu1 %1337 }
 0x134   : > { %v1259_v2 = vmul.f32 %v5620_v59, %v1221_v38  ;;  %vm1158_vm11 = vcmp.ge.f32.partialorder %v1126_v57, 0.0  ;;  %v1195_v39 = vmul.f32 0.2, %v5615_v58  ;;  %v1095_v48 = vmul.f32 %v5490_v5, %v5464_v14  ;;  %7462 = vst [vmem:[#allocation50_spill] sm:$0xff] %v5746_v41 }
 0x135   : > { %1280 = vadd.xlane.f32.xlu0 %v1241_v20  ;;  %v1207_v54 = vsel %vm1143_vm9, %v1111_v32, %v1175_v42  ;;  %v1177_v61 = vmul.f32 0.2, %v1113_v26  ;;  %v1123_v28 = vadd.f32 %v1091_v52, %v877_v30  ;;  %v1098_v7 = vmul.f32 %v5490_v5, %v5730_v47 }
 0x136   : > { %v1256_v17 = vmul.f32 %v5620_v59, %v1218_v56  ;;  %vm1145_vm12 = vcmp.ge.f32.partialorder %v1113_v26, 0.0  ;;  %v1227_v19 = vsel %vm1163_vm10, %v5615_v58, %v1195_v39  ;;  %v1114_v15 = vadd.f32 %v1082_v40, %v5591_v0 }
 0x137   : > { %1290 = vadd.xlane.f32.xlu1 %v1246_v44  ;;  %v1222_v24 = vsel %vm1158_vm11, %v1126_v57, %v1190_v31  ;;  %v1192_v36 = vmul.f32 0.2, %v1128_v37  ;;  %v1265_v22 = vmul.f32 %v5620_v59, %v1227_v19  ;;  %v1245_v27 = vmul.f32 %v5620_v59, %v1207_v54  ;;  %v5755_v20 = vpop.permute.xlu1 %1348 }
 0x138   : > { %vm1160_vm13 = vcmp.ge.f32.partialorder %v1128_v37, 0.0  ;;  %v1097_v30 = vmul.f32 %v5490_v5, %v5480_v34  ;;  %v1209_v12 = vsel %vm1145_vm12, %v1113_v26, %v1177_v61  ;;  %v1187_v10 = vmul.f32 0.2, %v1123_v28  ;;  %7463 = vst [vmem:[#allocation51_spill] sm:$0xff] %v5755_v20 }
 0x139   : > { %1316 = vadd.xlane.f32.xlu0 %v1259_v2  ;;  %v1127_v33 = vadd.f32 %v1095_v48, %v881_v16  ;;  %v1260_v58 = vmul.f32 %v5620_v59, %v1222_v24  ;;  %vm1155_vm14 = vcmp.ge.f32.partialorder %v1123_v28, 0.0  ;;  %v1130_v0 = vadd.f32 %v1098_v7, %v5608_v46  ;;  %v5763_v2 = vpop.permute.xlu0 %1341 }
 0x13a   : > { %v1224_v49 = vsel %vm1160_vm13, %v1128_v37, %v1192_v36  ;;  %v1178_v32 = vmul.f32 0.2, %v1114_v15  ;;  %v1247_v18 = vmul.f32 %v5620_v59, %v1209_v12  ;;  %vm1146_vm15 = vcmp.ge.f32.partialorder %v1114_v15, 0.0  ;;  %7465 = vst [vmem:[#allocation53_spill] sm:$0xff] %v5763_v2 }
 0x13b   : > { %1310 = vadd.xlane.f32.xlu1 %v1256_v17  ;;  %v1129_v25 = vadd.f32 %v1097_v30, %v5600_v35  ;;  %v1083_v13 = vmul.f32 %v5490_v5, %v5506_v53  ;;  %v1219_v4 = vsel %vm1155_vm14, %v1123_v28, %v1187_v10  ;;  %v1191_v57 = vmul.f32 0.2, %v1127_v33  ;;  %v5761_v37 = vpop.permute.xlu1 %1352 }
 0x13c   : > { %v1262_v16 = vmul.f32 %v5620_v59, %v1224_v49  ;;  %vm1159_vm2 = vcmp.ge.f32.partialorder %v1127_v33, 0.0  ;;  %v1210_v46 = vsel %vm1146_vm15, %v1114_v15, %v1178_v32  ;;  %v1194_v26 = vmul.f32 0.2, %v1130_v0  ;;  %7464 = vst [vmem:[#allocation52_spill] sm:$0xff] %v5761_v37 }
 0x13d   : > { %1288 = vadd.xlane.f32.xlu0 %v1245_v27  ;;  %v1257_v38 = vmul.f32 %v5620_v59, %v1219_v4  ;;  %vm1162_vm3 = vcmp.ge.f32.partialorder %v1130_v0, 0.0  ;;  %v1115_v42 = vadd.f32 %v1083_v13, %v5583_v51  ;;  %v1223_v35 = vsel %vm1159_vm2, %v1127_v33, %v1191_v57  ;;  %v5769_v61 = vpop.permute.xlu0 %1425 }
 0x13e   : > { %v1193_v52 = vmul.f32 0.2, %v1129_v25  ;;  %v1248_v5 = vmul.f32 %v5620_v59, %v1210_v46  ;;  %vm1161_vm4 = vcmp.ge.f32.partialorder %v1129_v25, 0.0  ;;  %v1226_v40 = vsel %vm1162_vm3, %v1130_v0, %v1194_v26  ;;  %7467 = vst [vmem:[#allocation55_spill] sm:$0xff] %v5769_v61 }
 0x13f   : > { %1318 = vadd.xlane.f32.xlu1 %v1260_v58  ;;  %v1261_v44 = vmul.f32 %v5620_v59, %v1223_v35  ;;  %v1179_v31 = vmul.f32 0.2, %v1115_v42  ;;  %v1264_v39 = vmul.f32 %v5620_v59, %v1226_v40  ;;  %vm1147_vm5 = vcmp.ge.f32.partialorder %v1115_v42, 0.0  ;;  %v5767_v54 = vpop.permute.xlu1 %1429 }
 0x140   : > { %v1225_v56 = vsel %vm1161_vm4, %v1129_v25, %v1193_v52  ;;  %7466 = vst [vmem:[#allocation54_spill] sm:$0xff] %v5767_v54  ;;  %vm1711_vm6 = vcmask 130112   ;;  %vm1848_vm7 = vcmask 1041409   ;;  %vm1850_vm8 = vcmask 1042434  }
 0x141   : > { %1292 = vadd.xlane.f32.xlu0 %v1247_v18  ;;  %v1263_v51 = vmul.f32 %v5620_v59, %v1225_v56  ;;  %v1211_v48 = vsel %vm1147_vm5, %v1115_v42, %v1179_v31  ;;  %v5774_v17 = vpop.permute.xlu0 %1436  ;;  %vm1852_vm9 = vcmask 1043459   ;;  %vm1854_vm10 = vcmask 1044484  }
 0x142   : > { %v1249_v28 = vmul.f32 %v5620_v59, %v1211_v48  ;;  %7469 = vst [vmem:[#allocation57_spill] sm:$0xff] %v5774_v17  ;;  %vm1856_vm11 = vcmask 1045509   ;;  %vm1858_vm12 = vcmask 1046534   ;;  %vm1860_vm13 = vcmask 1047559  }
 0x143   : > { %1322 = vadd.xlane.f32.xlu1 %v1262_v16  ;;  %v5772_v7 = vpop.permute.xlu1 %1440  ;;  %vm1871_vm14 = vcmask 130048   ;;  %vm5197_vm15 = vmmov 0   ;;  %vm2889_vm4 = vcmask 261120  }
 0x144   : > { %7468 = vst [vmem:[#allocation56_spill] sm:$0xff] %v5772_v7 }
 0x145   : > { %1312 = vadd.xlane.f32.xlu0 %v1257_v38  ;;  %v5778_v15 = vpop.permute.xlu0 %1359 }
 0x146   : > { %7471 = vst [vmem:[#allocation59_spill] sm:$0xff] %v5778_v15 }
 0x147   : > { %1294 = vadd.xlane.f32.xlu1 %v1248_v5  ;;  %v5776_v19 = vpop.permute.xlu1 %1363 }
 0x148   : > { %7470 = vst [vmem:[#allocation58_spill] sm:$0xff] %v5776_v19 }
 0x149   : > { %1320 = vadd.xlane.f32.xlu0 %v1261_v44  ;;  %v5782_v36 = vpop.permute.xlu0 %1447 }
 0x14a   : > { %7473 = vst [vmem:[#allocation61_spill] sm:$0xff] %v5782_v36 }
 0x14b   : > { %1326 = vadd.xlane.f32.xlu1 %v1264_v39  ;;  %v5780_v24 = vpop.permute.xlu1 %1451 }
 0x14c   : > { %7472 = vst [vmem:[#allocation60_spill] sm:$0xff] %v5780_v24 }
 0x14d   : > { %1324 = vadd.xlane.f32.xlu0 %v1263_v51  ;;  %v5786_v30 = vpop.permute.xlu0 %1370 }
 0x14e   : > { %7475 = vst [vmem:[#allocation63_spill] sm:$0xff] %v5786_v30 }
 0x14f   : > { %v5784_v27 = vpop.permute.xlu1 %1374 }
 0x150   : > { %7474 = vst [vmem:[#allocation62_spill] sm:$0xff] %v5784_v27 }
 0x151   : > { %1296 = vadd.xlane.f32.xlu0 %v1249_v28  ;;  %v5790_v59 = vpop.permute.xlu0 %1458 }
 0x152   : > { %7477 = vst [vmem:[#allocation65_spill] sm:$0xff] %v5790_v59 }
 0x153   : > { %v5788_v12 = vpop.permute.xlu1 %1462 }
 0x154   : > { %7476 = vst [vmem:[#allocation64_spill] sm:$0xff] %v5788_v12 }
 0x155   : > { %1328 = vadd.xlane.f32.xlu0 %v1265_v22  ;;  %v5794_v33 = vpop.permute.xlu0 %1381 }
 0x156   : > { %7479 = vst [vmem:[#allocation67_spill] sm:$0xff] %v5794_v33 }
 0x157   : > { %v5792_v10 = vpop.permute.xlu1 %1385 }
 0x158   : > { %7478 = vst [vmem:[#allocation66_spill] sm:$0xff] %v5792_v10 }
 0x159   : > { %v5798_v58 = vpop.permute.xlu0 %1469 }
 0x15a   : > { %7481 = vst [vmem:[#allocation69_spill] sm:$0xff] %v5798_v58 }
 0x15b   : > { %v5796_v22 = vpop.permute.xlu1 %1473 }
 0x15c   : > { %7480 = vst [vmem:[#allocation68_spill] sm:$0xff] %v5796_v22 }
 0x15d   : > { %v5802_v49 = vpop.permute.xlu0 %1392 }
 0x15e   : > { %7483 = vst [vmem:[#allocation71_spill] sm:$0xff] %v5802_v49 }
 0x15f   : > { %v5800_v0 = vpop.permute.xlu1 %1396 }
 0x160   : > { %7482 = vst [vmem:[#allocation70_spill] sm:$0xff] %v5800_v0 }
 0x161   : > { %v5806_v18 = vpop.permute.xlu0 %1480 }
 0x162   : > { %7485 = vst [vmem:[#allocation73_spill] sm:$0xff] %v5806_v18 }
 0x163   : > { %v5804_v32 = vpop.permute.xlu1 %1484 }
 0x164   : > { %7484 = vst [vmem:[#allocation72_spill] sm:$0xff] %v5804_v32 }
 0x165   : > { %v5810_v13 = vpop.permute.xlu0 %1403 }
 0x166   : > { %7487 = vst [vmem:[#allocation75_spill] sm:$0xff] %v5810_v13 }
 0x167   : > { %v5808_v25 = vpop.permute.xlu1 %1407 }
 0x168   : > { %7486 = vst [vmem:[#allocation74_spill] sm:$0xff] %v5808_v25 }
 0x169   : > { %v5814_v57 = vpop.permute.xlu0 %1491 }
 0x16a   : > { %7489 = vst [vmem:[#allocation77_spill] sm:$0xff] %v5814_v57 }
 0x16b   : > { %v5812_v4 = vpop.permute.xlu1 %1495 }
 0x16c   : > { %7488 = vst [vmem:[#allocation76_spill] sm:$0xff] %v5812_v4 }
 0x16d   : > { %v5818_v46 = vpop.permute.xlu0 %1414 }
 0x16e   : > { %7491 = vst [vmem:[#allocation79_spill] sm:$0xff] %v5818_v46 }
 0x16f   : > { %v5816_v16 = vpop.permute.xlu1 %1418 }
 0x170   : > { %7490 = vst [vmem:[#allocation78_spill] sm:$0xff] %v5816_v16 }
 0x171   : > { %v5822_v38 = vpop.permute.xlu0 %1502 }
 0x172   : > { %7493 = vst [vmem:[#allocation81_spill] sm:$0xff] %v5822_v38 }
 0x173   : > { %v5820_v26 = vpop.permute.xlu1 %1506 }
 0x174   : > { %7492 = vst [vmem:[#allocation80_spill] sm:$0xff] %v5820_v26 }
 0x1a0   : > { %v1269_v42 = vpop.xlane.xlu1 %1268 }
 0x1a1   : > { %v5825_v35 = vadd.f32 %v5763_v2, %v1269_v42  ;;  %v1267_v52 = vpop.xlane.xlu0 %1266 }
 0x1a2   : > { %v5828_v5 = vadd.f32 %v5746_v41, %v1267_v52 }
 0x1a3   : > { %1608 = vperm.xlu1 %4983, %v5825_v35  }
 0x1a4   : > { %1605 = vperm.xlu0 %4982, %v5828_v5   ;;  %v1299_v40 = vpop.xlane.xlu1 %1298 }
 0x1a5   : > { %v5837_v51 = vadd.f32 %v5769_v61, %v1299_v40 }
 0x1a6   : > { %v1271_v44 = vpop.xlane.xlu0 %1270 }
 0x1a7   : > { %v5833_v56 = vadd.f32 %v5755_v20, %v1271_v44 }
 0x1a8   : > { %v1275_v31 = vpop.xlane.xlu1 %1274 }
 0x1a9   : > { %1611 = vperm.xlu1 %4983, %v5833_v56   ;;  %v5845_v52 = vadd.f32 %v5778_v15, %v1275_v31 }
 0x1aa   : > { %v1273_v39 = vpop.xlane.xlu0 %1272 }
 0x1ab   : > { %v5840_v48 = vadd.f32 %v5761_v37, %v1273_v39 }
 0x1ac   : > { %v1283_v28 = vpop.xlane.xlu1 %1282 }
 0x1ad   : > { %1653 = vperm.xlu1 %4983, %v5837_v51   ;;  %1614 = vperm.xlu0 %4982, %v5840_v48   ;;  %v5853_v39 = vadd.f32 %v5794_v33, %v1283_v28 }
 0x1ae   : > { %v1301_v42 = vpop.xlane.xlu0 %1300 }
 0x1af   : > { %v5848_v44 = vadd.f32 %v5767_v54, %v1301_v42 }
 0x1b0   : > { %v1303_v20 = vpop.xlane.xlu1 %1302 }
 0x1b1   : > { %1617 = vperm.xlu1 %4983, %v5845_v52   ;;  %1656 = vperm.xlu0 %4982, %v5848_v44   ;;  %v5861_v42 = vadd.f32 %v5774_v17, %v1303_v20 }
 0x1b2   : > { %v1277_v40 = vpop.xlane.xlu0 %1276 }
 0x1b3   : > { %v5856_v61 = vadd.f32 %v5776_v19, %v1277_v40 }
 0x1b4   : > { %v1307_v37 = vpop.xlane.xlu1 %1306 }
 0x1b5   : > { %1629 = vperm.xlu1 %4983, %v5853_v39   ;;  %1620 = vperm.xlu0 %4982, %v5856_v61   ;;  %v5869_v40 = vadd.f32 %v5782_v36, %v1307_v37 }
 0x1b6   : > { %v1285_v31 = vpop.xlane.xlu0 %1284 }
 0x1b7   : > { %v5864_v15 = vadd.f32 %v5792_v10, %v1285_v31 }
 0x1b8   : > { %v1279_v54 = vpop.xlane.xlu1 %1278 }
 0x1b9   : > { %1659 = vperm.xlu1 %4983, %v5861_v42   ;;  %1632 = vperm.xlu0 %4982, %v5864_v15   ;;  %v5877_v31 = vadd.f32 %v5786_v30, %v1279_v54 }
 0x1ba   : > { %v1305_v28 = vpop.xlane.xlu0 %1304 }
 0x1bb   : > { %v5872_v33 = vadd.f32 %v5772_v7, %v1305_v28 }
 0x1bc   : > { %v1315_v19 = vpop.xlane.xlu1 %1314 }
 0x1bd   : > { %1665 = vperm.xlu1 %4983, %v5869_v40   ;;  %1662 = vperm.xlu0 %4982, %v5872_v33   ;;  %v5885_v28 = vadd.f32 %v5798_v58, %v1315_v19 }
 0x1be   : > { %v1309_v20 = vpop.xlane.xlu0 %1308 }
 0x1bf   : > { %v5880_v17 = vadd.f32 %v5780_v24, %v1309_v20 }
 0x1c0   : > { %v1287_v10 = vpop.xlane.xlu1 %1286 }
 0x1c1   : > { %1623 = vperm.xlu1 %4983, %v5877_v31   ;;  %1668 = vperm.xlu0 %4982, %v5880_v17   ;;  %v5893_v20 = vadd.f32 %v5802_v49, %v1287_v10 }
 0x1c2   : > { %v1281_v37 = vpop.xlane.xlu0 %1280 }
 0x1c3   : > { %v5888_v36 = vadd.f32 %v5784_v27, %v1281_v37 }
 0x1c4   : > { %v1291_v7 = vpop.xlane.xlu1 %1290 }
 0x1c5   : > { %1677 = vperm.xlu1 %4983, %v5885_v28   ;;  %1626 = vperm.xlu0 %4982, %v5888_v36   ;;  %v5901_v37 = vadd.f32 %v5810_v13, %v1291_v7 }
 0x1c6   : > { %v1317_v54 = vpop.xlane.xlu0 %1316 }
 0x1c7   : > { %v5896_v30 = vadd.f32 %v5796_v22, %v1317_v54 }
 0x1c8   : > { %v1311_v24 = vpop.xlane.xlu1 %1310 }
 0x1c9   : > { %1635 = vperm.xlu1 %4983, %v5893_v20   ;;  %1680 = vperm.xlu0 %4982, %v5896_v30   ;;  %v5909_v54 = vadd.f32 %v5790_v59, %v1311_v24 }
 0x1ca   : > { %v1289_v19 = vpop.xlane.xlu0 %1288 }
 0x1cb   : > { %v5904_v58 = vadd.f32 %v5800_v0, %v1289_v19 }
 0x1cc   : > { %v1319_v27 = vpop.xlane.xlu1 %1318 }
 0x1cd   : > { %1641 = vperm.xlu1 %4983, %v5901_v37   ;;  %1638 = vperm.xlu0 %4982, %v5904_v58   ;;  %v5917_v19 = vadd.f32 %v5806_v18, %v1319_v27 }
 0x1ce   : > { %v1293_v10 = vpop.xlane.xlu0 %1292 }
 0x1cf   : > { %v5912_v49 = vadd.f32 %v5808_v25, %v1293_v10  ;;  %7494 = vst [vmem:[#allocation82_spill] sm:$0xff] %v5917_v19 }
 0x1d0   : > { %v1323_v22 = vpop.xlane.xlu1 %1322 }
 0x1d1   : > { %1671 = vperm.xlu1 %4983, %v5909_v54   ;;  %1644 = vperm.xlu0 %4982, %v5912_v49   ;;  %v5925_v10 = vadd.f32 %v5814_v57, %v1323_v22 }
 0x1d2   : > { %v1313_v7 = vpop.xlane.xlu0 %1312 }
 0x1d3   : > { %v5920_v13 = vadd.f32 %v5788_v12, %v1313_v7  ;;  %7495 = vst [vmem:[#allocation83_spill] sm:$0xff] %v5925_v10 }
 0x1d4   : > { %v1295_v24 = vpop.xlane.xlu1 %1294 }
 0x1d5   : > { %1683 = vperm.xlu1 %4983, %v5917_v19   ;;  %1674 = vperm.xlu0 %4982, %v5920_v13   ;;  %v5933_v7 = vadd.f32 %v5818_v46, %v1295_v24 }
 0x1d6   : > { %v1321_v59 = vpop.xlane.xlu0 %1320 }
 0x1d7   : > { %v5928_v25 = vadd.f32 %v5804_v32, %v1321_v59 }
 0x1d8   : > { %v1327_v12 = vpop.xlane.xlu1 %1326 }
 0x1d9   : > { %7496 = vst [vmem:[#allocation84_spill] sm:$0xff] %v5928_v25  ;;  %1689 = vperm.xlu1 %4983, %v5925_v10   ;;  %1686 = vperm.xlu0 %4982, %v5928_v25   ;;  %v5941_v59 = vadd.f32 %v5822_v38, %v1327_v12 }
 0x1da   : > { %v1325_v27 = vpop.xlane.xlu0 %1324 }
 0x1db   : > { %v5936_v18 = vadd.f32 %v5812_v4, %v1325_v27  ;;  %7498 = vst [vmem:[#allocation86_spill] sm:$0xff] %v5941_v59 }
 0x1dd   : > { %7497 = vst [vmem:[#allocation85_spill] sm:$0xff] %v5936_v18  ;;  %1647 = vperm.xlu1 %4983, %v5933_v7   ;;  %1692 = vperm.xlu0 %4982, %v5936_v18  }
 0x1de   : > { %v1297_v22 = vpop.xlane.xlu0 %1296 }
 0x1df   : > { %v5944_v57 = vadd.f32 %v5816_v16, %v1297_v22 }
 0x1e1   : > { %1695 = vperm.xlu1 %4983, %v5941_v59   ;;  %1650 = vperm.xlu0 %4982, %v5944_v57  }
 0x1e2   : > { %v1329_v24 = vpop.xlane.xlu0 %1328 }
 0x1e3   : > { %v5949_v27 = vadd.f32 %v5820_v26, %v1329_v24 }
 0x1e5   : > { %7499 = vst [vmem:[#allocation87_spill] sm:$0xff] %v5949_v27  ;;  %1698 = vperm.xlu0 %4982, %v5949_v27  }
 0x222   : > { %v1609_v46 = vpop.permute.xlu1 %1608 }
 0x223   : > { %v1606_v4 = vpop.permute.xlu0 %1605  ;;  %v1710_v23 = vrot.slane %v1609_v46, %v7500_v9 }
 0x224   : > { %v1705_v3 = vrot.slane %v1606_v4, %v7501_v6 }
 0x226   : > { %v1712_v46 = vsel %vm1711_vm6, %v1710_v23, %v1705_v3 }
 0x228   : > { %v1612_v32 = vpop.permute.xlu1 %1611 }
 0x229   : > { %v1716_v59 = vrot.slane %v1612_v32, %v7501_v6 }
 0x22c   : > { %v5952_v0 = vpop.permute.xlu1 %1653  ;;  %v1615_v12 = vpop.permute.xlu0 %1614 }
 0x22d   : > { %v1720_v62 = vrot.slane %v1615_v12, %v7500_v9  ;;  %v1779_v12 = vrot.slane %v5952_v0, %v7501_v6 }
 0x230   : > { %v1618_v38 = vpop.permute.xlu1 %1617  ;;  %v5954_v41 = vpop.permute.xlu0 %1656 }
 0x231   : > { %v1725_v4 = vrot.slane %v1618_v38, %v7501_v6  ;;  %v1783_v23 = vrot.slane %v5954_v41, %v7500_v9 }
 0x234   : > { %v5956_v22 = vpop.permute.xlu1 %1629  ;;  %v1621_v16 = vpop.permute.xlu0 %1620 }
 0x235   : > { %v1729_v60 = vrot.slane %v1621_v16, %v7500_v9  ;;  %v1721_v16 = vsel %vm1711_vm6, %v1720_v62, %v1716_v59  ;;  %v1743_v41 = vrot.slane %v5956_v22, %v7501_v6 }
 0x237   : > { %v1730_v3 = vsel %vm1711_vm6, %v1729_v60, %v1725_v4 }
 0x238   : > { %v1660_v2 = vpop.permute.xlu1 %1659  ;;  %v1633_v47 = vpop.permute.xlu0 %1632 }
 0x239   : > { %v1747_v38 = vrot.slane %v1633_v47, %v7500_v9 }
 0x23c   : > { %v1666_v45 = vpop.permute.xlu1 %1665  ;;  %v1663_v53 = vpop.permute.xlu0 %1662 }
 0x23d   : > { %v1792_v10 = vrot.slane %v1663_v53, %v7500_v9  ;;  %v1788_v53 = vrot.slane %v1660_v2, %v7501_v6  ;;  %v1797_v25 = vrot.slane %v1666_v45, %v7501_v6 }
 0x23f   : > { %v1793_v60 = vsel %vm1711_vm6, %v1792_v10, %v1788_v53 }
 0x240   : > { %v1624_v24 = vpop.permute.xlu1 %1623  ;;  %v1669_v26 = vpop.permute.xlu0 %1668 }
 0x241   : > { %v1734_v32 = vrot.slane %v1624_v24, %v7501_v6 }
 0x244   : > { %v5958_v43 = vpop.permute.xlu1 %1677  ;;  %v1627_v34 = vpop.permute.xlu0 %1626 }
 0x245   : > { %v1738_v27 = vrot.slane %v1627_v34, %v7500_v9  ;;  %v1801_v34 = vrot.slane %v1669_v26, %v7500_v9  ;;  %v1849_v26 = vsel %vm1848_vm7, %v1721_v16, %v1712_v46  ;;  %v1748_v46 = vsel %vm1711_vm6, %v1747_v38, %v1743_v41 }
 0x246   : > { %v1851_v4 = vsel %vm1850_vm8, %v1730_v3, %v1849_v26 }
 0x247   : > { %v1739_v0 = vsel %vm1711_vm6, %v1738_v27, %v1734_v32  ;;  %v1802_v45 = vsel %vm1711_vm6, %v1801_v34, %v1797_v25 }
 0x248   : > { %v1636_v29 = vpop.permute.xlu1 %1635  ;;  %v5960_v14 = vpop.permute.xlu0 %1680  ;;  %v1853_v22 = vsel %vm1852_vm9, %v1739_v0, %v1851_v4 }
 0x249   : > { %v1752_v27 = vrot.slane %v1636_v29, %v7501_v6  ;;  %v1855_v38 = vsel %vm1854_vm10, %v1748_v46, %v1853_v22 }
 0x24c   : > { %v1642_v1 = vpop.permute.xlu1 %1641  ;;  %v1639_v55 = vpop.permute.xlu0 %1638 }
 0x24d   : > { %v1756_v62 = vrot.slane %v1639_v55, %v7500_v9  ;;  %v1761_v10 = vrot.slane %v1642_v1, %v7501_v6 }
 0x24f   : > { %v1757_v16 = vsel %vm1711_vm6, %v1756_v62, %v1752_v27 }
 0x250   : > { %v1672_v21 = vpop.permute.xlu1 %1671  ;;  %v1645_v11 = vpop.permute.xlu0 %1644 }
 0x251   : > { %v1765_v2 = vrot.slane %v1645_v11, %v7500_v9  ;;  %v1806_v55 = vrot.slane %v1672_v21, %v7501_v6  ;;  %v1819_v21 = vrot.slane %v5960_v14, %v7500_v9 }
 0x254   : > { %v5964_v50 = vpop.permute.xlu1 %1683  ;;  %v1675_v63 = vpop.permute.xlu0 %1674 }
 0x255   : > { %v1810_v59 = vrot.slane %v1675_v63, %v7500_v9  ;;  %v1784_v63 = vsel %vm1711_vm6, %v1783_v23, %v1779_v12  ;;  %v1766_v12 = vsel %vm1711_vm6, %v1765_v2, %v1761_v10  ;;  %v1824_v1 = vrot.slane %v5964_v50, %v7501_v6 }
 0x256   : > { %v1862_v11 = vsel %vm1848_vm7, %v1793_v60, %v1784_v63 }
 0x257   : > { %v1811_v32 = vsel %vm1711_vm6, %v1810_v59, %v1806_v55  ;;  %v1863_v29 = vsel %vm1850_vm8, %v1802_v45, %v1862_v11  ;;  %v1857_v59 = vsel %vm1856_vm11, %v1757_v16, %v1855_v38  ;;  %v7502_v16 = vld [vmem:[#allocation8_spill] sm:$0xff] }
 0x258   : > { %v1690_v18 = vpop.permute.xlu1 %1689  ;;  %v1687_v19 = vpop.permute.xlu0 %1686  ;;  %v1864_v0 = vsel %vm1852_vm9, %v1811_v32, %v1863_v29  ;;  %v1859_v41 = vsel %vm1858_vm12, %v1766_v12, %v1857_v59 }
 0x259   : > { %v1828_v25 = vrot.slane %v1687_v19, %v7500_v9  ;;  %v1815_v19 = vrot.slane %v5958_v43, %v7501_v6  ;;  %v1833_v14 = vrot.slane %v1690_v18, %v7501_v6 }
 0x25b   : > { %v1829_v26 = vsel %vm1711_vm6, %v1828_v25, %v1824_v1  ;;  %v1820_v60 = vsel %vm1711_vm6, %v1819_v21, %v1815_v19  ;;  %v7503_v21 = vld [vmem:[#allocation11_spill] sm:$0xff] }
 0x25c   : > { %v1648_v24 = vpop.permute.xlu1 %1647  ;;  %v1693_v47 = vpop.permute.xlu0 %1692  ;;  %v1865_v45 = vsel %vm1854_vm10, %v1820_v60, %v1864_v0 }
 0x25d   : > { %v1837_v34 = vrot.slane %v1693_v47, %v7500_v9  ;;  %v1770_v3 = vrot.slane %v1648_v24, %v7501_v6  ;;  %v1866_v27 = vsel %vm1856_vm11, %v1829_v26, %v1865_v45 }
 0x25f   : > { %v1838_v2 = vsel %vm1711_vm6, %v1837_v34, %v1833_v14 }
 0x260   : > { %v1651_v23 = vpop.permute.xlu0 %1650  ;;  %v1696_v62 = vpop.permute.xlu1 %1695  ;;  %v1867_v63 = vsel %vm1858_vm12, %v1838_v2, %v1866_v27  ;;  %v7508_v27 = vld [vmem:[#allocation16_spill] sm:$0xff] }
 0x261   : > { %v1774_v53 = vrot.slane %v1651_v23, %v7500_v9  ;;  %v1842_v47 = vrot.slane %v1696_v62, %v7501_v6  ;;  %v7505_v62 = vld [vmem:[#allocation13_spill] sm:$0xff] }
 0x263   : > { %v1775_v50 = vsel %vm1711_vm6, %v1774_v53, %v1770_v3  ;;  %v7504_v53 = vld [vmem:[#allocation12_spill] sm:$0xff] }
 0x264   : > { %v1699_v24 = vpop.permute.xlu0 %1698  ;;  %v1861_v43 = vsel %vm1860_vm13, %v1775_v50, %v1859_v41  ;;  %v7506_v50 = vld [vmem:[#allocation14_spill] sm:$0xff] }
 0x265   : > { %v1846_v18 = vrot.slane %v1699_v24, %v7500_v9  ;;  %v1872_v4 = vsel %vm1871_vm14, %v1861_v43, -inf }
 0x266   : > { %1873 = vmax.xlane.f32.xlu1 %v1872_v4 }
 0x267   : > { %v1847_v55 = vsel %vm1711_vm6, %v1846_v18, %v1842_v47 }
 0x268   : > { %v1868_v46 = vsel %vm1860_vm13, %v1847_v55, %v1867_v63 }
 0x269   : > { %v1875_v22 = vsel %vm1871_vm14, %v1868_v46, -inf }
 0x26a   : > { %1876 = vmax.xlane.f32.xlu0 %v1875_v22 }
 0x2f3   : > { %v1874_v10 = vpop.xlane.xlu1 %1873 }
 0x2f4   : > { %v1883_v11 = vrot.slane %v1874_v10, %v5353_v8  ;;  %v1887_v32 = vrot.slane %v1874_v10, %v7502_v16  ;;  %v1891_v12 = vrot.slane %v1874_v10, %v7503_v21  ;;  %v1895_v38 = vrot.slane %v1874_v10, %v7504_v53 }
 0x2f5   : > { %v1903_v41 = vrot.slane %v1874_v10, %v7506_v50  ;;  %v1911_v55 = vrot.slane %v1874_v10, %v7508_v27 }
 0x2f6   : > { %v1960_v25 = vsub.f32 %v5828_v5, %v1883_v11  ;;  %v1961_v29 = vsub.f32 %v5825_v35, %v1883_v11  ;;  %v1963_v34 = vsub.f32 %v5840_v48, %v1887_v32  ;;  %v1962_v23 = vsub.f32 %v5833_v56, %v1887_v32 }
 0x2f7   : > { %v1965_v19 = vsub.f32 %v5856_v61, %v1891_v12  ;;  %v1964_v14 = vsub.f32 %v5845_v52, %v1891_v12  ;;  %v1899_v35 = vrot.slane %v1874_v10, %v7505_v62  ;;  %v1967_v59 = vsub.f32 %v5888_v36, %v1895_v38  ;;  %v7507_v36 = vld [vmem:[#allocation15_spill] sm:$0xff]  ;;  %v6068_v22 = vpop.xlane.xlu0 %1876 }
 0x2f8   : > { %v1992_v1 = vmul.f32 1.442695, %v1960_v25  ;;  %v1994_v3 = vmul.f32 1.442695, %v1961_v29  ;;  %v1998_v0 = vmul.f32 1.442695, %v1963_v34  ;;  %v1966_v56 = vsub.f32 %v5877_v31, %v1895_v38 }
 0x2f9   : > { %v1996_v5 = vmul.f32 1.442695, %v1962_v23  ;;  %v2002_v48 = vmul.f32 1.442695, %v1965_v19  ;;  %v2000_v26 = vmul.f32 1.442695, %v1964_v14  ;;  %v1969_v61 = vsub.f32 %v5864_v15, %v1899_v35 }
 0x2fa   : > { %4993 = vpow2.f32 %v1992_v1  ;;  %v2006_v60 = vmul.f32 1.442695, %v1967_v59  ;;  %v1968_v52 = vsub.f32 %v5853_v39, %v1899_v35  ;;  %v2004_v2 = vmul.f32 1.442695, %v1966_v56 }
 0x2fb   : > { %4995 = vpow2.f32 %v1994_v3  ;;  %v1907_v31 = vrot.slane %v1874_v10, %v7507_v36  ;;  %v1971_v47 = vsub.f32 %v5904_v58, %v1903_v41  ;;  %v2010_v18 = vmul.f32 1.442695, %v1969_v61 }
 0x2fc   : > { %4997 = vpow2.f32 %v1998_v0  ;;  %v1970_v15 = vsub.f32 %v5893_v20, %v1903_v41  ;;  %v2008_v39 = vmul.f32 1.442695, %v1968_v52  ;;  %v1975_v10 = vsub.f32 %v5944_v57, %v1911_v55 }
 0x2fd   : > { %4999 = vpow2.f32 %v1996_v5  ;;  %v1973_v63 = vsub.f32 %v5912_v49, %v1907_v31  ;;  %v2014_v58 = vmul.f32 1.442695, %v1971_v47  ;;  %v1972_v46 = vsub.f32 %v5901_v37, %v1907_v31 }
 0x2fe   : > { %5001 = vpow2.f32 %v2002_v48  ;;  %v2012_v20 = vmul.f32 1.442695, %v1970_v15  ;;  %v1915_v25 = vrot.slane %v6068_v22, %v5353_v8  ;;  %v1974_v37 = vsub.f32 %v5933_v7, %v1911_v55 }
 0x2ff   : > { %5003 = vpow2.f32 %v2000_v26  ;;  %v2018_v49 = vmul.f32 1.442695, %v1973_v63  ;;  %v2016_v29 = vmul.f32 1.442695, %v1972_v46  ;;  %v2022_v23 = vmul.f32 1.442695, %v1975_v10 }
 0x300   : > { %5005 = vpow2.f32 %v2006_v60  ;;  %v1919_v57 = vrot.slane %v6068_v22, %v7502_v16  ;;  %v1977_v1 = vsub.f32 %v5848_v44, %v1915_v25  ;;  %v2020_v3 = vmul.f32 1.442695, %v1974_v37  ;;  %v7509_v46 = vld [vmem:[#allocation84_spill] sm:$0xff]  ;;  %v7510_v10 = vld [vmem:[#allocation82_spill] sm:$0xff] }
 0x301   : > { %5007 = vpow2.f32 %v2004_v2  ;;  %v1976_v7 = vsub.f32 %v5837_v51, %v1915_v25  ;;  %v1923_v0 = vrot.slane %v6068_v22, %v7503_v21  ;;  %v1927_v48 = vrot.slane %v6068_v22, %v7504_v53 }
 0x302   : > { %5009 = vpow2.f32 %v2010_v18  ;;  %v1979_v14 = vsub.f32 %v5872_v33, %v1919_v57  ;;  %v2026_v5 = vmul.f32 1.442695, %v1977_v1  ;;  %v1978_v44 = vsub.f32 %v5861_v42, %v1919_v57 }
 0x303   : > { %5011 = vpow2.f32 %v2008_v39  ;;  %v2024_v35 = vmul.f32 1.442695, %v1976_v7  ;;  %v1981_v56 = vsub.f32 %v5880_v17, %v1923_v0  ;;  %v1980_v26 = vsub.f32 %v5869_v40, %v1923_v0 }
 0x304   : > { %v6050_v24 = vpop.eup %4993  ;;  %5013 = vpow2.f32 %v2014_v58  ;;  %v2030_v33 = vmul.f32 1.442695, %v1979_v14  ;;  %v2028_v42 = vmul.f32 1.442695, %v1978_v44  ;;  %v1931_v60 = vrot.slane %v6068_v22, %v7505_v62  ;;  %v7513_v44 = vld [vmem:[#allocation87_spill] sm:$0xff] }
 0x305   : > { %v6052_v43 = vpop.eup %4995  ;;  %2089 = vperm.xlu0 %4982, %v6050_v24   ;;  %5015 = vpow2.f32 %v2012_v20  ;;  %v1983_v52 = vsub.f32 %v5920_v13, %v1927_v48  ;;  %v2034_v17 = vmul.f32 1.442695, %v1981_v56  ;;  %v1982_v2 = vsub.f32 %v5909_v54, %v1927_v48  ;;  %v7514_v48 = vld [vmem:[#allocation86_spill] sm:$0xff] }
 0x306   : > { %2092 = vperm.xlu1 %4983, %v6052_v43   ;;  %v6059_v4 = vpop.eup %4997  ;;  %5017 = vpow2.f32 %v2018_v49  ;;  %v2032_v40 = vmul.f32 1.442695, %v1980_v26  ;;  %v1935_v18 = vrot.slane %v6068_v22, %v7506_v50  ;;  %v1985_v15 = vsub.f32 %v5896_v30, %v1931_v60 }
 0x307   : > { %v6061_v45 = vpop.eup %4999  ;;  %5019 = vpow2.f32 %v2016_v29  ;;  %v2038_v13 = vmul.f32 1.442695, %v1983_v52  ;;  %v1984_v39 = vsub.f32 %v5885_v28, %v1931_v60  ;;  %v2036_v54 = vmul.f32 1.442695, %v1982_v2 }
 0x308   : > { %v6070_v11 = vpop.eup %5001  ;;  %5021 = vpow2.f32 %v2022_v23  ;;  %v1939_v58 = vrot.slane %v6068_v22, %v7507_v36  ;;  %v1987_v20 = vsub.f32 %v7509_v46, %v1935_v18  ;;  %v2042_v30 = vmul.f32 1.442695, %v1985_v15  ;;  %v7511_v23 = vld [vmem:[#allocation85_spill] sm:$0xff] }
 0x309   : > { %2098 = vperm.xlu0 %4982, %v6059_v4   ;;  %v6072_v32 = vpop.eup %5003  ;;  %5023 = vpow2.f32 %v2020_v3  ;;  %v1986_v49 = vsub.f32 %v7510_v10, %v1935_v18  ;;  %v2040_v28 = vmul.f32 1.442695, %v1984_v39  ;;  %v1943_v29 = vrot.slane %v6068_v22, %v7508_v27  ;;  %v7512_v3 = vld [vmem:[#allocation83_spill] sm:$0xff] }
 0x30a   : > { %2095 = vperm.xlu1 %4983, %v6061_v45   ;;  %v6080_v12 = vpop.eup %5005  ;;  %5025 = vpow2.f32 %v2026_v5  ;;  %v1989_v57 = vsub.f32 %v7511_v23, %v1939_v58  ;;  %v2046_v1 = vmul.f32 1.442695, %v1987_v20  ;;  %v1988_v7 = vsub.f32 %v7512_v3, %v1939_v58 }
 0x30b   : > { %v6082_v34 = vpop.eup %5007  ;;  %5027 = vpow2.f32 %v2024_v35  ;;  %v2044_v0 = vmul.f32 1.442695, %v1986_v49  ;;  %v1991_v35 = vsub.f32 %v7513_v44, %v1943_v29  ;;  %v1990_v56 = vsub.f32 %v7514_v48, %v1943_v29 }
 0x30c   : > { %v6090_v38 = vpop.eup %5009  ;;  %5029 = vpow2.f32 %v2030_v33  ;;  %v2050_v22 = vmul.f32 1.442695, %v1989_v57  ;;  %v2048_v33 = vmul.f32 1.442695, %v1988_v7 }
 0x30d   : > { %2104 = vperm.xlu0 %4982, %v6070_v11   ;;  %v6092_v19 = vpop.eup %5011  ;;  %5031 = vpow2.f32 %v2028_v42  ;;  %v2054_v60 = vmul.f32 1.442695, %v1991_v35  ;;  %v2052_v52 = vmul.f32 1.442695, %v1990_v56 }
 0x30e   : > { %2101 = vperm.xlu1 %4983, %v6072_v32   ;;  %v6100_v51 = vpop.eup %5013  ;;  %5033 = vpow2.f32 %v2034_v17 }
 0x30f   : > { %v6102_v59 = vpop.eup %5015  ;;  %5035 = vpow2.f32 %v2032_v40 }
 0x310   : > { %v6110_v41 = vpop.eup %5017  ;;  %5037 = vpow2.f32 %v2038_v13 }
 0x311   : > { %2110 = vperm.xlu0 %4982, %v6080_v12   ;;  %v6112_v61 = vpop.eup %5019  ;;  %5039 = vpow2.f32 %v2036_v54 }
 0x312   : > { %2107 = vperm.xlu1 %4983, %v6082_v34   ;;  %v6120_v31 = vpop.eup %5021  ;;  %5041 = vpow2.f32 %v2042_v30 }
 0x313   : > { %v6122_v47 = vpop.eup %5023  ;;  %5043 = vpow2.f32 %v2040_v28 }
 0x314   : > { %v6130_v55 = vpop.eup %5025  ;;  %5045 = vpow2.f32 %v2046_v1 }
 0x315   : > { %2116 = vperm.xlu0 %4982, %v6090_v38   ;;  %v6132_v63 = vpop.eup %5027  ;;  %5047 = vpow2.f32 %v2044_v0 }
 0x316   : > { %2113 = vperm.xlu1 %4983, %v6092_v19   ;;  %v6140_v25 = vpop.eup %5029  ;;  %5049 = vpow2.f32 %v2050_v22 }
 0x317   : > { %v6142_v37 = vpop.eup %5031  ;;  %5051 = vpow2.f32 %v2048_v33 }
 0x318   : > { %v6150_v14 = vpop.eup %5033  ;;  %5053 = vpow2.f32 %v2054_v60 }
 0x319   : > { %2122 = vperm.xlu0 %4982, %v6100_v51   ;;  %v6152_v5 = vpop.eup %5035  ;;  %5055 = vpow2.f32 %v2052_v52 }
 0x31a   : > { %2119 = vperm.xlu1 %4983, %v6102_v59   ;;  %v6158_v26 = vpop.eup %5037 }
 0x31b   : > { %v6160_v42 = vpop.eup %5039 }
 0x31c   : > { %v6164_v17 = vpop.eup %5041 }
 0x31d   : > { %2128 = vperm.xlu0 %4982, %v6110_v41   ;;  %v6166_v2 = vpop.eup %5043 }
 0x31e   : > { %2125 = vperm.xlu1 %4983, %v6112_v61   ;;  %v6170_v40 = vpop.eup %5045 }
 0x31f   : > { %v6172_v18 = vpop.eup %5047 }
 0x320   : > { %v6176_v15 = vpop.eup %5049 }
 0x321   : > { %2134 = vperm.xlu0 %4982, %v6120_v31   ;;  %v6178_v13 = vpop.eup %5051 }
 0x322   : > { %2131 = vperm.xlu1 %4983, %v6122_v47   ;;  %v6182_v39 = vpop.eup %5053 }
 0x323   : > { %7515 = vst [vmem:[#allocation10_spill] sm:$0xff] %v6182_v39  ;;  %v6184_v54 = vpop.eup %5055 }
 0x325   : > { %2140 = vperm.xlu0 %4982, %v6130_v55  }
 0x326   : > { %2137 = vperm.xlu1 %4983, %v6132_v63  }
 0x329   : > { %2146 = vperm.xlu0 %4982, %v6140_v25  }
 0x32a   : > { %2143 = vperm.xlu1 %4983, %v6142_v37  }
 0x32d   : > { %2152 = vperm.xlu0 %4982, %v6150_v14  }
 0x32e   : > { %2149 = vperm.xlu1 %4983, %v6152_v5  }
 0x331   : > { %2158 = vperm.xlu0 %4982, %v6158_v26  }
 0x332   : > { %2155 = vperm.xlu1 %4983, %v6160_v42  }
 0x335   : > { %2164 = vperm.xlu0 %4982, %v6164_v17  }
 0x336   : > { %2161 = vperm.xlu1 %4983, %v6166_v2  }
 0x339   : > { %2170 = vperm.xlu0 %4982, %v6170_v40  }
 0x33a   : > { %2167 = vperm.xlu1 %4983, %v6172_v18  }
 0x33d   : > { %2176 = vperm.xlu0 %4982, %v6176_v15  }
 0x33e   : > { %2173 = vperm.xlu1 %4983, %v6178_v13  }
 0x341   : > { %2182 = vperm.xlu0 %4982, %v6182_v39  }
 0x342   : > { %2179 = vperm.xlu1 %4983, %v6184_v54  }
 0x384   : > { %v2090_v58 = vpop.permute.xlu0 %2089 }
 0x385   : > { %v2093_v46 = vpop.permute.xlu1 %2092  ;;  %v2187_v48 = vrot.slane %v2090_v58, %v7501_v6 }
 0x386   : > { %v2191_v22 = vrot.slane %v2093_v46, %v7500_v9 }
 0x388   : > { %v2099_v20 = vpop.permute.xlu0 %2098 }
 0x389   : > { %v2096_v30 = vpop.permute.xlu1 %2095  ;;  %v2200_v3 = vrot.slane %v2099_v20, %v7500_v9 }
 0x38a   : > { %v2196_v1 = vrot.slane %v2096_v30, %v7501_v6 }
 0x38c   : > { %v2105_v10 = vpop.permute.xlu0 %2104  ;;  %v2201_v20 = vsel %vm1711_vm6, %v2200_v3, %v2196_v1 }
 0x38d   : > { %v2102_v49 = vpop.permute.xlu1 %2101  ;;  %v2209_v44 = vrot.slane %v2105_v10, %v7500_v9 }
 0x38e   : > { %v2205_v0 = vrot.slane %v2102_v49, %v7501_v6 }
 0x390   : > { %v2111_v28 = vpop.permute.xlu0 %2110  ;;  %v2210_v39 = vsel %vm1711_vm6, %v2209_v44, %v2205_v0 }
 0x391   : > { %v2108_v29 = vpop.permute.xlu1 %2107  ;;  %v2218_v33 = vrot.slane %v2111_v28, %v7500_v9 }
 0x392   : > { %v2214_v56 = vrot.slane %v2108_v29, %v7501_v6  ;;  %v2192_v29 = vsel %vm1711_vm6, %v2191_v22, %v2187_v48 }
 0x394   : > { %v2117_v23 = vpop.permute.xlu0 %2116  ;;  %v2219_v28 = vsel %vm1711_vm6, %v2218_v33, %v2214_v56 }
 0x395   : > { %v2114_v57 = vpop.permute.xlu1 %2113  ;;  %v2227_v52 = vrot.slane %v2117_v23, %v7500_v9  ;;  %v2328_v23 = vsel %vm1848_vm7, %v2201_v20, %v2192_v29 }
 0x396   : > { %v2223_v60 = vrot.slane %v2114_v57, %v7501_v6  ;;  %v2329_v3 = vsel %vm1850_vm8, %v2210_v39, %v2328_v23 }
 0x397   : > { %v2330_v0 = vsel %vm1852_vm9, %v2219_v28, %v2329_v3 }
 0x398   : > { %v2123_v7 = vpop.permute.xlu0 %2122  ;;  %v2228_v1 = vsel %vm1711_vm6, %v2227_v52, %v2223_v60 }
 0x399   : > { %v2120_v35 = vpop.permute.xlu1 %2119  ;;  %v2236_v49 = vrot.slane %v2123_v7, %v7500_v9  ;;  %v2331_v48 = vsel %vm1854_vm10, %v2228_v1, %v2330_v0 }
 0x39a   : > { %v2232_v30 = vrot.slane %v2120_v35, %v7501_v6 }
 0x39c   : > { %v2129_v10 = vpop.permute.xlu0 %2128  ;;  %v2237_v7 = vsel %vm1711_vm6, %v2236_v49, %v2232_v30 }
 0x39d   : > { %v2126_v46 = vpop.permute.xlu1 %2125  ;;  %v2245_v58 = vrot.slane %v2129_v10, %v7500_v9  ;;  %v2332_v33 = vsel %vm1856_vm11, %v2237_v7, %v2331_v48 }
 0x39e   : > { %v2241_v57 = vrot.slane %v2126_v46, %v7501_v6 }
 0x3a0   : > { %v2135_v35 = vpop.permute.xlu0 %2134  ;;  %v2246_v44 = vsel %vm1711_vm6, %v2245_v58, %v2241_v57 }
 0x3a1   : > { %v2132_v10 = vpop.permute.xlu1 %2131  ;;  %v2254_v22 = vrot.slane %v2135_v35, %v7500_v9  ;;  %v2333_v39 = vsel %vm1858_vm12, %v2246_v44, %v2332_v33 }
 0x3a2   : > { %v2250_v56 = vrot.slane %v2132_v10, %v7501_v6 }
 0x3a4   : > { %v2141_v20 = vpop.permute.xlu0 %2140  ;;  %v2255_v60 = vsel %vm1711_vm6, %v2254_v22, %v2250_v56 }
 0x3a5   : > { %v2138_v52 = vpop.permute.xlu1 %2137  ;;  %v2334_v30 = vsel %vm1860_vm13, %v2255_v60, %v2333_v39  ;;  %v2263_v56 = vrot.slane %v2141_v20, %v7500_v9 }
 0x3a6   : > { %v2344_v49 = vsel %vm1871_vm14, %v2334_v30, 0.0  ;;  %v2259_v48 = vrot.slane %v2138_v52, %v7501_v6 }
 0x3a7   : > { %2345 = vadd.xlane.f32.xlu1 %v2344_v49 }
 0x3a8   : > { %v2147_v46 = vpop.permute.xlu0 %2146 }
 0x3a9   : > { %v2144_v58 = vpop.permute.xlu1 %2143  ;;  %v2272_v35 = vrot.slane %v2147_v46, %v7500_v9 }
 0x3aa   : > { %v2268_v7 = vrot.slane %v2144_v58, %v7501_v6 }
 0x3ac   : > { %v2153_v29 = vpop.permute.xlu0 %2152  ;;  %v2273_v49 = vsel %vm1711_vm6, %v2272_v35, %v2268_v7 }
 0x3ad   : > { %v2150_v28 = vpop.permute.xlu1 %2149  ;;  %v2281_v10 = vrot.slane %v2153_v29, %v7500_v9 }
 0x3ae   : > { %v2277_v44 = vrot.slane %v2150_v28, %v7501_v6 }
 0x3b0   : > { %v2159_v57 = vpop.permute.xlu0 %2158  ;;  %v2282_v28 = vsel %vm1711_vm6, %v2281_v10, %v2277_v44 }
 0x3b1   : > { %v2156_v23 = vpop.permute.xlu1 %2155  ;;  %v2290_v60 = vrot.slane %v2159_v57, %v7500_v9 }
 0x3b2   : > { %v2286_v33 = vrot.slane %v2156_v23, %v7501_v6  ;;  %v2264_v23 = vsel %vm1711_vm6, %v2263_v56, %v2259_v48 }
 0x3b4   : > { %v2165_v1 = vpop.permute.xlu0 %2164  ;;  %v2291_v57 = vsel %vm1711_vm6, %v2290_v60, %v2286_v33 }
 0x3b5   : > { %v2162_v3 = vpop.permute.xlu1 %2161  ;;  %v2299_v30 = vrot.slane %v2165_v1, %v7500_v9  ;;  %v2335_v1 = vsel %vm1848_vm7, %v2273_v49, %v2264_v23 }
 0x3b6   : > { %v2295_v39 = vrot.slane %v2162_v3, %v7501_v6  ;;  %v2336_v35 = vsel %vm1850_vm8, %v2282_v28, %v2335_v1 }
 0x3b7   : > { %v2337_v44 = vsel %vm1852_vm9, %v2291_v57, %v2336_v35 }
 0x3b8   : > { %v2171_v0 = vpop.permute.xlu0 %2170  ;;  %v2300_v7 = vsel %vm1711_vm6, %v2299_v30, %v2295_v39 }
 0x3b9   : > { %v2168_v22 = vpop.permute.xlu1 %2167  ;;  %v2308_v58 = vrot.slane %v2171_v0, %v7500_v9  ;;  %v2338_v56 = vsel %vm1854_vm10, %v2300_v7, %v2337_v44 }
 0x3ba   : > { %v2304_v46 = vrot.slane %v2168_v22, %v7501_v6 }
 0x3bc   : > { %v2177_v29 = vpop.permute.xlu0 %2176  ;;  %v2309_v0 = vsel %vm1711_vm6, %v2308_v58, %v2304_v46 }
 0x3bd   : > { %v2174_v52 = vpop.permute.xlu1 %2173  ;;  %v2317_v20 = vrot.slane %v2177_v29, %v7500_v9  ;;  %v2339_v60 = vsel %vm1856_vm11, %v2309_v0, %v2338_v56 }
 0x3be   : > { %v2313_v3 = vrot.slane %v2174_v52, %v7501_v6 }
 0x3c0   : > { %v2183_v22 = vpop.permute.xlu0 %2182  ;;  %v2318_v10 = vsel %vm1711_vm6, %v2317_v20, %v2313_v3 }
 0x3c1   : > { %v2180_v29 = vpop.permute.xlu1 %2179  ;;  %v2326_v48 = vrot.slane %v2183_v22, %v7500_v9  ;;  %v2340_v30 = vsel %vm1858_vm12, %v2318_v10, %v2339_v60 }
 0x3c2   : > { %v2322_v33 = vrot.slane %v2180_v29, %v7501_v6 }
 0x3c4   : > { %v2327_v39 = vsel %vm1711_vm6, %v2326_v48, %v2322_v33 }
 0x3c5   : > { %v2341_v49 = vsel %vm1860_vm13, %v2327_v39, %v2340_v30 }
 0x3c6   : > { %v2347_v46 = vsel %vm1871_vm14, %v2341_v49, 0.0 }
 0x3c7   : > { %2348 = vadd.xlane.f32.xlu0 %v2347_v46 }
 0x434   : > { %v2346_v58 = vpop.xlane.xlu1 %2345 }
 0x435   : > { %5057 = vrcp.f32 %v2346_v58 }
 0x43f   : > { %v5058_v28 = vpop.eup %5057 }
 0x440   : > { %v2357_v52 = vrot.slane %v5058_v28, %v5353_v8  ;;  %v2361_v20 = vrot.slane %v5058_v28, %v7502_v16  ;;  %v2365_v23 = vrot.slane %v5058_v28, %v7503_v21  ;;  %v2369_v22 = vrot.slane %v5058_v28, %v7504_v53 }
 0x441   : > { %v2377_v60 = vrot.slane %v5058_v28, %v7506_v50 }
 0x442   : > { %v2434_v57 = vmul.f32 %v6050_v24, %v2357_v52  ;;  %v2435_v3 = vmul.f32 %v6052_v43, %v2357_v52  ;;  %v2436_v1 = vmul.f32 %v6061_v45, %v2361_v20  ;;  %v2437_v7 = vmul.f32 %v6059_v4, %v2361_v20 }
 0x443   : > { %v2438_v0 = vmul.f32 %v6072_v32, %v2365_v23  ;;  %v2439_v48 = vmul.f32 %v6070_v11, %v2365_v23  ;;  %v2440_v24 = vmul.f32 %v6082_v34, %v2369_v22  ;;  %v2373_v43 = vrot.slane %v5058_v28, %v7505_v62 }
 0x444   : > { %v2466_v35 = vpack.c.bf16 %v2435_v3, %v2434_v57  ;;  %v2467_v29 = vpack.c.bf16 %v2437_v7, %v2436_v1  ;;  %v2441_v4 = vmul.f32 %v6080_v12, %v2369_v22  ;;  %v2444_v34 = vmul.f32 %v6102_v59, %v2377_v60 }
 0x445   : > { %v2468_v33 = vpack.c.bf16 %v2439_v48, %v2438_v0  ;;  %v2442_v32 = vmul.f32 %v6092_v19, %v2373_v43  ;;  %v2443_v49 = vmul.f32 %v6090_v38, %v2373_v43  ;;  %v2445_v46 = vmul.f32 %v6100_v51, %v2377_v60 }
 0x446   : > { %v2506_v44 = vunpack.c.h.b16 %v2466_v35  ;;  %v2505_v10 = vunpack.c.l.b16 %v2466_v35  ;;  %v2507_v56 = vunpack.c.l.b16 %v2467_v29  ;;  %v2508_v45 = vunpack.c.h.b16 %v2467_v29 }
 0x447   : > { %v2509_v39 = vunpack.c.l.b16 %v2468_v33  ;;  %v2510_v30 = vunpack.c.h.b16 %v2468_v33  ;;  %v2469_v11 = vpack.c.bf16 %v2441_v4, %v2440_v24  ;;  %v2470_v12 = vpack.c.bf16 %v2443_v49, %v2442_v32 }
 0x448   : > { %2541 = vperm.xlu1 %4983, %v2506_v44   ;;  %2538 = vperm.xlu0 %4982, %v2505_v10   ;;  %v2381_v20 = vrot.slane %v5058_v28, %v7507_v36  ;;  %v2471_v23 = vpack.c.bf16 %v2445_v46, %v2444_v34  ;;  %v2385_v57 = vrot.slane %v5058_v28, %v7508_v27 }
 0x449   : > { %v2511_v58 = vunpack.c.l.b16 %v2469_v11  ;;  %v2512_v52 = vunpack.c.h.b16 %v2469_v11  ;;  %v2513_v3 = vunpack.c.l.b16 %v2470_v12  ;;  %v2514_v38 = vunpack.c.h.b16 %v2470_v12 }
 0x44a   : > { %v2446_v1 = vmul.f32 %v6112_v61, %v2381_v20  ;;  %v2447_v59 = vmul.f32 %v6110_v41, %v2381_v20  ;;  %v2448_v51 = vmul.f32 %v6122_v47, %v2385_v57  ;;  %v2449_v7 = vmul.f32 %v6120_v31, %v2385_v57 }
 0x44b   : > { %v2515_v35 = vunpack.c.l.b16 %v2471_v23  ;;  %v2516_v0 = vunpack.c.h.b16 %v2471_v23 }
 0x44c   : > { %2544 = vperm.xlu1 %4983, %v2507_v56   ;;  %2547 = vperm.xlu0 %4982, %v2508_v45   ;;  %v2472_v22 = vpack.c.bf16 %v2447_v59, %v2446_v1  ;;  %v2473_v44 = vpack.c.bf16 %v2449_v7, %v2448_v51 }
 0x44e   : > { %v2517_v10 = vunpack.c.l.b16 %v2472_v22  ;;  %v2518_v28 = vunpack.c.h.b16 %v2472_v22  ;;  %v2519_v48 = vunpack.c.l.b16 %v2473_v44  ;;  %v2520_v24 = vunpack.c.h.b16 %v2473_v44 }
 0x450   : > { %2550 = vperm.xlu1 %4983, %v2509_v39   ;;  %2553 = vperm.xlu0 %4982, %v2510_v30  }
 0x454   : > { %2556 = vperm.xlu1 %4983, %v2511_v58   ;;  %2559 = vperm.xlu0 %4982, %v2512_v52   ;;  %v2349_v19 = vpop.xlane.xlu0 %2348 }
 0x455   : > { %5059 = vrcp.f32 %v2349_v19 }
 0x458   : > { %2562 = vperm.xlu1 %4983, %v2513_v3   ;;  %2565 = vperm.xlu0 %4982, %v2514_v38  }
 0x45c   : > { %2568 = vperm.xlu1 %4983, %v2515_v35   ;;  %2571 = vperm.xlu0 %4982, %v2516_v0   ;;  %v7516_v0 = vld [vmem:[#allocation10_spill] sm:$0xff] }
 0x45f   : > { %v5060_v29 = vpop.eup %5059 }
 0x460   : > { %2574 = vperm.xlu1 %4983, %v2517_v10   ;;  %2577 = vperm.xlu0 %4982, %v2518_v28   ;;  %v2389_v61 = vrot.slane %v5060_v29, %v5353_v8  ;;  %v2393_v41 = vrot.slane %v5060_v29, %v7502_v16  ;;  %v2397_v47 = vrot.slane %v5060_v29, %v7503_v21  ;;  %v7517_v28 = vmov 0.0  }
 0x461   : > { %v2401_v32 = vrot.slane %v5060_v29, %v7504_v53  ;;  %v2409_v46 = vrot.slane %v5060_v29, %v7506_v50  ;;  %v2413_v20 = vrot.slane %v5060_v29, %v7507_v36  ;;  %v2417_v59 = vrot.slane %v5060_v29, %v7508_v27  ;;  %4921 = vmatprep.mubr.msk.bf16.mxu1 %vm5197_vm15, %v7517_v28 }
 0x462   : > { %v2450_v31 = vmul.f32 %v6132_v63, %v2389_v61  ;;  %v2451_v43 = vmul.f32 %v6130_v55, %v2389_v61  ;;  %v2452_v56 = vmul.f32 %v6142_v37, %v2393_v41  ;;  %v2453_v45 = vmul.f32 %v6140_v25, %v2393_v41 }
 0x463   : > { %v2454_v4 = vmul.f32 %v6152_v5, %v2397_v47  ;;  %v2455_v11 = vmul.f32 %v6150_v14, %v2397_v47  ;;  %v2456_v55 = vmul.f32 %v6160_v42, %v2401_v32  ;;  %v2405_v63 = vrot.slane %v5060_v29, %v7505_v62 }
 0x464   : > { %2580 = vperm.xlu1 %4983, %v2519_v48   ;;  %2583 = vperm.xlu0 %4982, %v2520_v24   ;;  %v2474_v33 = vpack.c.bf16 %v2451_v43, %v2450_v31  ;;  %v2475_v30 = vpack.c.bf16 %v2453_v45, %v2452_v56  ;;  %v2457_v34 = vmul.f32 %v6158_v26, %v2401_v32 }
 0x465   : > { %v2476_v49 = vpack.c.bf16 %v2455_v11, %v2454_v4  ;;  %v2458_v5 = vmul.f32 %v6166_v2, %v2405_v63  ;;  %v2459_v12 = vmul.f32 %v6164_v17, %v2405_v63  ;;  %v2460_v42 = vmul.f32 %v6172_v18, %v2409_v46 }
 0x466   : > { %v2522_v60 = vunpack.c.h.b16 %v2474_v33  ;;  %v2521_v39 = vunpack.c.l.b16 %v2474_v33  ;;  %v2524_v37 = vunpack.c.h.b16 %v2475_v30  ;;  %v2523_v25 = vunpack.c.l.b16 %v2475_v30 }
 0x467   : > { %v2526_v58 = vunpack.c.h.b16 %v2476_v49  ;;  %v2525_v52 = vunpack.c.l.b16 %v2476_v49  ;;  %v2477_v14 = vpack.c.bf16 %v2457_v34, %v2456_v55  ;;  %v2478_v26 = vpack.c.bf16 %v2459_v12, %v2458_v5 }
 0x468   : > { %2589 = vperm.xlu0 %4982, %v2522_v60   ;;  %2586 = vperm.xlu1 %4983, %v2521_v39   ;;  %v2461_v57 = vmul.f32 %v6170_v40, %v2409_v46  ;;  %v2462_v2 = vmul.f32 %v6178_v13, %v2413_v20  ;;  %v2463_v3 = vmul.f32 %v6176_v15, %v2413_v20 }
 0x469   : > { %v2528_v19 = vunpack.c.h.b16 %v2477_v14  ;;  %v2527_v23 = vunpack.c.l.b16 %v2477_v14  ;;  %v2530_v38 = vunpack.c.h.b16 %v2478_v26  ;;  %v2529_v1 = vunpack.c.l.b16 %v2478_v26 }
 0x46a   : > { %v2479_v17 = vpack.c.bf16 %v2461_v57, %v2460_v42  ;;  %v2480_v18 = vpack.c.bf16 %v2463_v3, %v2462_v2  ;;  %v2464_v35 = vmul.f32 %v6184_v54, %v2417_v59  ;;  %v2465_v40 = vmul.f32 %v7516_v0, %v2417_v59 }
 0x46c   : > { %2595 = vperm.xlu0 %4982, %v2524_v37   ;;  %2592 = vperm.xlu1 %4983, %v2523_v25   ;;  %v2532_v51 = vunpack.c.h.b16 %v2479_v17  ;;  %v2531_v7 = vunpack.c.l.b16 %v2479_v17  ;;  %v2534_v22 = vunpack.c.h.b16 %v2480_v18  ;;  %v2533_v13 = vunpack.c.l.b16 %v2480_v18 }
 0x46d   : > { %v2481_v44 = vpack.c.bf16 %v2465_v40, %v2464_v35 }
 0x46f   : > { %v2536_v15 = vunpack.c.h.b16 %v2481_v44  ;;  %v2535_v10 = vunpack.c.l.b16 %v2481_v44 }
 0x470   : > { %2601 = vperm.xlu0 %4982, %v2526_v58   ;;  %2598 = vperm.xlu1 %4983, %v2525_v52  }
 0x474   : > { %2607 = vperm.xlu0 %4982, %v2528_v19   ;;  %2604 = vperm.xlu1 %4983, %v2527_v23  }
 0x478   : > { %2613 = vperm.xlu0 %4982, %v2530_v38   ;;  %2610 = vperm.xlu1 %4983, %v2529_v1  }
 0x47c   : > { %2619 = vperm.xlu0 %4982, %v2532_v51   ;;  %2616 = vperm.xlu1 %4983, %v2531_v7  }
 0x480   : > { %2625 = vperm.xlu0 %4982, %v2534_v22   ;;  %2622 = vperm.xlu1 %4983, %v2533_v13  }
 0x484   : > { %2631 = vperm.xlu0 %4982, %v2536_v15   ;;  %2628 = vperm.xlu1 %4983, %v2535_v10  }
 0x4c7   : > { %v2542_v29 = vpop.permute.xlu1 %2541  ;;  %v2539_v61 = vpop.permute.xlu0 %2538 }
 0x4c8   : > { %v2640_v58 = vrot.slane %v2542_v29, %v7500_v9  ;;  %v2636_v52 = vrot.slane %v2539_v61, %v7501_v6 }
 0x4ca   : > { %v2641_v3 = vsel %vm1711_vm6, %v2640_v58, %v2636_v52 }
 0x4cb   : > { %v2545_v54 = vpop.permute.xlu1 %2544  ;;  %v2548_v41 = vpop.permute.xlu0 %2547 }
 0x4cc   : > { %v2645_v49 = vrot.slane %v2545_v54, %v7501_v6  ;;  %v2649_v34 = vrot.slane %v2548_v41, %v7500_v9 }
 0x4ce   : > { %v2650_v14 = vsel %vm1711_vm6, %v2649_v34, %v2645_v49 }
 0x4cf   : > { %v2551_v48 = vpop.permute.xlu1 %2550  ;;  %v2554_v24 = vpop.permute.xlu0 %2553  ;;  %v2777_v38 = vsel %vm1848_vm7, %v2650_v14, %v2641_v3 }
 0x4d0   : > { %v2654_v12 = vrot.slane %v2551_v48, %v7501_v6  ;;  %v2658_v42 = vrot.slane %v2554_v24, %v7500_v9 }
 0x4d2   : > { %v2659_v1 = vsel %vm1711_vm6, %v2658_v42, %v2654_v12 }
 0x4d3   : > { %v2557_v47 = vpop.permute.xlu1 %2556  ;;  %v2560_v31 = vpop.permute.xlu0 %2559 }
 0x4d4   : > { %v2663_v20 = vrot.slane %v2557_v47, %v7501_v6  ;;  %v2667_v19 = vrot.slane %v2560_v31, %v7500_v9 }
 0x4d6   : > { %v2668_v18 = vsel %vm1711_vm6, %v2667_v19, %v2663_v20 }
 0x4d7   : > { %v2563_v43 = vpop.permute.xlu1 %2562  ;;  %v2566_v56 = vpop.permute.xlu0 %2565 }
 0x4d8   : > { %v2672_v23 = vrot.slane %v2563_v43, %v7501_v6  ;;  %v2676_v26 = vrot.slane %v2566_v56, %v7500_v9 }
 0x4da   : > { %v2677_v51 = vsel %vm1711_vm6, %v2676_v26, %v2672_v23 }
 0x4db   : > { %v6302_v45 = vpop.permute.xlu1 %2568  ;;  %v6304_v33 = vpop.permute.xlu0 %2571 }
 0x4dc   : > { %v2681_v10 = vrot.slane %v6302_v45, %v7501_v6  ;;  %v2685_v29 = vrot.slane %v6304_v33, %v7500_v9 }
 0x4df   : > { %v6306_v4 = vpop.permute.xlu1 %2574  ;;  %v6308_v32 = vpop.permute.xlu0 %2577 }
 0x4e0   : > { %v2690_v41 = vrot.slane %v6306_v4, %v7501_v6  ;;  %v2694_v31 = vrot.slane %v6308_v32, %v7500_v9  ;;  %v2778_v32 = vsel %vm1850_vm8, %v2659_v1, %v2777_v38 }
 0x4e3   : > { %v6310_v60 = vpop.permute.xlu1 %2580  ;;  %v6312_v39 = vpop.permute.xlu0 %2583 }
 0x4e4   : > { %v2699_v43 = vrot.slane %v6310_v60, %v7501_v6  ;;  %v2703_v56 = vrot.slane %v6312_v39, %v7500_v9  ;;  %v2779_v39 = vsel %vm1852_vm9, %v2668_v18, %v2778_v32  ;;  %v4987_v18 = vld [vmem:[%s7291_s9] ss:$8 sps:$4 sm:$0xff]  }
 0x4e5   : > { %v7518_v32 = vld [vmem:[#allocation36_spill] sm:$0xff] }
 0x4e6   : > { %v2704_v42 = vsel %vm1711_vm6, %v2703_v56, %v2699_v43 }
 0x4e7   : > { %v2587_v30 = vpop.permute.xlu1 %2586  ;;  %v2590_v11 = vpop.permute.xlu0 %2589 }
 0x4e8   : > { %v2708_v22 = vrot.slane %v2587_v30, %v7501_v6  ;;  %v2712_v13 = vrot.slane %v2590_v11, %v7500_v9 }
 0x4ea   : > { %v2713_v4 = vsel %vm1711_vm6, %v2712_v13, %v2708_v22  ;;  %v4891_v22 = vld [vmem:[%s7290_s8] ss:$0 sm:$0xff] }
 0x4eb   : > { %v2593_v55 = vpop.permute.xlu1 %2592  ;;  %v2596_v63 = vpop.permute.xlu0 %2595 }
 0x4ec   : > { %v2717_v17 = vrot.slane %v2593_v55, %v7501_v6  ;;  %v2721_v59 = vrot.slane %v2596_v63, %v7500_v9 }
 0x4ee   : > { %v2722_v48 = vsel %vm1711_vm6, %v2721_v59, %v2717_v17 }
 0x4ef   : > { %v2599_v37 = vpop.permute.xlu1 %2598  ;;  %v2602_v25 = vpop.permute.xlu0 %2601 }
 0x4f0   : > { %v2726_v7 = vrot.slane %v2599_v37, %v7501_v6  ;;  %v2730_v35 = vrot.slane %v2602_v25, %v7500_v9  ;;  %v2784_v37 = vsel %vm1848_vm7, %v2722_v48, %v2713_v4  ;;  %v2686_v25 = vsel %vm1711_vm6, %v2685_v29, %v2681_v10 }
 0x4f2   : > { %v2731_v45 = vsel %vm1711_vm6, %v2730_v35, %v2726_v7  ;;  %v4990_v7 = vld [vmem:[%s7291_s9 + $0x10] ss:$8 sps:$4 sm:$0xff]   ;;  %v4992_v35 = vld [vmem:[%s7291_s9 + $0x14] ss:$8 sps:$4 sm:$0xff]  }
 0x4f3   : > { %v2605_v5 = vpop.permute.xlu1 %2604  ;;  %v2608_v46 = vpop.permute.xlu0 %2607  ;;  %v2785_v49 = vsel %vm1850_vm8, %v2731_v45, %v2784_v37 }
 0x4f4   : > { %v2735_v44 = vrot.slane %v2605_v5, %v7501_v6  ;;  %v2739_v15 = vrot.slane %v2608_v46, %v7500_v9  ;;  %v2780_v5 = vsel %vm1854_vm10, %v2677_v51, %v2779_v39  ;;  %v2695_v46 = vsel %vm1711_vm6, %v2694_v31, %v2690_v41  ;;  %v4989_v51 = vld [vmem:[%s7291_s9 + $0x4] ss:$8 sps:$4 sm:$0xff]  }
 0x4f5   : > { %v2781_v26 = vsel %vm1856_vm11, %v2686_v25, %v2780_v5  ;;  %2893 = vmatprep.subr.bf16.mxu0 %v4989_v51  ;;  %v7522_v51 = vld [vmem:[#allocation26_spill] sm:$0xff] }
 0x4f6   : > { %v2740_v11 = vsel %vm1711_vm6, %v2739_v15, %v2735_v44  ;;  %2894 = vmatpush1.bf16.msra.mxu0 %v4987_v18 }
 0x4f7   : > { %v2611_v57 = vpop.permute.xlu1 %2610  ;;  %v2614_v2 = vpop.permute.xlu0 %2613  ;;  %v2786_v58 = vsel %vm1852_vm9, %v2740_v11, %v2785_v49  ;;  %2895 = vmatprep.subr.bf16.mxu0 %v4992_v35 }
 0x4f8   : > { %v2744_v61 = vrot.slane %v2611_v57, %v7501_v6  ;;  %v2748_v54 = vrot.slane %v2614_v2, %v7500_v9  ;;  %v2782_v2 = vsel %vm1858_vm12, %v2695_v46, %v2781_v26 }
 0x4f9   : > { %v2783_v1 = vsel %vm1860_vm13, %v2704_v42, %v2782_v2 }
 0x4fa   : > { %v2749_v60 = vsel %vm1711_vm6, %v2748_v54, %v2744_v61  ;;  %2896 = vmatpush1.bf16.msra.mxu0 %v4990_v7 }
 0x4fb   : > { %v2617_v0 = vpop.permute.xlu1 %2616  ;;  %v2620_v40 = vpop.permute.xlu0 %2619  ;;  %v2787_v20 = vsel %vm1854_vm10, %v2749_v60, %v2786_v58  ;;  %4931 = vmatprep.subr.bf16.mxu0 %v7517_v28 }
 0x4fc   : > { %v2753_v24 = vrot.slane %v2617_v0, %v7501_v6  ;;  %v2757_v47 = vrot.slane %v2620_v40, %v7500_v9  ;;  %v4889_v0 = vld [vmem:[%s7289_s7] ss:$0 sm:$0xff] }
 0x4fe   : > { %v2758_v34 = vsel %vm1711_vm6, %v2757_v47, %v2753_v24  ;;  %v2854_v47 = vld [vmem:[%s7292_s10] sm:$0x3] }
 0x4ff   : > { %v2623_v33 = vpop.permute.xlu1 %2622  ;;  %v2626_v30 = vpop.permute.xlu0 %2625  ;;  %v2788_v57 = vsel %vm1856_vm11, %v2758_v34, %v2787_v20  ;;  %v2866_v31 = vrot.slane %v2854_v47, %v7502_v16  ;;  %v2862_v43 = vrot.slane %v2854_v47, %v5353_v8 }
 0x500   : > { %v2762_v55 = vrot.slane %v2623_v33, %v7501_v6  ;;  %v2766_v63 = vrot.slane %v2626_v30, %v7500_v9 }
 0x502   : > { %v2767_v52 = vsel %vm1711_vm6, %v2766_v63, %v2762_v55 }
 0x503   : > { %v2629_v14 = vpop.permute.xlu1 %2628  ;;  %v2632_v12 = vpop.permute.xlu0 %2631  ;;  %v2789_v3 = vsel %vm1858_vm12, %v2767_v52, %v2788_v57 }
 0x504   : > { %v2771_v19 = vrot.slane %v2629_v14, %v7501_v6  ;;  %v2775_v23 = vrot.slane %v2632_v12, %v7500_v9  ;;  %v6433_v14 = vld [vmem:[%s7293_s11] ss:$0 sm:$0xff] }
 0x505   : > { %v3155_v7 = vmul.f32 %v6433_v14, %v7522_v51 }
 0x506   : > { %v2776_v38 = vsel %vm1711_vm6, %v2775_v23, %v2771_v19 }
 0x507   : > { %v2790_v17 = vsel %vm1860_vm13, %v2776_v38, %v2789_v3  ;;  %v7519_v3 = vld [vmem:[#allocation17_spill] sm:$0xff] }
 0x508   : > { %v2791_v59 = vpack.c.b16 %v2790_v17, %v2783_v1  ;;  %v3156_v38 = vmul.f32 %v6433_v14, %v7519_v3  ;;  %v7520_v1 = vld [vmem:[#allocation24_spill] sm:$0xff] }
 0x509   : > { %v3154_v17 = vmul.f32 %v6433_v14, %v7520_v1 }
 0x50a   : > { %4922 = vmatmul.mubr.msk.bf16.vlgmr.msra.gmra.mrb[0].mxu1 %vm1871_vm14, %v2791_v59  ;;  %v7521_v59 = vld [vmem:[#allocation18_spill] sm:$0xff] }
 0x50b   : > { %4927 = vmatprep.mubr.msk.bf16.mxu1 %vm5197_vm15, %v7517_v28  ;;  %v3157_v18 = vmul.f32 %v6433_v14, %v7521_v59 }
 0x5dd   : > { %v2829_v40 = vpop.f32.mrb[0].mxu1 }
 0x5de   : > { %v2830_v13 = vadd.f32 %v4889_v0, %v2829_v40  ;;  %v4923_v44 = vpop.f32.mrb[1].mxu1 }
 0x5df   : > { %v2832_v15 = vpop.f32.mrb[2].mxu1 }
 0x5e0   : > { %v2845_v10 = vmul.f32 %v4891_v22, %v2830_v13  ;;  %v2833_v29 = vadd.f32 %v4889_v0, %v2832_v15  ;;  %v4924_v61 = vpop.f32.mrb[3].mxu1  ;;  %vm2837_vm2 = vcmp.ge.f32.partialorder %v2830_v13, 0.0  ;;  %v7524_v15 = vld [vmem:[#allocation28_spill] sm:$0xff] }
 0x5e2   : > { %vm2838_vm3 = vcmp.ge.f32.partialorder %v2833_v29, 0.0  ;;  %v2846_v54 = vmul.f32 %v4891_v22, %v2833_v29  ;;  %v2847_v41 = vsel %vm2837_vm2, %v2830_v13, %v2845_v10  ;;  %v7523_v13 = vld [vmem:[#allocation19_spill] sm:$0xff]  ;;  %v3170_v10 = vmul.f32 %v6433_v14, %v7524_v15 }
 0x5e3   : > { %v3171_v44 = vmul.f32 %v6433_v14, %v7523_v13 }
 0x5e4   : > { %v2848_v48 = vsel %vm2838_vm3, %v2833_v29, %v2846_v54  ;;  %v7525_v54 = vld [vmem:[#allocation20_spill] sm:$0xff] }
 0x5e5   : > { %v2849_v24 = vpack.c.bf16 %v2848_v48, %v2847_v41  ;;  %v6475_v41 = vmul.f32 %v6433_v14, %v7525_v54  ;;  %v7532_v54 = vld [vmem:[#allocation37_spill] sm:$0xff] }
 0x5e7   : > { %4896 = vmatmul.mubr.msk.bf16.vlgmr.msra.gmra.mrb[4].mxu0 %vm2889_vm4, %v2849_v24 }
 0x5e8   : > { %4933 = vmatprep.mubr.msk.bf16.mxu0 %vm5197_vm15, %v7517_v28 }
 0x6ba   : > { %v2927_v56 = vpop.f32.mrb[4].mxu0 }
 0x6bb   : > { %v2929_v45 = vpop.f32.mrb[5].mxu0  ;;  %v6411_v4 = vadd.f32 %v2927_v56, %v2862_v43  ;;  %v7527_v56 = vld [vmem:[#allocation21_spill] sm:$0xff] }
 0x6bc   : > { %v2930_v33 = vadd.f32 %v2929_v45, %v2866_v31  ;;  %v2931_v30 = vpop.f32.mrb[6].mxu0  ;;  %v3159_v45 = vmul.f32 %v6433_v14, %v7527_v56 }
 0x6bd   : > { %v6413_v11 = vadd.f32 %v2931_v30, %v2862_v43  ;;  %v2933_v55 = vpop.f32.mrb[7].mxu0 }
 0x6be   : > { %v2938_v63 = vcombine.high %v2930_v33, %v2930_v33  ;;  %v2945_v28 = vrot.slane %v2930_v33, %v7518_v32  ;;  %v2934_v37 = vadd.f32 %v2933_v55, %v2866_v31  ;;  %v7526_v31 = vld [vmem:[#allocation30_spill] sm:$0xff]  ;;  %v7528_v55 = vld [vmem:[#allocation32_spill] sm:$0xff] }
 0x6bf   : > { %v4346_v60 = vpack.c.bf16 %v6413_v11, %v6411_v4  ;;  %v6483_v43 = vmul.f32 %v6433_v14, %v7526_v31  ;;  %v6528_v31 = vld [vmem:[%s7294_s12] ss:$0 sm:$0xff] }
 0x6c0   : > { %v6419_v39 = vrot.slane %v2938_v63, %v7518_v32  ;;  %v2953_v25 = vcombine.high %v2945_v28, %v2945_v28  ;;  %v2961_v49 = vrot.slane %v2945_v28, %v7518_v32  ;;  %v2987_v34 = vcombine.high %v2934_v37, %v2934_v37  ;;  %v7529_v28 = vld [vmem:[#allocation22_spill] sm:$0xff] }
 0x6c1   : > { %v2994_v5 = vrot.slane %v2934_v37, %v7518_v32  ;;  %4926 = vmatpush3.bf16.msra.mxu1 %v4346_v60  ;;  %v3158_v63 = vmul.f32 %v6433_v14, %v7528_v55  ;;  %v6494_v37 = vmul.f32 %v6433_v14, %v7529_v28 }
 0x6c2   : > { %v6425_v46 = vrot.slane %v6419_v39, %v7518_v32  ;;  %v6428_v58 = vrot.slane %v2953_v25, %v7518_v32  ;;  %v2983_v52 = vcombine.high %v2961_v49, %v2961_v49  ;;  %v3039_v12 = vrot.slane %v2961_v49, %v5353_v8  ;;  %v7530_v49 = vld [vmem:[#allocation34_spill] sm:$0xff] }
 0x6c3   : > { %v6437_v42 = vrot.slane %v2987_v34, %v7518_v32  ;;  %v3002_v19 = vcombine.high %v2994_v5, %v2994_v5  ;;  %v3010_v23 = vrot.slane %v2994_v5, %v7518_v32  ;;  %v6500_v34 = vmul.f32 %v6433_v14, %v7530_v49  ;;  %v7531_v5 = vld [vmem:[#allocation23_spill] sm:$0xff] }
 0x6c4   : > { %v3043_v20 = vrot.slane %v6428_v58, %v5353_v8  ;;  %v3047_v26 = vrot.slane %v2983_v52, %v5353_v8  ;;  %v6445_v57 = vrot.slane %v6425_v46, %v5353_v8  ;;  %v3116_v2 = vadd.f32 %v3039_v12, %v6411_v4 }
 0x6c5   : > { %v6464_v22 = vrot.slane %v6437_v42, %v7518_v32  ;;  %v6471_v29 = vrot.slane %v3002_v19, %v7518_v32  ;;  %v3032_v61 = vcombine.high %v3010_v23, %v3010_v23  ;;  %v3071_v48 = vrot.slane %v3010_v23, %v5353_v8 }
 0x6c6   : > { %v3118_v35 = vadd.f32 %v3043_v20, %v6411_v4  ;;  %v3120_v0 = vadd.f32 %v3047_v26, %v6411_v4  ;;  %v6460_v40 = vadd.f32 %v6445_v57, %v6411_v4  ;;  %v3117_v47 = vadd.f32 %v3039_v12, %v6413_v11 }
 0x6c7   : > { %v3087_v24 = vrot.slane %v6464_v22, %v5353_v8  ;;  %v3075_v33 = vrot.slane %v6471_v29, %v5353_v8  ;;  %v3079_v30 = vrot.slane %v3032_v61, %v5353_v8  ;;  %v3132_v60 = vadd.f32 %v3071_v48, %v6411_v4 }
 0x6c8   : > { %v3133_v25 = vadd.f32 %v3071_v48, %v6413_v11  ;;  %v6504_v52 = vmul.f32 %v6433_v14, %v7531_v5  ;;  %v3187_v51 = vadd.f32 %v3155_v7, %v3117_v47  ;;  %v3186_v13 = vadd.f32 %v3154_v17, %v3116_v2  ;;  %v7534_v5 = vld [vmem:[#allocation27_spill] sm:$0xff] }
 0x6c9   : > { %v3134_v12 = vadd.f32 %v3075_v33, %v6411_v4  ;;  %v3135_v19 = vadd.f32 %v3075_v33, %v6413_v11  ;;  %v6509_v23 = vadd.f32 %v3079_v30, %v6411_v4  ;;  %v6512_v3 = vadd.f32 %v3079_v30, %v6413_v11 }
 0x6ca   : > { %v6515_v1 = vadd.f32 %v3087_v24, %v6411_v4  ;;  %v6518_v59 = vadd.f32 %v3087_v24, %v6413_v11  ;;  %v3188_v15 = vadd.f32 %v3156_v38, %v3118_v35  ;;  %v3119_v61 = vadd.f32 %v3043_v20, %v6413_v11  ;;  %v7533_v38 = vld [vmem:[#allocation39_spill] sm:$0xff] }
 0x6cb   : > { %v6523_v48 = vmul.f32 %v6433_v14, %v7532_v54  ;;  %v3202_v56 = vadd.f32 %v3170_v10, %v3132_v60  ;;  %v3203_v33 = vadd.f32 %v3171_v44, %v3133_v25  ;;  %v3121_v30 = vadd.f32 %v3047_v26, %v6413_v11 }
 0x6cc   : > { %vm3219_vm5 = vcmp.ge.f32.partialorder %v3187_v51, 0.0  ;;  %v3251_v24 = vmul.f32 0.2, %v3187_v51  ;;  %vm3218_vm15 = vcmp.ge.f32.partialorder %v3186_v13, 0.0  ;;  %v3250_v2 = vmul.f32 0.2, %v3186_v13 }
 0x6cd   : > { %v6533_v20 = vmul.f32 %v6433_v14, %v7533_v38  ;;  %vm3220_vm2 = vcmp.ge.f32.partialorder %v3188_v15, 0.0  ;;  %v3252_v17 = vmul.f32 0.2, %v3188_v15  ;;  %v3189_v7 = vadd.f32 %v3157_v18, %v3119_v61  ;;  %v7535_v18 = vld [vmem:[#allocation41_spill] sm:$0xff] }
 0x6ce   : > { %v2954_v35 = vcombine.high %v6419_v39, %v6419_v39  ;;  %v3283_v47 = vsel %vm3219_vm5, %v3187_v51, %v3251_v24  ;;  %v3282_v55 = vsel %vm3218_vm15, %v3186_v13, %v3250_v2  ;;  %v3190_v10 = vadd.f32 %v3158_v63, %v3120_v0  ;;  %v7536_v0 = vld [vmem:[#allocation29_spill] sm:$0xff] }
 0x6cf   : > { %v3321_v44 = vmul.f32 %v6528_v31, %v3283_v47  ;;  %v3320_v26 = vmul.f32 %v6528_v31, %v3282_v55  ;;  %vm3221_vm3 = vcmp.ge.f32.partialorder %v3189_v7, 0.0  ;;  %v3266_v28 = vmul.f32 0.2, %v3202_v56 }
 0x6d0   : > { %v3284_v60 = vsel %vm3220_vm2, %v3188_v15, %v3252_v17  ;;  %v3253_v25 = vmul.f32 0.2, %v3189_v7  ;;  %vm3234_vm4 = vcmp.ge.f32.partialorder %v3202_v56, 0.0  ;;  %v3267_v49 = vmul.f32 0.2, %v3203_v33 }
 0x6d1   : > { %v3163_v54 = vmul.f32 %v6433_v14, %v7534_v5  ;;  %v3162_v61 = vmul.f32 %v6433_v14, %v7535_v18  ;;  %3354 = vadd.xlane.f32.xlu0 %v3321_v44  ;;  %3352 = vadd.xlane.f32.xlu1 %v3320_v26  ;;  %vm3235_vm5 = vcmp.ge.f32.partialorder %v3203_v33, 0.0  ;;  %v3191_v39 = vadd.f32 %v3159_v45, %v3121_v30 }
 0x6d2   : > { %v6545_v63 = vmul.f32 %v6433_v14, %v7536_v0  ;;  %v6548_v51 = vrot.slane %v2954_v35, %v7518_v32  ;;  %v3285_v13 = vsel %vm3221_vm3, %v3189_v7, %v3253_v25  ;;  %v3125_v15 = vadd.f32 %v6445_v57, %v6413_v11  ;;  %v7537_v35 = vld [vmem:[#allocation43_spill] sm:$0xff] }
 0x6d3   : > { %v2985_v24 = vcombine.high %v6428_v58, %v6428_v58  ;;  %v3322_v2 = vmul.f32 %v6528_v31, %v3284_v60  ;;  %v3323_v38 = vmul.f32 %v6528_v31, %v3285_v13  ;;  %v3298_v17 = vsel %vm3234_vm4, %v3202_v56, %v3266_v28 }
 0x6d4   : > { %v3299_v45 = vsel %vm3235_vm5, %v3203_v33, %v3267_v49  ;;  %v3254_v30 = vmul.f32 0.2, %v3190_v10  ;;  %v3255_v47 = vmul.f32 0.2, %v3191_v39  ;;  %v3194_v55 = vadd.f32 %v3162_v61, %v6460_v40 }
 0x6d5   : > { %3356 = vadd.xlane.f32.xlu0 %v3322_v2  ;;  %3358 = vadd.xlane.f32.xlu1 %v3323_v38  ;;  %vm3222_vm15 = vcmp.ge.f32.partialorder %v3190_v10, 0.0  ;;  %vm3223_vm2 = vcmp.ge.f32.partialorder %v3191_v39, 0.0  ;;  %v3195_v7 = vadd.f32 %v3163_v54, %v3125_v15  ;;  %v3204_v57 = vadd.f32 %v6483_v43, %v3134_v12 }
 0x6d6   : > { %v3178_v58 = vmul.f32 %v6433_v14, %v7537_v35  ;;  %v2984_v44 = vcombine.high %v6425_v46, %v6425_v46  ;;  %v3003_v56 = vcombine.high %v6437_v42, %v6437_v42  ;;  %v3205_v33 = vadd.f32 %v6475_v41, %v3135_v19 }
 0x6d7   : > { %v3051_v40 = vrot.slane %v2985_v24, %v5353_v8  ;;  %v3059_v26 = vrot.slane %v6548_v51, %v5353_v8  ;;  %v3336_v28 = vmul.f32 %v6528_v31, %v3298_v17  ;;  %v3337_v43 = vmul.f32 %v6528_v31, %v3299_v45  ;;  %v7538_v17 = vld [vmem:[#allocation44_spill] sm:$0xff] }
 0x6d8   : > { %v3286_v12 = vsel %vm3222_vm15, %v3190_v10, %v3254_v30  ;;  %v3287_v60 = vsel %vm3223_vm2, %v3191_v39, %v3255_v47  ;;  %v3258_v25 = vmul.f32 0.2, %v3194_v55  ;;  %v3259_v49 = vmul.f32 0.2, %v3195_v7 }
 0x6d9   : > { %3384 = vadd.xlane.f32.xlu0 %v3336_v28  ;;  %3386 = vadd.xlane.f32.xlu1 %v3337_v43  ;;  %vm3226_vm3 = vcmp.ge.f32.partialorder %v3194_v55, 0.0  ;;  %vm3227_vm4 = vcmp.ge.f32.partialorder %v3195_v7, 0.0  ;;  %v3268_v46 = vmul.f32 0.2, %v3204_v57  ;;  %v3206_v42 = vadd.f32 %v6500_v34, %v6509_v23 }
 0x6da   : > { %v6573_v41 = vrot.slane %v3003_v56, %v7518_v32  ;;  %vm3236_vm5 = vcmp.ge.f32.partialorder %v3204_v57, 0.0  ;;  %v3269_v19 = vmul.f32 0.2, %v3205_v33  ;;  %v3207_v5 = vadd.f32 %v6494_v37, %v6512_v3 }
 0x6db   : > { %v3324_v10 = vmul.f32 %v6528_v31, %v3286_v12  ;;  %v3325_v54 = vmul.f32 %v6528_v31, %v3287_v60  ;;  %vm3237_vm15 = vcmp.ge.f32.partialorder %v3205_v33, 0.0  ;;  %v3122_v18 = vadd.f32 %v3051_v40, %v6411_v4 }
 0x6dc   : > { %v3034_v61 = vcombine.high %v6471_v29, %v6471_v29  ;;  %v3290_v39 = vsel %vm3226_vm3, %v3194_v55, %v3258_v25  ;;  %v3291_v34 = vsel %vm3227_vm4, %v3195_v7, %v3259_v49  ;;  %v3123_v32 = vadd.f32 %v3051_v40, %v6413_v11  ;;  %v7539_v25 = vld [vmem:[#allocation31_spill] sm:$0xff] }
 0x6dd   : > { %v3063_v23 = vrot.slane %v2984_v44, %v5353_v8  ;;  %3360 = vadd.xlane.f32.xlu0 %v3324_v10  ;;  %3362 = vadd.xlane.f32.xlu1 %v3325_v54  ;;  %v3300_v0 = vsel %vm3236_vm5, %v3204_v57, %v3268_v46  ;;  %vm3238_vm2 = vcmp.ge.f32.partialorder %v3206_v42, 0.0  ;;  %v3270_v37 = vmul.f32 0.2, %v3206_v42 }
 0x6de   : > { %v3301_v3 = vsel %vm3237_vm15, %v3205_v33, %v3269_v19  ;;  %v3271_v13 = vmul.f32 0.2, %v3207_v5  ;;  %v3192_v15 = vadd.f32 %v6523_v48, %v3122_v18  ;;  %v3126_v24 = vadd.f32 %v3059_v26, %v6411_v4  ;;  %v7541_v18 = vld [vmem:[#allocation46_spill] sm:$0xff] }
 0x6df   : > { %v3328_v2 = vmul.f32 %v6528_v31, %v3290_v39  ;;  %v3329_v29 = vmul.f32 %v6528_v31, %v3291_v34  ;;  %vm3239_vm3 = vcmp.ge.f32.partialorder %v3207_v5, 0.0  ;;  %v3193_v38 = vadd.f32 %v6504_v52, %v3123_v32 }
 0x6e0   : > { %v3164_v45 = vmul.f32 %v6433_v14, %v7538_v17  ;;  %v3033_v30 = vcombine.high %v6464_v22, %v6464_v22  ;;  %v3083_v47 = vrot.slane %v3034_v61, %v5353_v8  ;;  %v3091_v48 = vrot.slane %v6573_v41, %v5353_v8  ;;  %v7542_v17 = vld [vmem:[#allocation25_spill] sm:$0xff] }
 0x6e1   : > { %3368 = vadd.xlane.f32.xlu0 %v3328_v2  ;;  %3370 = vadd.xlane.f32.xlu1 %v3329_v29  ;;  %v3338_v55 = vmul.f32 %v6528_v31, %v3300_v0  ;;  %v3339_v7 = vmul.f32 %v6528_v31, %v3301_v3  ;;  %v3302_v57 = vsel %vm3238_vm2, %v3206_v42, %v3270_v37  ;;  %vm3224_vm4 = vcmp.ge.f32.partialorder %v3192_v15, 0.0 }
 0x6e2   : > { %v3303_v52 = vsel %vm3239_vm3, %v3207_v5, %v3271_v13  ;;  %v3210_v35 = vadd.f32 %v3178_v58, %v6515_v1  ;;  %v3211_v22 = vadd.f32 %v6545_v63, %v6518_v59  ;;  %v3256_v44 = vmul.f32 0.2, %v3192_v15  ;;  %v7540_v5 = vld [vmem:[#allocation35_spill] sm:$0xff] }
 0x6e3   : > { %v3257_v56 = vmul.f32 0.2, %v3193_v38  ;;  %v3127_v33 = vadd.f32 %v3059_v26, %v6413_v11  ;;  %v3128_v40 = vadd.f32 %v3063_v23, %v6411_v4  ;;  %v3129_v28 = vadd.f32 %v3063_v23, %v6413_v11 }
 0x6e4   : > { %v3138_v43 = vadd.f32 %v3083_v47, %v6411_v4  ;;  %v3139_v12 = vadd.f32 %v3083_v47, %v6413_v11  ;;  %v6608_v60 = vadd.f32 %v3091_v48, %v6411_v4  ;;  %v3165_v1 = vmul.f32 %v6433_v14, %v7539_v25  ;;  %v7544_v25 = vld [vmem:[#allocation45_spill] sm:$0xff] }
 0x6e5   : > { %v2986_v59 = vcombine.high %v6548_v51, %v6548_v51  ;;  %v3035_v63 = vcombine.high %v6573_v41, %v6573_v41  ;;  %3388 = vadd.xlane.f32.xlu0 %v3338_v55  ;;  %3390 = vadd.xlane.f32.xlu1 %v3339_v7  ;;  %vm3225_vm5 = vcmp.ge.f32.partialorder %v3193_v38, 0.0  ;;  %v3340_v58 = vmul.f32 %v6528_v31, %v3302_v57 }
 0x6e6   : > { %v3274_v26 = vmul.f32 0.2, %v3210_v35  ;;  %v3275_v49 = vmul.f32 0.2, %v3211_v22  ;;  %v3196_v46 = vadd.f32 %v3164_v45, %v3126_v24  ;;  %v3341_v42 = vmul.f32 %v6528_v31, %v3303_v52 }
 0x6e7   : > { %v3288_v19 = vsel %vm3224_vm4, %v3192_v15, %v3256_v44  ;;  %vm3242_vm15 = vcmp.ge.f32.partialorder %v3210_v35, 0.0  ;;  %vm3243_vm2 = vcmp.ge.f32.partialorder %v3211_v22, 0.0  ;;  %v3167_v51 = vmul.f32 %v6433_v14, %v7540_v5 }
 0x6e8   : > { %v3095_v10 = vrot.slane %v3033_v30, %v5353_v8  ;;  %v3289_v41 = vsel %vm3225_vm5, %v3193_v38, %v3257_v56  ;;  %v3197_v54 = vadd.f32 %v3165_v1, %v3127_v33  ;;  %v3166_v61 = vmul.f32 %v6433_v14, %v7541_v18 }
 0x6e9   : > { %v3067_v39 = vrot.slane %v2986_v59, %v5353_v8  ;;  %v3099_v34 = vrot.slane %v3035_v63, %v5353_v8  ;;  %3392 = vadd.xlane.f32.xlu0 %v3340_v58  ;;  %3394 = vadd.xlane.f32.xlu1 %v3341_v42  ;;  %v3326_v32 = vmul.f32 %v6528_v31, %v3288_v19  ;;  %vm3228_vm3 = vcmp.ge.f32.partialorder %v3196_v46, 0.0 }
 0x6ea   : > { %v3306_v23 = vsel %vm3242_vm15, %v3210_v35, %v3274_v26  ;;  %v3307_v0 = vsel %vm3243_vm2, %v3211_v22, %v3275_v49  ;;  %v3327_v37 = vmul.f32 %v6528_v31, %v3289_v41  ;;  %v3260_v3 = vmul.f32 0.2, %v3196_v46  ;;  %v7545_v26 = vld [vmem:[#allocation38_spill] sm:$0xff] }
 0x6eb   : > { %v3198_v13 = vadd.f32 %v3166_v61, %v3128_v40  ;;  %v3199_v15 = vadd.f32 %v3167_v51, %v3129_v28  ;;  %v3261_v24 = vmul.f32 0.2, %v3197_v54  ;;  %v3143_v2 = vadd.f32 %v3091_v48, %v6413_v11  ;;  %v7543_v40 = vld [vmem:[#allocation33_spill] sm:$0xff] }
 0x6ec   : > { %v3144_v29 = vadd.f32 %v3095_v10, %v6411_v4  ;;  %v3145_v38 = vadd.f32 %v3095_v10, %v6413_v11  ;;  %v3177_v45 = vmul.f32 %v6433_v14, %v7542_v17  ;;  %vm3229_vm4 = vcmp.ge.f32.partialorder %v3197_v54, 0.0  ;;  %v7550_v17 = vld [vmem:[#allocation49_spill] sm:$0xff] }
 0x6ed   : > { %3364 = vadd.xlane.f32.xlu0 %v3326_v32  ;;  %3366 = vadd.xlane.f32.xlu1 %v3327_v37  ;;  %v3130_v30 = vadd.f32 %v3067_v39, %v6411_v4  ;;  %v3131_v47 = vadd.f32 %v3067_v39, %v6413_v11  ;;  %v3344_v55 = vmul.f32 %v6528_v31, %v3306_v23  ;;  %v3262_v35 = vmul.f32 0.2, %v3198_v13 }
 0x6ee   : > { %v3345_v7 = vmul.f32 %v6528_v31, %v3307_v0  ;;  %v3208_v48 = vadd.f32 %v6533_v20, %v3138_v43  ;;  %v3146_v57 = vadd.f32 %v3099_v34, %v6411_v4  ;;  %v3292_v52 = vsel %vm3228_vm3, %v3196_v46, %v3260_v3  ;;  %v7546_v46 = vld [vmem:[#allocation47_spill] sm:$0xff] }
 0x6ef   : > { %v3209_v22 = vadd.f32 %v3177_v45, %v3139_v12  ;;  %v3147_v44 = vadd.f32 %v3099_v34, %v6413_v11  ;;  %v3293_v56 = vsel %vm3229_vm4, %v3197_v54, %v3261_v24  ;;  %vm3230_vm5 = vcmp.ge.f32.partialorder %v3198_v13, 0.0  ;;  %v7548_v34 = vld [vmem:[#allocation48_spill] sm:$0xff] }
 0x6f0   : > { %v3263_v33 = vmul.f32 0.2, %v3199_v15  ;;  %vm3231_vm15 = vcmp.ge.f32.partialorder %v3199_v15, 0.0  ;;  %v3181_v28 = vmul.f32 %v6433_v14, %v7543_v40  ;;  %v3180_v20 = vmul.f32 %v6433_v14, %v7544_v25 }
 0x6f1   : > { %3400 = vadd.xlane.f32.xlu0 %v3344_v55  ;;  %3402 = vadd.xlane.f32.xlu1 %v3345_v7  ;;  %v3330_v4 = vmul.f32 %v6528_v31, %v3292_v52  ;;  %vm3240_vm2 = vcmp.ge.f32.partialorder %v3208_v48, 0.0  ;;  %v3331_v43 = vmul.f32 %v6528_v31, %v3293_v56  ;;  %v3294_v12 = vsel %vm3230_vm5, %v3198_v13, %v3262_v35 }
 0x6f2   : > { %v3272_v1 = vmul.f32 0.2, %v3208_v48  ;;  %v3273_v11 = vmul.f32 0.2, %v3209_v22  ;;  %v3295_v59 = vsel %vm3231_vm15, %v3199_v15, %v3263_v33  ;;  %vm3241_vm3 = vcmp.ge.f32.partialorder %v3209_v22, 0.0 }
 0x6f3   : > { %v3212_v63 = vadd.f32 %v3180_v20, %v6608_v60  ;;  %v3213_v58 = vadd.f32 %v3181_v28, %v3143_v2  ;;  %v3183_v49 = vmul.f32 %v6433_v14, %v7545_v26  ;;  %v3182_v42 = vmul.f32 %v6433_v14, %v7546_v46  ;;  %v7547_v60 = vld [vmem:[#allocation40_spill] sm:$0xff] }
 0x6f4   : > { %v3332_v19 = vmul.f32 %v6528_v31, %v3294_v12  ;;  %v3333_v5 = vmul.f32 %v6528_v31, %v3295_v59  ;;  %v3304_v51 = vsel %vm3240_vm2, %v3208_v48, %v3272_v1  ;;  %v3305_v10 = vsel %vm3241_vm3, %v3209_v22, %v3273_v11  ;;  %v7551_v59 = vld [vmem:[#allocation53_spill] sm:$0xff] }
 0x6f5   : > { %3372 = vadd.xlane.f32.xlu0 %v3330_v4  ;;  %3374 = vadd.xlane.f32.xlu1 %v3331_v43  ;;  %v3276_v41 = vmul.f32 0.2, %v3212_v63  ;;  %v3277_v54 = vmul.f32 0.2, %v3213_v58  ;;  %v3214_v18 = vadd.f32 %v3182_v42, %v3144_v29  ;;  %v3215_v61 = vadd.f32 %v3183_v49, %v3145_v38  ;;  %v7549_v29 = vld [vmem:[#allocation42_spill] sm:$0xff]  ;;  %v7553_v42 = vld [vmem:[#allocation51_spill] sm:$0xff] }
 0x6f6   : > { %v3169_v39 = vmul.f32 %v6433_v14, %v7547_v60  ;;  %v3168_v32 = vmul.f32 %v6433_v14, %v7548_v34  ;;  %vm3244_vm4 = vcmp.ge.f32.partialorder %v3212_v63, 0.0  ;;  %vm3245_vm5 = vcmp.ge.f32.partialorder %v3213_v58, 0.0  ;;  %v7557_v34 = vld [vmem:[#allocation59_spill] sm:$0xff] }
 0x6f7   : > { %v3342_v23 = vmul.f32 %v6528_v31, %v3304_v51  ;;  %v3343_v0 = vmul.f32 %v6528_v31, %v3305_v10  ;;  %v3308_v13 = vsel %vm3244_vm4, %v3212_v63, %v3276_v41  ;;  %v3309_v15 = vsel %vm3245_vm5, %v3213_v58, %v3277_v54  ;;  %v7552_v58 = vld [vmem:[#allocation50_spill] sm:$0xff]  ;;  %v7555_v41 = vld [vmem:[#allocation55_spill] sm:$0xff] }
 0x6f8   : > { %v3200_v37 = vadd.f32 %v3168_v32, %v3130_v30  ;;  %v3201_v3 = vadd.f32 %v3169_v39, %v3131_v47  ;;  %v3278_v24 = vmul.f32 0.2, %v3214_v18  ;;  %v3279_v2 = vmul.f32 0.2, %v3215_v61 }
 0x6f9   : > { %3376 = vadd.xlane.f32.xlu0 %v3332_v19  ;;  %3378 = vadd.xlane.f32.xlu1 %v3333_v5  ;;  %vm3246_vm15 = vcmp.ge.f32.partialorder %v3214_v18, 0.0  ;;  %vm3247_vm2 = vcmp.ge.f32.partialorder %v3215_v61, 0.0  ;;  %v3185_v38 = vmul.f32 %v6433_v14, %v7549_v29  ;;  %v3184_v45 = vmul.f32 %v6433_v14, %v7550_v17  ;;  %v7561_v17 = vld [vmem:[#allocation57_spill] sm:$0xff] }
 0x6fa   : > { %v3346_v55 = vmul.f32 %v6528_v31, %v3308_v13  ;;  %v3347_v7 = vmul.f32 %v6528_v31, %v3309_v15  ;;  %v3264_v30 = vmul.f32 0.2, %v3200_v37  ;;  %v3265_v47 = vmul.f32 0.2, %v3201_v3  ;;  %v7559_v13 = vld [vmem:[#allocation67_spill] sm:$0xff] }
 0x6fb   : > { %v3310_v48 = vsel %vm3246_vm15, %v3214_v18, %v3278_v24  ;;  %v3311_v52 = vsel %vm3247_vm2, %v3215_v61, %v3279_v2  ;;  %v3216_v35 = vadd.f32 %v3184_v45, %v3146_v57  ;;  %v3217_v22 = vadd.f32 %v3185_v38, %v3147_v44  ;;  %v7556_v18 = vld [vmem:[#allocation54_spill] sm:$0xff] }
 0x6fc   : > { %vm3232_vm3 = vcmp.ge.f32.partialorder %v3200_v37, 0.0  ;;  %vm3233_vm4 = vcmp.ge.f32.partialorder %v3201_v3, 0.0  ;;  %v3348_v56 = vmul.f32 %v6528_v31, %v3310_v48  ;;  %v3349_v33 = vmul.f32 %v6528_v31, %v3311_v52  ;;  %v7560_v24 = vld [vmem:[#allocation66_spill] sm:$0xff]  ;;  %v7564_v48 = vld [vmem:[#allocation61_spill] sm:$0xff] }
 0x6fd   : > { %3396 = vadd.xlane.f32.xlu0 %v3342_v23  ;;  %3398 = vadd.xlane.f32.xlu1 %v3343_v0  ;;  %v3296_v40 = vsel %vm3232_vm3, %v3200_v37, %v3264_v30  ;;  %v3297_v14 = vsel %vm3233_vm4, %v3201_v3, %v3265_v47  ;;  %v3280_v28 = vmul.f32 0.2, %v3216_v35  ;;  %v3281_v25 = vmul.f32 0.2, %v3217_v22  ;;  %v7558_v23 = vld [vmem:[#allocation58_spill] sm:$0xff] }
 0x6fe   : > { %vm3248_vm5 = vcmp.ge.f32.partialorder %v3216_v35, 0.0  ;;  %vm3249_vm1 = vcmp.ge.f32.partialorder %v3217_v22, 0.0  ;;  %v3334_v20 = vmul.f32 %v6528_v31, %v3296_v40  ;;  %v3335_v57 = vmul.f32 %v6528_v31, %v3297_v14  ;;  %v7568_v40 = vld [vmem:[#allocation63_spill] sm:$0xff] }
 0x6ff   : > { %v3312_v44 = vsel %vm3248_vm5, %v3216_v35, %v3280_v28  ;;  %v3313_v4 = vsel %vm3249_vm1, %v3217_v22, %v3281_v25  ;;  %v7566_v35 = vld [vmem:[#allocation60_spill] sm:$0xff]  ;;  %v7569_v28 = vld [vmem:[#allocation62_spill] sm:$0xff]  ;;  %vm7611_vm1 = vcmask 64512  }
 0x700   : > { %v3350_v43 = vmul.f32 %v6528_v31, %v3312_v44  ;;  %v3351_v12 = vmul.f32 %v6528_v31, %v3313_v4  ;;  %v7554_v31 = vld [vmem:[#allocation52_spill] sm:$0xff]  ;;  %v7570_v44 = vld [vmem:[#allocation69_spill] sm:$0xff] }
 0x701   : > { %3404 = vadd.xlane.f32.xlu0 %v3346_v55  ;;  %3406 = vadd.xlane.f32.xlu1 %v3347_v7  ;;  %v7563_v55 = vld [vmem:[#allocation56_spill] sm:$0xff] }
 0x705   : > { %3408 = vadd.xlane.f32.xlu0 %v3348_v56  ;;  %3410 = vadd.xlane.f32.xlu1 %v3349_v33 }
 0x709   : > { %3380 = vadd.xlane.f32.xlu0 %v3334_v20  ;;  %3382 = vadd.xlane.f32.xlu1 %v3335_v57 }
 0x70d   : > { %3412 = vadd.xlane.f32.xlu0 %v3350_v43  ;;  %3414 = vadd.xlane.f32.xlu1 %v3351_v12  ;;  %v7572_v43 = vld [vmem:[#allocation68_spill] sm:$0xff] }
 0x75e   : > { %v3355_v1 = vpop.xlane.xlu0 %3354  ;;  %v3353_v11 = vpop.xlane.xlu1 %3352 }
 0x75f   : > { %v6673_v63 = vadd.f32 %v3355_v1, %v7551_v59  ;;  %v6676_v26 = vadd.f32 %v3353_v11, %v7552_v58  ;;  %v7574_v59 = vld [vmem:[#allocation71_spill] sm:$0xff] }
 0x761   : > { %3484 = vperm.xlu1 %4983, %v6673_v63   ;;  %3481 = vperm.xlu0 %4982, %v6676_v26  }
 0x762   : > { %v3357_v49 = vpop.xlane.xlu0 %3356  ;;  %v3359_v46 = vpop.xlane.xlu1 %3358 }
 0x763   : > { %v6681_v19 = vadd.f32 %v3357_v49, %v7553_v42  ;;  %v6684_v5 = vadd.f32 %v3359_v46, %v7554_v31  ;;  %v7575_v49 = vld [vmem:[#allocation70_spill] sm:$0xff] }
 0x765   : > { %3487 = vperm.xlu1 %4983, %v6681_v19   ;;  %3490 = vperm.xlu0 %4982, %v6684_v5  }
 0x766   : > { %v3385_v51 = vpop.xlane.xlu0 %3384  ;;  %v3387_v10 = vpop.xlane.xlu1 %3386 }
 0x767   : > { %v6689_v54 = vadd.f32 %v3385_v51, %v7555_v41  ;;  %v6692_v61 = vadd.f32 %v3387_v10, %v7556_v18  ;;  %v7576_v51 = vld [vmem:[#allocation75_spill] sm:$0xff]  ;;  %v7577_v41 = vld [vmem:[#allocation74_spill] sm:$0xff] }
 0x769   : > { %3529 = vperm.xlu1 %4983, %v6689_v54   ;;  %3532 = vperm.xlu0 %4982, %v6692_v61  }
 0x76a   : > { %v3361_v60 = vpop.xlane.xlu0 %3360  ;;  %v3363_v39 = vpop.xlane.xlu1 %3362 }
 0x76b   : > { %v6697_v32 = vadd.f32 %v3361_v60, %v7557_v34  ;;  %v6700_v0 = vadd.f32 %v3363_v39, %v7558_v23  ;;  %v7578_v34 = vld [vmem:[#allocation65_spill] sm:$0xff] }
 0x76d   : > { %3493 = vperm.xlu1 %4983, %v6697_v32   ;;  %3496 = vperm.xlu0 %4982, %v6700_v0  }
 0x76e   : > { %v3369_v37 = vpop.xlane.xlu0 %3368  ;;  %v3371_v3 = vpop.xlane.xlu1 %3370 }
 0x76f   : > { %v6705_v15 = vadd.f32 %v3369_v37, %v7559_v13  ;;  %v6708_v2 = vadd.f32 %v3371_v3, %v7560_v24  ;;  %v7580_v37 = vld [vmem:[#allocation64_spill] sm:$0xff] }
 0x771   : > { %3505 = vperm.xlu1 %4983, %v6705_v15   ;;  %3508 = vperm.xlu0 %4982, %v6708_v2  }
 0x772   : > { %v3389_v29 = vpop.xlane.xlu0 %3388  ;;  %v3391_v38 = vpop.xlane.xlu1 %3390 }
 0x773   : > { %v6713_v45 = vadd.f32 %v3389_v29, %v7561_v17  ;;  %v6716_v7 = vadd.f32 %v3391_v38, %v7563_v55  ;;  %v7582_v29 = vld [vmem:[#allocation73_spill] sm:$0xff]  ;;  %v7584_v17 = vld [vmem:[#allocation72_spill] sm:$0xff] }
 0x775   : > { %7562 = vst [vmem:[#allocation9_spill] sm:$0xff] %v6713_v45  ;;  %3535 = vperm.xlu1 %4983, %v6713_v45   ;;  %3538 = vperm.xlu0 %4982, %v6716_v7  }
 0x776   : > { %v3393_v30 = vpop.xlane.xlu0 %3392  ;;  %v3395_v47 = vpop.xlane.xlu1 %3394 }
 0x777   : > { %v6721_v52 = vadd.f32 %v3393_v30, %v7564_v48  ;;  %v6724_v22 = vadd.f32 %v3395_v47, %v7566_v35  ;;  %v7586_v48 = vld [vmem:[#allocation77_spill] sm:$0xff] }
 0x779   : > { %7565 = vst [vmem:[#allocation8_spill] sm:$0xff] %v6721_v52  ;;  %7567 = vst [vmem:[#allocation11_spill] sm:$0xff] %v6724_v22  ;;  %3541 = vperm.xlu1 %4983, %v6721_v52   ;;  %3544 = vperm.xlu0 %4982, %v6724_v22  }
 0x77a   : > { %v3365_v56 = vpop.xlane.xlu0 %3364  ;;  %v3367_v33 = vpop.xlane.xlu1 %3366 }
 0x77b   : > { %v6729_v14 = vadd.f32 %v3365_v56, %v7568_v40  ;;  %v6732_v25 = vadd.f32 %v3367_v33, %v7569_v28  ;;  %v7588_v56 = vld [vmem:[#allocation76_spill] sm:$0xff] }
 0x77d   : > { %3499 = vperm.xlu1 %4983, %v6729_v14   ;;  %3502 = vperm.xlu0 %4982, %v6732_v25  }
 0x77e   : > { %v3401_v20 = vpop.xlane.xlu0 %3400  ;;  %v3403_v57 = vpop.xlane.xlu1 %3402 }
 0x77f   : > { %v6737_v4 = vadd.f32 %v3401_v20, %v7570_v44  ;;  %v6740_v12 = vadd.f32 %v3403_v57, %v7572_v43  ;;  %v7590_v20 = vld [vmem:[#allocation79_spill] sm:$0xff]  ;;  %v7591_v44 = vld [vmem:[#allocation78_spill] sm:$0xff] }
 0x781   : > { %7571 = vst [vmem:[#allocation12_spill] sm:$0xff] %v6737_v4  ;;  %7573 = vst [vmem:[#allocation13_spill] sm:$0xff] %v6740_v12  ;;  %3553 = vperm.xlu1 %4983, %v6737_v4   ;;  %3556 = vperm.xlu0 %4982, %v6740_v12  }
 0x782   : > { %v3373_v1 = vpop.xlane.xlu0 %3372  ;;  %v3375_v11 = vpop.xlane.xlu1 %3374 }
 0x783   : > { %v6745_v58 = vadd.f32 %v3373_v1, %v7574_v59  ;;  %v6748_v46 = vadd.f32 %v3375_v11, %v7575_v49  ;;  %v7592_v59 = vld [vmem:[#allocation81_spill] sm:$0xff] }
 0x785   : > { %3511 = vperm.xlu1 %4983, %v6745_v58   ;;  %3514 = vperm.xlu0 %4982, %v6748_v46  }
 0x786   : > { %v3377_v42 = vpop.xlane.xlu0 %3376  ;;  %v3379_v31 = vpop.xlane.xlu1 %3378 }
 0x787   : > { %v6753_v10 = vadd.f32 %v3377_v42, %v7576_v51  ;;  %v6756_v18 = vadd.f32 %v3379_v31, %v7577_v41  ;;  %v7594_v42 = vld [vmem:[#allocation80_spill] sm:$0xff] }
 0x789   : > { %3517 = vperm.xlu1 %4983, %v6753_v10   ;;  %3520 = vperm.xlu0 %4982, %v6756_v18  }
 0x78a   : > { %v3397_v60 = vpop.xlane.xlu0 %3396  ;;  %v3399_v39 = vpop.xlane.xlu1 %3398 }
 0x78b   : > { %v6761_v23 = vadd.f32 %v3397_v60, %v7578_v34  ;;  %v6764_v3 = vadd.f32 %v3399_v39, %v7580_v37 }
 0x78d   : > { %7579 = vst [vmem:[#allocation14_spill] sm:$0xff] %v6761_v23  ;;  %7581 = vst [vmem:[#allocation15_spill] sm:$0xff] %v6764_v3  ;;  %3547 = vperm.xlu1 %4983, %v6761_v23   ;;  %3550 = vperm.xlu0 %4982, %v6764_v3  }
 0x78e   : > { %v3405_v13 = vpop.xlane.xlu0 %3404  ;;  %v3407_v24 = vpop.xlane.xlu1 %3406 }
 0x78f   : > { %v6769_v38 = vadd.f32 %v3405_v13, %v7582_v29  ;;  %v6772_v55 = vadd.f32 %v3407_v24, %v7584_v17 }
 0x791   : > { %7583 = vst [vmem:[#allocation16_spill] sm:$0xff] %v6769_v38  ;;  %7585 = vst [vmem:[#allocation84_spill] sm:$0xff] %v6772_v55  ;;  %3559 = vperm.xlu1 %4983, %v6769_v38   ;;  %3562 = vperm.xlu0 %4982, %v6772_v55  }
 0x792   : > { %v3409_v30 = vpop.xlane.xlu0 %3408  ;;  %v3411_v47 = vpop.xlane.xlu1 %3410 }
 0x793   : > { %v6777_v35 = vadd.f32 %v3409_v30, %v7586_v48  ;;  %v6780_v33 = vadd.f32 %v3411_v47, %v7588_v56 }
 0x795   : > { %7587 = vst [vmem:[#allocation82_spill] sm:$0xff] %v6777_v35  ;;  %7589 = vst [vmem:[#allocation85_spill] sm:$0xff] %v6780_v33  ;;  %3565 = vperm.xlu1 %4983, %v6777_v35   ;;  %3568 = vperm.xlu0 %4982, %v6780_v33  }
 0x796   : > { %v3381_v40 = vpop.xlane.xlu0 %3380  ;;  %v3383_v28 = vpop.xlane.xlu1 %3382 }
 0x797   : > { %v6785_v57 = vadd.f32 %v3381_v40, %v7590_v20  ;;  %v6788_v43 = vadd.f32 %v3383_v28, %v7591_v44 }
 0x799   : > { %3523 = vperm.xlu1 %4983, %v6785_v57   ;;  %3526 = vperm.xlu0 %4982, %v6788_v43  }
 0x79a   : > { %v3413_v1 = vpop.xlane.xlu0 %3412  ;;  %v3415_v11 = vpop.xlane.xlu1 %3414 }
 0x79b   : > { %v6793_v49 = vadd.f32 %v3413_v1, %v7592_v59  ;;  %v6796_v31 = vadd.f32 %v3415_v11, %v7594_v42 }
 0x79d   : > { %7593 = vst [vmem:[#allocation83_spill] sm:$0xff] %v6793_v49  ;;  %7595 = vst [vmem:[#allocation87_spill] sm:$0xff] %v6796_v31  ;;  %3571 = vperm.xlu1 %4983, %v6793_v49   ;;  %3574 = vperm.xlu0 %4982, %v6796_v31  }
 0x7e0   : > { %v3482_v51 = vpop.permute.xlu0 %3481  ;;  %v3485_v41 = vpop.permute.xlu1 %3484 }
 0x7e1   : > { %v3579_v49 = vrot.slane %v3482_v51, %v7501_v6  ;;  %v3583_v31 = vrot.slane %v3485_v41, %v7500_v9 }
 0x7e3   : > { %v3584_v41 = vsel %vm1711_vm6, %v3583_v31, %v3579_v49 }
 0x7e4   : > { %v3491_v60 = vpop.permute.xlu0 %3490  ;;  %v3488_v39 = vpop.permute.xlu1 %3487 }
 0x7e5   : > { %v3592_v35 = vrot.slane %v3491_v60, %v7500_v9  ;;  %v3588_v33 = vrot.slane %v3488_v39, %v7501_v6 }
 0x7e7   : > { %v3593_v60 = vsel %vm1711_vm6, %v3592_v35, %v3588_v33 }
 0x7e8   : > { %v3533_v34 = vpop.permute.xlu0 %3532  ;;  %v3530_v37 = vpop.permute.xlu1 %3529 }
 0x7e9   : > { %v3655_v39 = vrot.slane %v3533_v34, %v7500_v9 }
 0x7ec   : > { %v3497_v13 = vpop.permute.xlu0 %3496  ;;  %v3494_v24 = vpop.permute.xlu1 %3493 }
 0x7ed   : > { %v3601_v4 = vrot.slane %v3497_v13, %v7500_v9  ;;  %v3597_v12 = vrot.slane %v3494_v24, %v7501_v6  ;;  %v3651_v13 = vrot.slane %v3530_v37, %v7501_v6 }
 0x7ef   : > { %v3602_v24 = vsel %vm1711_vm6, %v3601_v4, %v3597_v12  ;;  %v3720_v12 = vsel %vm1848_vm7, %v3593_v60, %v3584_v41 }
 0x7f0   : > { %v3509_v29 = vpop.permute.xlu0 %3508  ;;  %v3506_v17 = vpop.permute.xlu1 %3505 }
 0x7f4   : > { %v3539_v30 = vpop.permute.xlu0 %3538  ;;  %v3536_v47 = vpop.permute.xlu1 %3535 }
 0x7f5   : > { %v3664_v23 = vrot.slane %v3539_v30, %v7500_v9  ;;  %v3660_v3 = vrot.slane %v3536_v47, %v7501_v6  ;;  %v3619_v30 = vrot.slane %v3509_v29, %v7500_v9  ;;  %v3615_v47 = vrot.slane %v3506_v17, %v7501_v6 }
 0x7f6   : > { %v3656_v17 = vsel %vm1711_vm6, %v3655_v39, %v3651_v13 }
 0x7f8   : > { %v3545_v48 = vpop.permute.xlu0 %3544  ;;  %v3542_v56 = vpop.permute.xlu1 %3541 }
 0x7f9   : > { %v3669_v49 = vrot.slane %v3542_v56, %v7501_v6 }
 0x7fc   : > { %v3503_v40 = vpop.permute.xlu0 %3502  ;;  %v3500_v28 = vpop.permute.xlu1 %3499 }
 0x7fd   : > { %v3610_v52 = vrot.slane %v3503_v40, %v7500_v9  ;;  %v3606_v51 = vrot.slane %v3500_v28, %v7501_v6  ;;  %v3665_v40 = vsel %vm1711_vm6, %v3664_v23, %v3660_v3  ;;  %v3673_v28 = vrot.slane %v3545_v48, %v7500_v9 }
 0x7fe   : > { %v3620_v48 = vsel %vm1711_vm6, %v3619_v30, %v3615_v47  ;;  %v3727_v56 = vsel %vm1848_vm7, %v3665_v40, %v3656_v17 }
 0x7ff   : > { %v3611_v35 = vsel %vm1711_vm6, %v3610_v52, %v3606_v51  ;;  %v3721_v52 = vsel %vm1850_vm8, %v3602_v24, %v3720_v12 }
 0x800   : > { %v6800_v20 = vpop.permute.xlu0 %3556  ;;  %v6802_v44 = vpop.permute.xlu1 %3553 }
 0x801   : > { %v3687_v41 = vrot.slane %v6802_v44, %v7501_v6 }
 0x804   : > { %v3515_v1 = vpop.permute.xlu0 %3514  ;;  %v3512_v11 = vpop.permute.xlu1 %3511 }
 0x805   : > { %v3628_v33 = vrot.slane %v3515_v1, %v7500_v9  ;;  %v3624_v31 = vrot.slane %v3512_v11, %v7501_v6  ;;  %v3691_v1 = vrot.slane %v6800_v20, %v7500_v9 }
 0x807   : > { %v3629_v11 = vsel %vm1711_vm6, %v3628_v33, %v3624_v31  ;;  %v3692_v33 = vsel %vm1711_vm6, %v3691_v1, %v3687_v41 }
 0x808   : > { %v3521_v59 = vpop.permute.xlu0 %3520  ;;  %v3518_v42 = vpop.permute.xlu1 %3517 }
 0x809   : > { %v3637_v37 = vrot.slane %v3521_v59, %v7500_v9  ;;  %v3633_v23 = vrot.slane %v3518_v42, %v7501_v6 }
 0x80b   : > { %v3638_v60 = vsel %vm1711_vm6, %v3637_v37, %v3633_v23 }
 0x80c   : > { %v3551_v38 = vpop.permute.xlu0 %3550  ;;  %v3548_v55 = vpop.permute.xlu1 %3547 }
 0x80d   : > { %v3682_v34 = vrot.slane %v3551_v38, %v7500_v9  ;;  %v3678_v4 = vrot.slane %v3548_v55, %v7501_v6  ;;  %v3674_v38 = vsel %vm1711_vm6, %v3673_v28, %v3669_v49  ;;  %v3722_v55 = vsel %vm1852_vm9, %v3611_v35, %v3721_v52 }
 0x80e   : > { %v3728_v20 = vsel %vm1850_vm8, %v3674_v38, %v3727_v56 }
 0x80f   : > { %v3683_v59 = vsel %vm1711_vm6, %v3682_v34, %v3678_v4 }
 0x810   : > { %v3563_v22 = vpop.permute.xlu0 %3562  ;;  %v3560_v45 = vpop.permute.xlu1 %3559 }
 0x811   : > { %v3700_v42 = vrot.slane %v3563_v22, %v7500_v9  ;;  %v3696_v51 = vrot.slane %v3560_v45, %v7501_v6  ;;  %v3723_v22 = vsel %vm1854_vm10, %v3620_v48, %v3722_v55  ;;  %v3729_v45 = vsel %vm1852_vm9, %v3683_v59, %v3728_v20 }
 0x812   : > { %v3724_v44 = vsel %vm1856_vm11, %v3629_v11, %v3723_v22 }
 0x813   : > { %v3701_v28 = vsel %vm1711_vm6, %v3700_v42, %v3696_v51  ;;  %v3725_v35 = vsel %vm1858_vm12, %v3638_v60, %v3724_v44 }
 0x814   : > { %v3569_v3 = vpop.permute.xlu0 %3568  ;;  %v3566_v29 = vpop.permute.xlu1 %3565 }
 0x815   : > { %v3709_v39 = vrot.slane %v3569_v3, %v7500_v9  ;;  %v3705_v13 = vrot.slane %v3566_v29, %v7501_v6  ;;  %v3730_v29 = vsel %vm1854_vm10, %v3692_v33, %v3729_v45 }
 0x816   : > { %v3731_v17 = vsel %vm1856_vm11, %v3701_v28, %v3730_v29 }
 0x817   : > { %v3710_v31 = vsel %vm1711_vm6, %v3709_v39, %v3705_v13 }
 0x818   : > { %v3527_v24 = vpop.permute.xlu0 %3526  ;;  %v3524_v30 = vpop.permute.xlu1 %3523  ;;  %v3732_v48 = vsel %vm1858_vm12, %v3710_v31, %v3731_v17 }
 0x819   : > { %v3646_v47 = vrot.slane %v3527_v24, %v7500_v9  ;;  %v3642_v40 = vrot.slane %v3524_v30, %v7501_v6 }
 0x81b   : > { %v3647_v49 = vsel %vm1711_vm6, %v3646_v47, %v3642_v40 }
 0x81c   : > { %v3575_v34 = vpop.permute.xlu0 %3574  ;;  %v3572_v4 = vpop.permute.xlu1 %3571  ;;  %v3726_v12 = vsel %vm1860_vm13, %v3647_v49, %v3725_v35 }
 0x81d   : > { %v3718_v37 = vrot.slane %v3575_v34, %v7500_v9  ;;  %v3714_v23 = vrot.slane %v3572_v4, %v7501_v6  ;;  %v3736_v3 = vsel %vm1871_vm14, %v3726_v12, -inf }
 0x81e   : > { %3737 = vmax.xlane.f32.xlu1 %v3736_v3 }
 0x81f   : > { %v3719_v52 = vsel %vm1711_vm6, %v3718_v37, %v3714_v23 }
 0x820   : > { %v3733_v56 = vsel %vm1860_vm13, %v3719_v52, %v3732_v48 }
 0x821   : > { %v3739_v38 = vsel %vm1871_vm14, %v3733_v56, -inf }
 0x822   : > { %3740 = vmax.xlane.f32.xlu0 %v3739_v38 }
 0x8ab   : > { %v3738_v55 = vpop.xlane.xlu1 %3737 }
 0x8ac   : > { %v3747_v1 = vrot.slane %v3738_v55, %v5353_v8  ;;  %v3751_v11 = vrot.slane %v3738_v55, %v7502_v16  ;;  %v3755_v51 = vrot.slane %v3738_v55, %v7503_v21  ;;  %v3759_v24 = vrot.slane %v3738_v55, %v7504_v53 }
 0x8ad   : > { %v3767_v45 = vrot.slane %v3738_v55, %v7506_v50  ;;  %v3775_v4 = vrot.slane %v3738_v55, %v7508_v27 }
 0x8ae   : > { %v3824_v59 = vsub.f32 %v6676_v26, %v3747_v1  ;;  %v3825_v42 = vsub.f32 %v6673_v63, %v3747_v1  ;;  %v3827_v41 = vsub.f32 %v6684_v5, %v3751_v11  ;;  %v3826_v60 = vsub.f32 %v6681_v19, %v3751_v11 }
 0x8af   : > { %v3829_v30 = vsub.f32 %v6700_v0, %v3755_v51  ;;  %v3828_v47 = vsub.f32 %v6697_v32, %v3755_v51  ;;  %v3763_v63 = vrot.slane %v3738_v55, %v7505_v62  ;;  %v3831_v40 = vsub.f32 %v6732_v25, %v3759_v24  ;;  %v6904_v23 = vpop.xlane.xlu0 %3740 }
 0x8b0   : > { %v3856_v39 = vmul.f32 1.442695, %v3824_v59  ;;  %v3858_v13 = vmul.f32 1.442695, %v3825_v42  ;;  %v3862_v20 = vmul.f32 1.442695, %v3827_v41  ;;  %v3830_v19 = vsub.f32 %v6729_v14, %v3759_v24 }
 0x8b1   : > { %v3860_v26 = vmul.f32 1.442695, %v3826_v60  ;;  %v3866_v5 = vmul.f32 1.442695, %v3829_v30  ;;  %v3864_v22 = vmul.f32 1.442695, %v3828_v47  ;;  %v3833_v0 = vsub.f32 %v6708_v2, %v3763_v63 }
 0x8b2   : > { %5061 = vpow2.f32 %v3856_v39  ;;  %v3870_v44 = vmul.f32 1.442695, %v3831_v40  ;;  %v3832_v32 = vsub.f32 %v6705_v15, %v3763_v63  ;;  %v3868_v28 = vmul.f32 1.442695, %v3830_v19 }
 0x8b3   : > { %5063 = vpow2.f32 %v3858_v13  ;;  %v3771_v14 = vrot.slane %v3738_v55, %v7507_v36  ;;  %v3835_v25 = vsub.f32 %v6748_v46, %v3767_v45  ;;  %v3874_v33 = vmul.f32 1.442695, %v3833_v0 }
 0x8b4   : > { %5065 = vpow2.f32 %v3862_v20  ;;  %v3834_v2 = vsub.f32 %v6745_v58, %v3767_v45  ;;  %v3872_v15 = vmul.f32 1.442695, %v3832_v32  ;;  %v3839_v17 = vsub.f32 %v6788_v43, %v3775_v4  ;;  %v7597_v20 = vld [vmem:[#allocation11_spill] sm:$0xff]  ;;  %v7600_v32 = vld [vmem:[#allocation14_spill] sm:$0xff] }
 0x8b5   : > { %5067 = vpow2.f32 %v3860_v26  ;;  %v3837_v12 = vsub.f32 %v6756_v18, %v3771_v14  ;;  %v3878_v46 = vmul.f32 1.442695, %v3835_v25  ;;  %v3836_v37 = vsub.f32 %v6753_v10, %v3771_v14  ;;  %v7598_v26 = vld [vmem:[#allocation8_spill] sm:$0xff]  ;;  %v7599_v45 = vld [vmem:[#allocation15_spill] sm:$0xff] }
 0x8b6   : > { %5069 = vpow2.f32 %v3866_v5  ;;  %v3876_v58 = vmul.f32 1.442695, %v3834_v2  ;;  %v3779_v52 = vrot.slane %v6904_v23, %v5353_v8  ;;  %v3838_v10 = vsub.f32 %v6785_v57, %v3775_v4 }
 0x8b7   : > { %5071 = vpow2.f32 %v3864_v22  ;;  %v3882_v18 = vmul.f32 1.442695, %v3837_v12  ;;  %v3880_v48 = vmul.f32 1.442695, %v3836_v37  ;;  %v3886_v55 = vmul.f32 1.442695, %v3839_v17 }
 0x8b8   : > { %5073 = vpow2.f32 %v3870_v44  ;;  %v3783_v43 = vrot.slane %v6904_v23, %v7502_v16  ;;  %v3841_v1 = vsub.f32 %v6692_v61, %v3779_v52  ;;  %v3884_v11 = vmul.f32 1.442695, %v3838_v10  ;;  %v7596_v61 = vld [vmem:[#allocation9_spill] sm:$0xff]  ;;  %v7603_v10 = vld [vmem:[#allocation84_spill] sm:$0xff] }
 0x8b9   : > { %5075 = vpow2.f32 %v3868_v28  ;;  %v3840_v57 = vsub.f32 %v6689_v54, %v3779_v52  ;;  %v3787_v51 = vrot.slane %v6904_v23, %v7503_v21  ;;  %v3791_v30 = vrot.slane %v6904_v23, %v7504_v53 }
 0x8ba   : > { %5077 = vpow2.f32 %v3874_v33  ;;  %v3843_v41 = vsub.f32 %v6716_v7, %v3783_v43  ;;  %v3890_v60 = vmul.f32 1.442695, %v3841_v1  ;;  %v3842_v39 = vsub.f32 %v7596_v61, %v3783_v43  ;;  %v7604_v43 = vld [vmem:[#allocation16_spill] sm:$0xff] }
 0x8bb   : > { %5079 = vpow2.f32 %v3872_v15  ;;  %v3888_v13 = vmul.f32 1.442695, %v3840_v57  ;;  %v3845_v47 = vsub.f32 %v7597_v20, %v3787_v51  ;;  %v3844_v63 = vsub.f32 %v7598_v26, %v3787_v51  ;;  %v7601_v15 = vld [vmem:[#allocation13_spill] sm:$0xff]  ;;  %v7607_v26 = vld [vmem:[#allocation87_spill] sm:$0xff] }
 0x8bc   : > { %v6886_v49 = vpop.eup %5061  ;;  %5081 = vpow2.f32 %v3878_v46  ;;  %v3894_v7 = vmul.f32 1.442695, %v3843_v41  ;;  %v3892_v40 = vmul.f32 1.442695, %v3842_v39  ;;  %v3795_v22 = vrot.slane %v6904_v23, %v7505_v62  ;;  %v7602_v46 = vld [vmem:[#allocation12_spill] sm:$0xff] }
 0x8bd   : > { %v6888_v35 = vpop.eup %5063  ;;  %3953 = vperm.xlu0 %4982, %v6886_v49   ;;  %5083 = vpow2.f32 %v3876_v58  ;;  %v3847_v0 = vsub.f32 %v7599_v45, %v3791_v30  ;;  %v3898_v44 = vmul.f32 1.442695, %v3845_v47  ;;  %v3846_v28 = vsub.f32 %v7600_v32, %v3791_v30 }
 0x8be   : > { %3956 = vperm.xlu1 %4983, %v6888_v35   ;;  %v6895_v31 = vpop.eup %5065  ;;  %5085 = vpow2.f32 %v3882_v18  ;;  %v3896_v14 = vmul.f32 1.442695, %v3844_v63  ;;  %v3799_v2 = vrot.slane %v6904_v23, %v7506_v50  ;;  %v3849_v4 = vsub.f32 %v7601_v15, %v3795_v22 }
 0x8bf   : > { %v6897_v34 = vpop.eup %5067  ;;  %5087 = vpow2.f32 %v3880_v48  ;;  %v3902_v12 = vmul.f32 1.442695, %v3847_v0  ;;  %v3848_v37 = vsub.f32 %v7602_v46, %v3795_v22  ;;  %v3900_v58 = vmul.f32 1.442695, %v3846_v28 }
 0x8c0   : > { %v6906_v3 = vpop.eup %5069  ;;  %5089 = vpow2.f32 %v3886_v55  ;;  %v3803_v52 = vrot.slane %v6904_v23, %v7507_v36  ;;  %v3851_v48 = vsub.f32 %v7603_v10, %v3799_v2  ;;  %v3906_v55 = vmul.f32 1.442695, %v3849_v4 }
 0x8c1   : > { %3962 = vperm.xlu0 %4982, %v6895_v31   ;;  %v6908_v29 = vpop.eup %5071  ;;  %5091 = vpow2.f32 %v3884_v11  ;;  %v3850_v1 = vsub.f32 %v7604_v43, %v3799_v2  ;;  %v3904_v11 = vmul.f32 1.442695, %v3848_v37  ;;  %v3807_v41 = vrot.slane %v6904_v23, %v7508_v27 }
 0x8c2   : > { %3959 = vperm.xlu1 %4983, %v6897_v34   ;;  %v6916_v56 = vpop.eup %5073  ;;  %5093 = vpow2.f32 %v3890_v60  ;;  %v7605_v60 = vld [vmem:[#allocation85_spill] sm:$0xff]  ;;  %v3910_v39 = vmul.f32 1.442695, %v3851_v48 }
 0x8c3   : > { %v6918_v38 = vpop.eup %5075  ;;  %5095 = vpow2.f32 %v3888_v13  ;;  %v3853_v61 = vsub.f32 %v7605_v60, %v3803_v52  ;;  %v7606_v13 = vld [vmem:[#allocation82_spill] sm:$0xff]  ;;  %v3908_v20 = vmul.f32 1.442695, %v3850_v1  ;;  %v3855_v63 = vsub.f32 %v7607_v26, %v3807_v41 }
 0x8c4   : > { %v6926_v59 = vpop.eup %5077  ;;  %5097 = vpow2.f32 %v3894_v7  ;;  %v3852_v30 = vsub.f32 %v7606_v13, %v3803_v52 }
 0x8c5   : > { %3968 = vperm.xlu0 %4982, %v6906_v3   ;;  %v6928_v42 = vpop.eup %5079  ;;  %5099 = vpow2.f32 %v3892_v40  ;;  %v3914_v23 = vmul.f32 1.442695, %v3853_v61  ;;  %v7608_v40 = vld [vmem:[#allocation83_spill] sm:$0xff]  ;;  %v3918_v32 = vmul.f32 1.442695, %v3855_v63 }
 0x8c6   : > { %3965 = vperm.xlu1 %4983, %v6908_v29   ;;  %v6936_v54 = vpop.eup %5081  ;;  %5101 = vpow2.f32 %v3898_v44  ;;  %v3854_v22 = vsub.f32 %v7608_v40, %v3807_v41  ;;  %v3912_v45 = vmul.f32 1.442695, %v3852_v30 }
 0x8c7   : > { %v6938_v24 = vpop.eup %5083  ;;  %5103 = vpow2.f32 %v3896_v14 }
 0x8c8   : > { %v6946_v5 = vpop.eup %5085  ;;  %5105 = vpow2.f32 %v3902_v12  ;;  %v3916_v28 = vmul.f32 1.442695, %v3854_v22 }
 0x8c9   : > { %3974 = vperm.xlu0 %4982, %v6916_v56   ;;  %v6948_v19 = vpop.eup %5087  ;;  %5107 = vpow2.f32 %v3900_v58 }
 0x8ca   : > { %3971 = vperm.xlu1 %4983, %v6918_v38   ;;  %v6956_v25 = vpop.eup %5089  ;;  %5109 = vpow2.f32 %v3906_v55 }
 0x8cb   : > { %v6958_v33 = vpop.eup %5091  ;;  %5111 = vpow2.f32 %v3904_v11 }
 0x8cc   : > { %v6966_v17 = vpop.eup %5093  ;;  %5113 = vpow2.f32 %v3910_v39 }
 0x8cd   : > { %3980 = vperm.xlu0 %4982, %v6926_v59   ;;  %v6968_v18 = vpop.eup %5095  ;;  %5115 = vpow2.f32 %v3908_v20 }
 0x8ce   : > { %3977 = vperm.xlu1 %4983, %v6928_v42   ;;  %v6976_v57 = vpop.eup %5097  ;;  %5117 = vpow2.f32 %v3914_v23 }
 0x8cf   : > { %v6978_v51 = vpop.eup %5099  ;;  %5119 = vpow2.f32 %v3912_v45 }
 0x8d0   : > { %v6986_v47 = vpop.eup %5101  ;;  %5121 = vpow2.f32 %v3918_v32 }
 0x8d1   : > { %3986 = vperm.xlu0 %4982, %v6936_v54   ;;  %v6988_v7 = vpop.eup %5103  ;;  %5123 = vpow2.f32 %v3916_v28 }
 0x8d2   : > { %3983 = vperm.xlu1 %4983, %v6938_v24   ;;  %v6994_v0 = vpop.eup %5105 }
 0x8d3   : > { %v6996_v44 = vpop.eup %5107 }
 0x8d4   : > { %v7000_v14 = vpop.eup %5109 }
 0x8d5   : > { %3992 = vperm.xlu0 %4982, %v6946_v5   ;;  %v7002_v2 = vpop.eup %5111 }
 0x8d6   : > { %3989 = vperm.xlu1 %4983, %v6948_v19   ;;  %v7006_v15 = vpop.eup %5113 }
 0x8d7   : > { %v7008_v4 = vpop.eup %5115 }
 0x8d8   : > { %v7012_v12 = vpop.eup %5117 }
 0x8d9   : > { %3998 = vperm.xlu0 %4982, %v6956_v25   ;;  %v7014_v46 = vpop.eup %5119 }
 0x8da   : > { %3995 = vperm.xlu1 %4983, %v6958_v33   ;;  %v7018_v37 = vpop.eup %5121 }
 0x8db   : > { %7609 = vst [vmem:[#allocation86_spill] sm:$0xff] %v7018_v37  ;;  %v7020_v58 = vpop.eup %5123 }
 0x8dd   : > { %4004 = vperm.xlu0 %4982, %v6966_v17  }
 0x8de   : > { %4001 = vperm.xlu1 %4983, %v6968_v18  }
 0x8e1   : > { %4010 = vperm.xlu0 %4982, %v6976_v57  }
 0x8e2   : > { %4007 = vperm.xlu1 %4983, %v6978_v51  }
 0x8e5   : > { %4016 = vperm.xlu0 %4982, %v6986_v47  }
 0x8e6   : > { %4013 = vperm.xlu1 %4983, %v6988_v7  }
 0x8e9   : > { %4022 = vperm.xlu0 %4982, %v6994_v0  }
 0x8ea   : > { %4019 = vperm.xlu1 %4983, %v6996_v44  }
 0x8ed   : > { %4028 = vperm.xlu0 %4982, %v7000_v14  }
 0x8ee   : > { %4025 = vperm.xlu1 %4983, %v7002_v2  }
 0x8f1   : > { %4034 = vperm.xlu0 %4982, %v7006_v15  }
 0x8f2   : > { %4031 = vperm.xlu1 %4983, %v7008_v4  }
 0x8f5   : > { %4040 = vperm.xlu0 %4982, %v7012_v12  }
 0x8f6   : > { %4037 = vperm.xlu1 %4983, %v7014_v46  }
 0x8f9   : > { %4046 = vperm.xlu0 %4982, %v7018_v37  }
 0x8fa   : > { %4043 = vperm.xlu1 %4983, %v7020_v58  }
 0x93c   : > { %v3954_v52 = vpop.permute.xlu0 %3953 }
 0x93d   : > { %v3957_v10 = vpop.permute.xlu1 %3956  ;;  %v4051_v40 = vrot.slane %v3954_v52, %v7501_v6 }
 0x93e   : > { %v4055_v23 = vrot.slane %v3957_v10, %v7500_v9 }
 0x940   : > { %v3963_v48 = vpop.permute.xlu0 %3962 }
 0x941   : > { %v3960_v55 = vpop.permute.xlu1 %3959  ;;  %v4064_v13 = vrot.slane %v3963_v48, %v7500_v9 }
 0x942   : > { %v4060_v39 = vrot.slane %v3960_v55, %v7501_v6 }
 0x944   : > { %v3969_v43 = vpop.permute.xlu0 %3968  ;;  %v4065_v48 = vsel %vm1711_vm6, %v4064_v13, %v4060_v39 }
 0x945   : > { %v3966_v1 = vpop.permute.xlu1 %3965  ;;  %v4073_v26 = vrot.slane %v3969_v43, %v7500_v9 }
 0x946   : > { %v4069_v20 = vrot.slane %v3966_v1, %v7501_v6 }
 0x948   : > { %v3975_v11 = vpop.permute.xlu0 %3974  ;;  %v4074_v37 = vsel %vm1711_vm6, %v4073_v26, %v4069_v20 }
 0x949   : > { %v3972_v41 = vpop.permute.xlu1 %3971  ;;  %v4082_v45 = vrot.slane %v3975_v11, %v7500_v9 }
 0x94a   : > { %v4078_v22 = vrot.slane %v3972_v41, %v7501_v6  ;;  %v4056_v41 = vsel %vm1711_vm6, %v4055_v23, %v4051_v40 }
 0x94c   : > { %v3981_v60 = vpop.permute.xlu0 %3980  ;;  %v4083_v11 = vsel %vm1711_vm6, %v4082_v45, %v4078_v22 }
 0x94d   : > { %v3978_v61 = vpop.permute.xlu1 %3977  ;;  %v4091_v28 = vrot.slane %v3981_v60, %v7500_v9  ;;  %v4192_v60 = vsel %vm1848_vm7, %v4065_v48, %v4056_v41 }
 0x94e   : > { %v4087_v32 = vrot.slane %v3978_v61, %v7501_v6  ;;  %v4193_v13 = vsel %vm1850_vm8, %v4074_v37, %v4192_v60 }
 0x94f   : > { %v4194_v20 = vsel %vm1852_vm9, %v4083_v11, %v4193_v13 }
 0x950   : > { %v3987_v30 = vpop.permute.xlu0 %3986  ;;  %v4092_v39 = vsel %vm1711_vm6, %v4091_v28, %v4087_v32 }
 0x951   : > { %v3984_v63 = vpop.permute.xlu1 %3983  ;;  %v4100_v1 = vrot.slane %v3987_v30, %v7500_v9  ;;  %v4195_v40 = vsel %vm1854_vm10, %v4092_v39, %v4194_v20 }
 0x952   : > { %v4096_v55 = vrot.slane %v3984_v63, %v7501_v6 }
 0x954   : > { %v3993_v43 = vpop.permute.xlu0 %3992  ;;  %v4101_v30 = vsel %vm1711_vm6, %v4100_v1, %v4096_v55 }
 0x955   : > { %v3990_v10 = vpop.permute.xlu1 %3989  ;;  %v4109_v52 = vrot.slane %v3993_v43, %v7500_v9  ;;  %v4196_v45 = vsel %vm1856_vm11, %v4101_v30, %v4195_v40 }
 0x956   : > { %v4105_v61 = vrot.slane %v3990_v10, %v7501_v6 }
 0x958   : > { %v3999_v63 = vpop.permute.xlu0 %3998  ;;  %v4110_v26 = vsel %vm1711_vm6, %v4109_v52, %v4105_v61 }
 0x959   : > { %v3996_v43 = vpop.permute.xlu1 %3995  ;;  %v4118_v23 = vrot.slane %v3999_v63, %v7500_v9  ;;  %v4197_v37 = vsel %vm1858_vm12, %v4110_v26, %v4196_v45 }
 0x95a   : > { %v4114_v22 = vrot.slane %v3996_v43, %v7501_v6 }
 0x95c   : > { %v4005_v48 = vpop.permute.xlu0 %4004  ;;  %v4119_v32 = vsel %vm1711_vm6, %v4118_v23, %v4114_v22 }
 0x95d   : > { %v4002_v28 = vpop.permute.xlu1 %4001  ;;  %v4198_v55 = vsel %vm1860_vm13, %v4119_v32, %v4197_v37  ;;  %v4127_v22 = vrot.slane %v4005_v48, %v7500_v9 }
 0x95e   : > { %v4208_v1 = vsel %vm1871_vm14, %v4198_v55, 0.0  ;;  %v4123_v40 = vrot.slane %v4002_v28, %v7501_v6 }
 0x95f   : > { %4209 = vadd.xlane.f32.xlu1 %v4208_v1 }
 0x960   : > { %v4011_v10 = vpop.permute.xlu0 %4010 }
 0x961   : > { %v4008_v52 = vpop.permute.xlu1 %4007  ;;  %v4136_v63 = vrot.slane %v4011_v10, %v7500_v9 }
 0x962   : > { %v4132_v30 = vrot.slane %v4008_v52, %v7501_v6 }
 0x964   : > { %v4017_v41 = vpop.permute.xlu0 %4016  ;;  %v4137_v1 = vsel %vm1711_vm6, %v4136_v63, %v4132_v30 }
 0x965   : > { %v4014_v11 = vpop.permute.xlu1 %4013  ;;  %v4145_v43 = vrot.slane %v4017_v41, %v7500_v9 }
 0x966   : > { %v4141_v26 = vrot.slane %v4014_v11, %v7501_v6 }
 0x968   : > { %v4023_v61 = vpop.permute.xlu0 %4022  ;;  %v4146_v11 = vsel %vm1711_vm6, %v4145_v43, %v4141_v26 }
 0x969   : > { %v4020_v60 = vpop.permute.xlu1 %4019  ;;  %v4154_v32 = vrot.slane %v4023_v61, %v7500_v9 }
 0x96a   : > { %v4150_v45 = vrot.slane %v4020_v60, %v7501_v6  ;;  %v4128_v60 = vsel %vm1711_vm6, %v4127_v22, %v4123_v40 }
 0x96c   : > { %v4029_v39 = vpop.permute.xlu0 %4028  ;;  %v4155_v61 = vsel %vm1711_vm6, %v4154_v32, %v4150_v45 }
 0x96d   : > { %v4026_v13 = vpop.permute.xlu1 %4025  ;;  %v4163_v55 = vrot.slane %v4029_v39, %v7500_v9  ;;  %v4199_v39 = vsel %vm1848_vm7, %v4137_v1, %v4128_v60 }
 0x96e   : > { %v4159_v37 = vrot.slane %v4026_v13, %v7501_v6  ;;  %v4200_v63 = vsel %vm1850_vm8, %v4146_v11, %v4199_v39 }
 0x96f   : > { %v4201_v26 = vsel %vm1852_vm9, %v4155_v61, %v4200_v63 }
 0x970   : > { %v4035_v20 = vpop.permute.xlu0 %4034  ;;  %v4164_v30 = vsel %vm1711_vm6, %v4163_v55, %v4159_v37 }
 0x971   : > { %v4032_v23 = vpop.permute.xlu1 %4031  ;;  %v4172_v52 = vrot.slane %v4035_v20, %v7500_v9  ;;  %v4202_v22 = vsel %vm1854_vm10, %v4164_v30, %v4201_v26 }
 0x972   : > { %v4168_v10 = vrot.slane %v4032_v23, %v7501_v6 }
 0x974   : > { %v4041_v41 = vpop.permute.xlu0 %4040  ;;  %v4173_v20 = vsel %vm1711_vm6, %v4172_v52, %v4168_v10 }
 0x975   : > { %v4038_v28 = vpop.permute.xlu1 %4037  ;;  %v4181_v48 = vrot.slane %v4041_v41, %v7500_v9  ;;  %v4203_v32 = vsel %vm1856_vm11, %v4173_v20, %v4202_v22 }
 0x976   : > { %v4177_v13 = vrot.slane %v4038_v28, %v7501_v6 }
 0x978   : > { %v4047_v23 = vpop.permute.xlu0 %4046  ;;  %v4182_v43 = vsel %vm1711_vm6, %v4181_v48, %v4177_v13 }
 0x979   : > { %v4044_v41 = vpop.permute.xlu1 %4043  ;;  %v4190_v40 = vrot.slane %v4047_v23, %v7500_v9  ;;  %v4204_v55 = vsel %vm1858_vm12, %v4182_v43, %v4203_v32 }
 0x97a   : > { %v4186_v45 = vrot.slane %v4044_v41, %v7501_v6 }
 0x97c   : > { %v4191_v37 = vsel %vm1711_vm6, %v4190_v40, %v4186_v45 }
 0x97d   : > { %v4205_v1 = vsel %vm1860_vm13, %v4191_v37, %v4204_v55 }
 0x97e   : > { %v4211_v10 = vsel %vm1871_vm14, %v4205_v1, 0.0 }
 0x97f   : > { %4212 = vadd.xlane.f32.xlu0 %v4211_v10 }
 0x9ec   : > { %v4210_v52 = vpop.xlane.xlu1 %4209 }
 0x9ed   : > { %5125 = vrcp.f32 %v4210_v52 }
 0x9f7   : > { %v5126_v11 = vpop.eup %5125 }
 0x9f8   : > { %v4221_v28 = vrot.slane %v5126_v11, %v5353_v8  ;;  %v4225_v48 = vrot.slane %v5126_v11, %v7502_v16  ;;  %v4229_v60 = vrot.slane %v5126_v11, %v7503_v21  ;;  %v4233_v23 = vrot.slane %v5126_v11, %v7504_v53 }
 0x9f9   : > { %v4241_v32 = vrot.slane %v5126_v11, %v7506_v50 }
 0x9fa   : > { %v4298_v61 = vmul.f32 %v6886_v49, %v4221_v28  ;;  %v4299_v13 = vmul.f32 %v6888_v35, %v4221_v28  ;;  %v4300_v39 = vmul.f32 %v6897_v34, %v4225_v48  ;;  %v4301_v30 = vmul.f32 %v6895_v31, %v4225_v48 }
 0x9fb   : > { %v4302_v20 = vmul.f32 %v6908_v29, %v4229_v60  ;;  %v4303_v40 = vmul.f32 %v6906_v3, %v4229_v60  ;;  %v4304_v49 = vmul.f32 %v6918_v38, %v4233_v23  ;;  %v4237_v35 = vrot.slane %v5126_v11, %v7505_v62 }
 0x9fc   : > { %v4330_v63 = vpack.c.bf16 %v4299_v13, %v4298_v61  ;;  %v4331_v41 = vpack.c.bf16 %v4301_v30, %v4300_v39  ;;  %v4305_v31 = vmul.f32 %v6916_v56, %v4233_v23  ;;  %v4308_v38 = vmul.f32 %v6938_v24, %v4241_v32 }
 0x9fd   : > { %v4332_v45 = vpack.c.bf16 %v4303_v40, %v4302_v20  ;;  %v4306_v29 = vmul.f32 %v6928_v42, %v4237_v35  ;;  %v4307_v1 = vmul.f32 %v6926_v59, %v4237_v35  ;;  %v4309_v10 = vmul.f32 %v6936_v54, %v4241_v32 }
 0x9fe   : > { %v4370_v26 = vunpack.c.h.b16 %v4330_v63  ;;  %v4369_v43 = vunpack.c.l.b16 %v4330_v63  ;;  %v4371_v22 = vunpack.c.l.b16 %v4331_v41  ;;  %v4372_v34 = vunpack.c.h.b16 %v4331_v41 }
 0x9ff   : > { %v4373_v37 = vunpack.c.l.b16 %v4332_v45  ;;  %v4374_v55 = vunpack.c.h.b16 %v4332_v45  ;;  %v4333_v3 = vpack.c.bf16 %v4305_v31, %v4304_v49  ;;  %v4334_v56 = vpack.c.bf16 %v4307_v1, %v4306_v29 }
 0xa00   : > { %4405 = vperm.xlu1 %4983, %v4370_v26   ;;  %4402 = vperm.xlu0 %4982, %v4369_v43   ;;  %v4245_v48 = vrot.slane %v5126_v11, %v7507_v36  ;;  %v4335_v60 = vpack.c.bf16 %v4309_v10, %v4308_v38  ;;  %v4249_v61 = vrot.slane %v5126_v11, %v7508_v27 }
 0xa01   : > { %v4375_v52 = vunpack.c.l.b16 %v4333_v3  ;;  %v4376_v28 = vunpack.c.h.b16 %v4333_v3  ;;  %v4377_v13 = vunpack.c.l.b16 %v4334_v56  ;;  %v4378_v59 = vunpack.c.h.b16 %v4334_v56 }
 0xa02   : > { %v4310_v39 = vmul.f32 %v6948_v19, %v4245_v48  ;;  %v4311_v24 = vmul.f32 %v6946_v5, %v4245_v48  ;;  %v4312_v54 = vmul.f32 %v6958_v33, %v4249_v61  ;;  %v4313_v30 = vmul.f32 %v6956_v25, %v4249_v61 }
 0xa03   : > { %v4379_v63 = vunpack.c.l.b16 %v4335_v60  ;;  %v4380_v20 = vunpack.c.h.b16 %v4335_v60 }
 0xa04   : > { %4408 = vperm.xlu1 %4983, %v4371_v22   ;;  %4411 = vperm.xlu0 %4982, %v4372_v34   ;;  %v4336_v23 = vpack.c.bf16 %v4311_v24, %v4310_v39  ;;  %v4337_v26 = vpack.c.bf16 %v4313_v30, %v4312_v54  ;;  %v5129_v54 = vld [vmem:[%s5364_s3] sm:$0xff]   ;;  %s569_s3 = sand.u32 1, %s5184_s25  }
 0xa05   : > { %s4875_s30 = sshll.u32 %s569_s3, 4  ;;  %s7241_s28 = scalar_lea.sflag [#allocation3], %s569_s3 }
 0xa06   : > { %v4381_v43 = vunpack.c.l.b16 %v4336_v23  ;;  %v4382_v11 = vunpack.c.h.b16 %v4336_v23  ;;  %v4383_v40 = vunpack.c.l.b16 %v4337_v26  ;;  %v4384_v49 = vunpack.c.h.b16 %v4337_v26  ;;  %s571_s19 = scalar_lea.vmem [#allocation2], %s4875_s30 }
 0xa07   : > { %s4785_s29 = sshll.u32 %s571_s19, 4  ;;  %s7239_s29 = int_to_ptr.vmem [resolvable:$true] %s4785_s29 }
 0xa08   : > { %4414 = vperm.xlu1 %4983, %v4373_v37   ;;  %4417 = vperm.xlu0 %4982, %v4374_v55   ;;  %s5130_s30 = scalar_lea.vmem %s7239_s29, 256  ;;  %p5137_p0 = scmp.lt.s32.totalorder %s7239_s29, %s5135_s26 }
 0xa09   : > { %p5131_p11 = scmp.ne.s32.totalorder %s7239_s29, %s5130_s30  ;;  %p5138_p1 = scmp.lt.s32.totalorder %s5136_s0, %s5130_s30 }
 0xa0b   : > { %p5132_p12 = pnand %p5131_p11, %p5329_p5  ;;  %p5139_p2 = por %p5138_p1, %p5137_p0 }
 0xa0c   : > { %4420 = vperm.xlu1 %4983, %v4375_v52   ;;  %4423 = vperm.xlu0 %4982, %v4376_v28   ;;  %v4213_v42 = vpop.xlane.xlu0 %4212 }
 0xa0d   : > { %5127 = vrcp.f32 %v4213_v42  ;;  %p5133_p13 = pneg %p5132_p12 }
 0xa0f   : > { %p5140_p3 = pnand %p5139_p2, %p5133_p13 }
 0xa10   : > { %4426 = vperm.xlu1 %4983, %v4377_v13   ;;  %4429 = vperm.xlu0 %4982, %v4378_v59   ;;  %v7610_v13 = vld [vmem:[#allocation86_spill] sm:$0xff] }
 0xa14   : > { %4432 = vperm.xlu1 %4983, %v4379_v63   ;;  %4435 = vperm.xlu0 %4982, %v4380_v20  }
 0xa17   : > { %v5128_v41 = vpop.eup %5127 }
 0xa18   : > { %4438 = vperm.xlu1 %4983, %v4381_v43   ;;  %4441 = vperm.xlu0 %4982, %v4382_v11   ;;  %v4253_v19 = vrot.slane %v5128_v41, %v5353_v8  ;;  %v4257_v5 = vrot.slane %v5128_v41, %v7502_v16  ;;  %v4261_v33 = vrot.slane %v5128_v41, %v7503_v21 }
 0xa19   : > { %v4265_v8 = vrot.slane %v5128_v41, %v7504_v53  ;;  %v4281_v42 = vrot.slane %v5128_v41, %v7508_v27  ;;  %v4700_v27 = vld [vmem:[%s7297_s15] sm:$0xf] }
 0xa1a   : > { %v4314_v25 = vmul.f32 %v6968_v18, %v4253_v19  ;;  %v4315_v35 = vmul.f32 %v6966_v17, %v4253_v19  ;;  %v4316_v22 = vmul.f32 %v6978_v51, %v4257_v5  ;;  %v4317_v34 = vmul.f32 %v6976_v57, %v4257_v5 }
 0xa1b   : > { %v4318_v31 = vmul.f32 %v6988_v7, %v4261_v33  ;;  %v4319_v21 = vmul.f32 %v6986_v47, %v4261_v33  ;;  %v4320_v17 = vmul.f32 %v6996_v44, %v4265_v8  ;;  %v4269_v18 = vrot.slane %v5128_v41, %v7505_v62 }
 0xa1c   : > { %4444 = vperm.xlu1 %4983, %v4383_v40   ;;  %4447 = vperm.xlu0 %4982, %v4384_v49   ;;  %v4338_v45 = vpack.c.bf16 %v4315_v35, %v4314_v25  ;;  %v4339_v32 = vpack.c.bf16 %v4317_v34, %v4316_v22  ;;  %v4321_v55 = vmul.f32 %v6994_v0, %v4265_v8 }
 0xa1d   : > { %v4340_v37 = vpack.c.bf16 %v4319_v21, %v4318_v31  ;;  %v4322_v53 = vmul.f32 %v7002_v2, %v4269_v18  ;;  %v4273_v7 = vrot.slane %v5128_v41, %v7506_v50  ;;  %v4323_v38 = vmul.f32 %v7000_v14, %v4269_v18 }
 0xa1e   : > { %v4386_v16 = vunpack.c.h.b16 %v4338_v45  ;;  %v4385_v29 = vunpack.c.l.b16 %v4338_v45  ;;  %v4388_v51 = vunpack.c.h.b16 %v4339_v32  ;;  %v4387_v57 = vunpack.c.l.b16 %v4339_v32 }
 0xa1f   : > { %v4390_v3 = vunpack.c.h.b16 %v4340_v37  ;;  %v4389_v1 = vunpack.c.l.b16 %v4340_v37  ;;  %v4341_v47 = vpack.c.bf16 %v4321_v55, %v4320_v17  ;;  %v4324_v62 = vmul.f32 %v7008_v4, %v4273_v7 }
 0xa20   : > { %4453 = vperm.xlu0 %4982, %v4386_v16   ;;  %4450 = vperm.xlu1 %4983, %v4385_v29   ;;  %v4277_v44 = vrot.slane %v5128_v41, %v7507_v36  ;;  %v4342_v0 = vpack.c.bf16 %v4323_v38, %v4322_v53  ;;  %v4325_v28 = vmul.f32 %v7006_v15, %v4273_v7 }
 0xa21   : > { %v4392_v10 = vunpack.c.h.b16 %v4341_v47  ;;  %v4391_v52 = vunpack.c.l.b16 %v4341_v47  ;;  %v4328_v61 = vmul.f32 %v7020_v58, %v4281_v42  ;;  %v4329_v15 = vmul.f32 %v7610_v13, %v4281_v42 }
 0xa22   : > { %v4326_v50 = vmul.f32 %v7014_v46, %v4277_v44  ;;  %v4327_v2 = vmul.f32 %v7012_v12, %v4277_v44  ;;  %v4394_v56 = vunpack.c.h.b16 %v4342_v0  ;;  %v4393_v48 = vunpack.c.l.b16 %v4342_v0 }
 0xa23   : > { %v4343_v14 = vpack.c.bf16 %v4325_v28, %v4324_v62  ;;  %v4345_v12 = vpack.c.bf16 %v4329_v15, %v4328_v61  ;;  %v4702_v58 = vsel %vm624_vm0, %v4700_v27, 0 }
 0xa24   : > { %4459 = vperm.xlu0 %4982, %v4388_v51   ;;  %4456 = vperm.xlu1 %4983, %v4387_v57   ;;  %v4344_v4 = vpack.c.bf16 %v4327_v2, %v4326_v50 }
 0xa25   : > { %v4396_v36 = vunpack.c.h.b16 %v4343_v14  ;;  %v4395_v60 = vunpack.c.l.b16 %v4343_v14  ;;  %v4400_v39 = vunpack.c.h.b16 %v4345_v12  ;;  %v4399_v24 = vunpack.c.l.b16 %v4345_v12  ;;  %4932 = vmatpush3.bf16.msra.mxu0 %v4702_v58 }
 0xa26   : > { %v4398_v46 = vunpack.c.h.b16 %v4344_v4  ;;  %v4397_v59 = vunpack.c.l.b16 %v4344_v4 }
 0xa28   : > { %4465 = vperm.xlu0 %4982, %v4390_v3   ;;  %4462 = vperm.xlu1 %4983, %v4389_v1  }
 0xa29   : > { %4934 = vmatmul.mubr.msk.bf16.vlgmr.msra.gmra.mrb[8].mxu0 %vm7611_vm1, %v5129_v54 }
 0xa2c   : > { %4471 = vperm.xlu0 %4982, %v4392_v10   ;;  %4468 = vperm.xlu1 %4983, %v4391_v52  }
 0xa30   : > { %4477 = vperm.xlu0 %4982, %v4394_v56   ;;  %4474 = vperm.xlu1 %4983, %v4393_v48  }
 0xa34   : > { %4483 = vperm.xlu0 %4982, %v4396_v36   ;;  %4480 = vperm.xlu1 %4983, %v4395_v60  }
 0xa38   : > { %4489 = vperm.xlu0 %4982, %v4398_v46   ;;  %4486 = vperm.xlu1 %4983, %v4397_v59  }
 0xa3c   : > { %4495 = vperm.xlu0 %4982, %v4400_v39   ;;  %4492 = vperm.xlu1 %4983, %v4399_v24  }
 0xa7f   : > { %v4406_v30 = vpop.permute.xlu1 %4405  ;;  %v4403_v63 = vpop.permute.xlu0 %4402 }
 0xa80   : > { %v4504_v51 = vrot.slane %v4406_v30, %v7500_v9  ;;  %v4500_v57 = vrot.slane %v4403_v63, %v7501_v6 }
 0xa82   : > { %v4505_v44 = vsel %vm1711_vm6, %v4504_v51, %v4500_v57 }
 0xa83   : > { %v4409_v20 = vpop.permute.xlu1 %4408  ;;  %v4412_v23 = vpop.permute.xlu0 %4411 }
 0xa84   : > { %v4509_v32 = vrot.slane %v4409_v20, %v7501_v6  ;;  %v4513_v21 = vrot.slane %v4412_v23, %v7500_v9 }
 0xa86   : > { %v4514_v37 = vsel %vm1711_vm6, %v4513_v21, %v4509_v32 }
 0xa87   : > { %v4415_v26 = vpop.permute.xlu1 %4414  ;;  %v4418_v43 = vpop.permute.xlu0 %4417  ;;  %v4641_v10 = vsel %vm1848_vm7, %v4514_v37, %v4505_v44 }
 0xa88   : > { %v4518_v55 = vrot.slane %v4415_v26, %v7501_v6  ;;  %v4522_v53 = vrot.slane %v4418_v43, %v7500_v9 }
 0xa8a   : > { %v4523_v52 = vsel %vm1711_vm6, %v4522_v53, %v4518_v55 }
 0xa8b   : > { %v4421_v11 = vpop.permute.xlu1 %4420  ;;  %v4424_v41 = vpop.permute.xlu0 %4423 }
 0xa8c   : > { %v4527_v7 = vrot.slane %v4421_v11, %v7501_v6  ;;  %v4531_v3 = vrot.slane %v4424_v41, %v7500_v9 }
 0xa8e   : > { %v4532_v50 = vsel %vm1711_vm6, %v4531_v3, %v4527_v7 }
 0xa8f   : > { %v4427_v19 = vpop.permute.xlu1 %4426  ;;  %v4430_v5 = vpop.permute.xlu0 %4429 }
 0xa90   : > { %v4536_v1 = vrot.slane %v4427_v19, %v7501_v6  ;;  %v4540_v47 = vrot.slane %v4430_v5, %v7500_v9  ;;  %v4642_v19 = vsel %vm1850_vm8, %v4523_v52, %v4641_v10  ;;  %v4902_v52 = vld [vmem:[%s7298_s16] ss:$0 sm:$0xff] }
 0xa92   : > { %v4541_v2 = vsel %vm1711_vm6, %v4540_v47, %v4536_v1 }
 0xa93   : > { %v7142_v40 = vpop.permute.xlu1 %4432  ;;  %v7144_v49 = vpop.permute.xlu0 %4435 }
 0xa94   : > { %v4545_v13 = vrot.slane %v7142_v40, %v7501_v6  ;;  %v4549_v15 = vrot.slane %v7144_v49, %v7500_v9  ;;  %v4643_v49 = vsel %vm1852_vm9, %v4532_v50, %v4642_v19 }
 0xa97   : > { %v7146_v33 = vpop.permute.xlu1 %4438  ;;  %v7148_v25 = vpop.permute.xlu0 %4441 }
 0xa98   : > { %v4554_v12 = vrot.slane %v7146_v33, %v7501_v6  ;;  %v4558_v58 = vrot.slane %v7148_v25, %v7500_v9  ;;  %v4550_v33 = vsel %vm1711_vm6, %v4549_v15, %v4545_v13 }
 0xa9b   : > { %v7150_v35 = vpop.permute.xlu1 %4444  ;;  %v7152_v22 = vpop.permute.xlu0 %4447 }
 0xa9c   : > { %v4563_v54 = vrot.slane %v7150_v35, %v7501_v6  ;;  %v4567_v30 = vrot.slane %v7152_v22, %v7500_v9  ;;  %v4644_v22 = vsel %vm1854_vm10, %v4541_v2, %v4643_v49 }
 0xa9f   : > { %v4451_v34 = vpop.permute.xlu1 %4450  ;;  %v4454_v45 = vpop.permute.xlu0 %4453 }
 0xaa0   : > { %v4572_v4 = vrot.slane %v4451_v34, %v7501_v6  ;;  %v4576_v36 = vrot.slane %v4454_v45, %v7500_v9  ;;  %v4559_v34 = vsel %vm1711_vm6, %v4558_v58, %v4554_v12 }
 0xaa2   : > { %v4577_v26 = vsel %vm1711_vm6, %v4576_v36, %v4572_v4 }
 0xaa3   : > { %v4457_v31 = vpop.permute.xlu1 %4456  ;;  %v4460_v8 = vpop.permute.xlu0 %4459 }
 0xaa4   : > { %v4581_v0 = vrot.slane %v4457_v31, %v7501_v6  ;;  %v4585_v28 = vrot.slane %v4460_v8, %v7500_v9 }
 0xaa6   : > { %v4586_v39 = vsel %vm1711_vm6, %v4585_v28, %v4581_v0 }
 0xaa7   : > { %v4463_v16 = vpop.permute.xlu1 %4462  ;;  %v4466_v29 = vpop.permute.xlu0 %4465  ;;  %v4648_v5 = vsel %vm1848_vm7, %v4586_v39, %v4577_v26 }
 0xaa8   : > { %v4590_v56 = vrot.slane %v4463_v16, %v7501_v6  ;;  %v4594_v48 = vrot.slane %v4466_v29, %v7500_v9  ;;  %v4568_v29 = vsel %vm1711_vm6, %v4567_v30, %v4563_v54 }
 0xaaa   : > { %v4595_v63 = vsel %vm1711_vm6, %v4594_v48, %v4590_v56  ;;  %v4903_v56 = vld [vmem:[%s7296_s14] ss:$0 sm:$0xff] }
 0xaab   : > { %v4469_v17 = vpop.permute.xlu1 %4468  ;;  %v4472_v18 = vpop.permute.xlu0 %4471  ;;  %v4649_v25 = vsel %vm1850_vm8, %v4595_v63, %v4648_v5 }
 0xaac   : > { %v4599_v60 = vrot.slane %v4469_v17, %v7501_v6  ;;  %v4603_v61 = vrot.slane %v4472_v18, %v7500_v9  ;;  %v4645_v18 = vsel %vm1856_vm11, %v4550_v33, %v4644_v22 }
 0xaad   : > { %v4646_v57 = vsel %vm1858_vm12, %v4559_v34, %v4645_v18 }
 0xaae   : > { %v4604_v43 = vsel %vm1711_vm6, %v4603_v61, %v4599_v60  ;;  %v4647_v53 = vsel %vm1860_vm13, %v4568_v29, %v4646_v57 }
 0xaaf   : > { %v4475_v38 = vpop.permute.xlu1 %4474  ;;  %v4478_v62 = vpop.permute.xlu0 %4477  ;;  %v4650_v45 = vsel %vm1852_vm9, %v4604_v43, %v4649_v25 }
 0xab0   : > { %v4608_v46 = vrot.slane %v4475_v38, %v7501_v6  ;;  %v4612_v59 = vrot.slane %v4478_v62, %v7500_v9  ;;  %v4899_v38 = vld [vmem:[%s7295_s13] ss:$0 sm:$0xff] }
 0xab2   : > { %v4613_v40 = vsel %vm1711_vm6, %v4612_v59, %v4608_v46 }
 0xab3   : > { %v4481_v14 = vpop.permute.xlu1 %4480  ;;  %v4484_v42 = vpop.permute.xlu0 %4483  ;;  %v4651_v32 = vsel %vm1854_vm10, %v4613_v40, %v4650_v45 }
 0xab4   : > { %v4617_v24 = vrot.slane %v4481_v14, %v7501_v6  ;;  %v4621_v27 = vrot.slane %v4484_v42, %v7500_v9 }
 0xab6   : > { %v4622_v35 = vsel %vm1711_vm6, %v4621_v27, %v4617_v24 }
 0xab7   : > { %v4487_v20 = vpop.permute.xlu1 %4486  ;;  %v4490_v23 = vpop.permute.xlu0 %4489  ;;  %v4652_v51 = vsel %vm1856_vm11, %v4622_v35, %v4651_v32 }
 0xab8   : > { %v4626_v11 = vrot.slane %v4487_v20, %v7501_v6  ;;  %v4630_v41 = vrot.slane %v4490_v23, %v7500_v9 }
 0xaba   : > { %v4631_v31 = vsel %vm1711_vm6, %v4630_v41, %v4626_v11 }
 0xabb   : > { %v4493_v8 = vpop.permute.xlu1 %4492  ;;  %v4496_v16 = vpop.permute.xlu0 %4495  ;;  %v4653_v37 = vsel %vm1858_vm12, %v4631_v31, %v4652_v51 }
 0xabc   : > { %v4635_v21 = vrot.slane %v4493_v8, %v7501_v6  ;;  %v4639_v17 = vrot.slane %v4496_v16, %v7500_v9 }
 0xabe   : > { %v4640_v55 = vsel %vm1711_vm6, %v4639_v17, %v4635_v21 }
 0xabf   : > { %v4654_v7 = vsel %vm1860_vm13, %v4640_v55, %v4653_v37 }
 0xac0   : > { %v4655_v3 = vpack.c.b16 %v4654_v7, %v4647_v53 }
 0xac2   : > { %4928 = vmatmul.mubr.msk.bf16.vlgmr.msra.gmra.mrb[4].mxu1 %vm1871_vm14, %v4655_v3 }
 0xafc   : > { %v4738_v6 = vpop.f32.mrb[8].mxu0 }
 0xafd   : > { %v4935_v1 = vpop.f32.mrb[9].mxu0 }
 0xafe   : > { %v4741_v9 = vpop.f32.mrb[10].mxu0 }
 0xaff   : > { %v4936_v47 = vpop.f32.mrb[11].mxu0 }
 0xb95   : > { %v4693_v62 = vpop.f32.mrb[4].mxu1 }
 0xb96   : > { %v4694_v44 = vadd.f32 %v4899_v38, %v4693_v62  ;;  %v4929_v10 = vpop.f32.mrb[5].mxu1 }
 0xb97   : > { %v4696_v0 = vpop.f32.mrb[6].mxu1 }
 0xb98   : > { %v4745_v28 = vadd.f32 %v4738_v6, %v4694_v44  ;;  %v4697_v50 = vadd.f32 %v4899_v38, %v4696_v0  ;;  %v4930_v2 = vpop.f32.mrb[7].mxu1 }
 0xb9a   : > { %v4754_v48 = vadd.f32 %v4902_v52, %v4745_v28  ;;  %v4746_v14 = vadd.f32 %v4741_v9, %v4697_v50 }
 0xb9c   : > { %vm4757_vm0 = vcmp.ge.f32.partialorder %v4754_v48, 0.0  ;;  %v4765_v42 = vmul.f32 %v4903_v56, %v4754_v48  ;;  %v4755_v4 = vadd.f32 %v4902_v52, %v4746_v14 }
 0xb9e   : > { %v4767_v36 = vsel %vm4757_vm0, %v4754_v48, %v4765_v42  ;;  %vm4758_vm6 = vcmp.ge.f32.partialorder %v4755_v4, 0.0  ;;  %v4766_v60 = vmul.f32 %v4903_v56, %v4755_v4 }
 0xb9f   : > { %4769 = vst [vmem:[%s571_s19] sm:$0xff] %v4767_v36 }
 0xba0   : > { %v4768_v61 = vsel %vm4758_vm6, %v4755_v4, %v4766_v60 }
 0xba1   : > { %4770 = vst [vmem:[%s571_s19 + $0x8] sm:$0xff] %v4768_v61 }
 0xba2   : > { %5143 = shalt.err (!%p5140_p3)
}
 0xba3   : > { %s5144_s3 = scalar_lea.hbm %s7237_s21, 256  ;;  %s5148_s18 = scalar_lea.hbm %s7299_s17, 1024 }
 0xba4   : > { %p5145_p4 = scmp.ne.s32.totalorder %s7237_s21, %s5144_s3  ;;  %p5149_p9 = scmp.lt.u32.totalorder %s7237_s21, %s7299_s17 }
 0xba5   : > { %p5150_p10 = scmp.lt.u32.totalorder %s5148_s18, %s5144_s3  ;;  %p5152_p12 = scmp.lt.u32.totalorder %s5144_s3, %s7237_s21 }
 0xba6   : > { %p5146_p7 = pnand %p5145_p4, %p5329_p5 }
 0xba7   : > { %p5151_p11 = por %p5150_p10, %p5149_p9 }
 0xba8   : > { %p5147_p8 = pneg %p5146_p7 }
 0xba9   : > { %p5153_p13 = por %p5152_p12, %p5151_p11 }
 0xbab   : > { %p5154_p0 = pnand %p5153_p13, %p5147_p8 }
 0xbad   : > { %5157 = shalt.err (!%p5154_p0)
}
 0xbae   : > { %s5199_s30 = smov 128   ;;  %s5200_s0 = smov 8  }
 0xbaf   : > { %4937 = dma.vmem_to_hbm [thread:$0]  (%p5329_p5), %s7239_s29, 256, %s7237_s21, %s7241_s28, %s5199_s30, %s5199_s30, %s5200_s0  }
 0xbb0 PF: > { %p4943_p1 = scmp.ge.s32.totalorder %s5192_s27, 2  ;;  %s4800_s19 = sand.u32 1, %s5180_s24  }
 0xbb1   : > { %s4801_s3 = scalar_lea.sflag [#allocation3], %s4800_s19 }
 0xbb2   : > { %p4940_p2 = pnand %p4943_p1, %p5333_p6 }
 0xbb4   : > { %5175 = dma.done.wait (!%p4940_p2), %s4801_s3, 256  }
 0xbb5   : > { %5177 = vsyncadd (!%p4940_p2), %s4801_s3, 4294967040  ;;  %s7612_s27 = sld [smem:[#allocation6_spill]]  ;;  %s7613_s23 = sld [smem:[#allocation5_spill]] }
 0xbb6   : > { %s7614_s26 = sld [smem:[#allocation7_spill]]  ;;  %s7615_s24 = smov %s5184_s25 }
 0xbbb   : > { %p27_p3 = scmp.ge.s32.totalorder %s7612_s27, 6   ;;  %s7616_s25 = smov %s7613_s23 }
 0xbbd   :  { %29 = sbr.rel (!%p27_p3) target bundleno = 7 (0x7), region = 129 }
 0xbc4   :  { %4806 = vsyncpa [#allocation3], 1 }
 0xbc5   :  { %4808 = vsyncpa [#allocation3 + $0x1], 1 }

</bundles_post_ra>
